<compile_context>
chip_gen: v7x
topology: tpu7x:2x2x1
jax: 0.10.0
libtpu: 0.0.40
codegen_flags: <defaults>
</compile_context>

<pallas_src>
import functools

import jax
import jax.numpy as jnp
from jax.experimental import pallas as pl
from jax.experimental.pallas import tpu as pltpu


# ----------------------------- fused Pallas kernel -------------------------

def _fused_bert_kernel(ids_ref, mask_ref, emb_ref, wmat_ref, bvec_ref, ln_ref,
                       o_ref, *, num_heads):
    S = ids_ref.shape[0]
    V, H = emb_ref.shape
    nh = num_heads
    dh = H // nh
    bf = lambda a: a.astype(jnp.bfloat16)

    # ---- embedding lookup fused in-kernel: one-hot @ table on the MXU (exact). ----
    ids = ids_ref[...]                                              # (S, 1) int32
    onehot = (ids == jax.lax.broadcasted_iota(jnp.int32, (S, V), 1)
              ).astype(jnp.float32)                                 # (S, V)
    x = jnp.dot(onehot, emb_ref[...],
                preferred_element_type=jnp.float32)                 # (S, H) f32

    mask = mask_ref[...]                                            # (S, S) f32

    # Packed-weight slices: column block c0..c0+cn (in units of H) of wmat/bvec.
    def proj(h, c0, cn, relu=False):
        w = wmat_ref[:, c0 * H:(c0 + cn) * H]                       # (H, cn*H) bf16
        b = bvec_ref[:, c0 * H:(c0 + cn) * H]                       # (1, cn*H) f32
        y = jnp.dot(bf(h), w, preferred_element_type=jnp.float32) + b
        return jnp.maximum(y, 0.0) if relu else y

    def layer_norm(h, row, eps=1e-5):
        g = ln_ref[row:row + 1, :]                                  # (1, H)
        b = ln_ref[row + 1:row + 2, :]
        mu = jnp.mean(h, axis=-1, keepdims=True)
        hc = h - mu
        var = jnp.mean(hc * hc, axis=-1, keepdims=True)
        return hc * jax.lax.rsqrt(var + eps) * g + b

    def softmax(s):                                                 # f32 throughout
        m = jnp.max(s, axis=-1, keepdims=True)
        e = jnp.exp(s - m)
        return e / jnp.sum(e, axis=-1, keepdims=True)

    def attention(q_all, k_all, v_all, wo_c0, add_mask):
        # q_all already carries the 1/sqrt(dh) scale (folded into Wq/bq on the host).
        ctx_parts = []
        for h in range(nh):                                         # static unroll, nh=4
            sl = slice(h * dh, (h + 1) * dh)
            qh, kh, vh = q_all[:, sl], k_all[:, sl], v_all[:, sl]
            s = jax.lax.dot_general(bf(qh), bf(kh),
                                    (((1,), (1,)), ((), ())),       # q @ k^T
                                    preferred_element_type=jnp.float32)
            if add_mask:                                            # static option
                s = s + mask
            p = softmax(s)
            ctx_parts.append(jnp.dot(bf(p), bf(vh),
                                     preferred_element_type=jnp.float32))
        ctx = jnp.concatenate(ctx_parts, axis=1)                    # (S, H) head-concat
        return proj(ctx, wo_c0, 1)                                  # single out-proj matmul

    # ----- encoder layer (post-norm; additive src_mask = attention_mask) -----
    qkv = proj(x, 0, 3)                                             # fused QKV (S, 3H)
    a = attention(qkv[:, :H], qkv[:, H:2 * H], qkv[:, 2 * H:], wo_c0=3, add_mask=True)
    x = layer_norm(x + a, 0)
    ff = proj(proj(x, 4, 1, relu=True), 5, 1)
    x = layer_norm(x + ff, 2)

    # ----- decoder layer (memory = attention_mask; needs S == H, module quirk) -----
    memory = mask
    qkv = proj(x, 6, 3)                                             # decoder self-attn QKV
    a = attention(qkv[:, :H], qkv[:, H:2 * H], qkv[:, 2 * H:], wo_c0=9, add_mask=False)
    y = layer_norm(x + a, 4)

    q_all = proj(y, 10, 1)                                          # cross-attn Q
    kv = proj(memory, 11, 2)                                        # cross-attn fused K/V
    a = attention(q_all, kv[:, :H], kv[:, H:], wo_c0=13, add_mask=False)
    y = layer_norm(y + a, 6)

    ff = proj(proj(y, 14, 1, relu=True), 15, 1)
    y = layer_norm(y + ff, 8)

    o_ref[...] = y


# ----------------------------- wrapper / plumbing ---------------------------

def _full_block(shape):
    nd = len(shape)
    return pl.BlockSpec(shape, lambda i, _nd=nd: (0,) * _nd)


def pack_params(params, num_heads):
    """Host-side, ONCE at init: fold the q-scale, fuse QKV weights, and pack all
    matmul weights / biases / LN params into a handful of flat buffers so the
    kernel needs only 5 input DMAs."""
    H = params["embedding"].shape[1]
    dh = H // num_heads
    scale = 1.0 / float(dh) ** 0.5
    enc, dec = params["encoder"], params["decoder"]

    def qkv_w(ap):
        return jnp.concatenate([ap["wq"] * scale, ap["wk"], ap["wv"]], axis=1)

    def qkv_b(ap):
        return jnp.concatenate([ap["bq"] * scale, ap["bk"], ap["bv"]], axis=1)

    cr = dec["cross_attn"]
    # Column layout (units of H):
    #  0-2 enc qkv | 3 enc wo | 4 enc w1 | 5 enc w2 | 6-8 dec self qkv | 9 dec self wo
    #  10 dec cross q | 11-12 dec cross kv | 13 dec cross wo | 14 dec w1 | 15 dec w2
    wmat = jnp.concatenate([
        qkv_w(enc["self_attn"]), enc["self_attn"]["wo"], enc["w1"], enc["w2"],
        qkv_w(dec["self_attn"]), dec["self_attn"]["wo"],
        cr["wq"] * scale, jnp.concatenate([cr["wk"], cr["wv"]], axis=1), cr["wo"],
        dec["w1"], dec["w2"],
    ], axis=1).astype(jnp.bfloat16)                                 # (H, 16H) bf16

    bvec = jnp.concatenate([
        qkv_b(enc["self_attn"]), enc["self_attn"]["bo"], enc["b1"], enc["b2"],
        qkv_b(dec["self_attn"]), dec["self_attn"]["bo"],
        cr["bq"] * scale, jnp.concatenate([cr["bk"], cr["bv"]], axis=1), cr["bo"],
        dec["b1"], dec["b2"],
    ], axis=1).astype(jnp.float32)                                  # (1, 16H) f32

    # LN rows: 0-1 enc ln1 | 2-3 enc ln2 | 4-5 dec ln1 | 6-7 dec ln2 | 8-9 dec ln3
    lnvec = jnp.concatenate([
        enc["ln1_g"], enc["ln1_b"], enc["ln2_g"], enc["ln2_b"],
        dec["ln1_g"], dec["ln1_b"], dec["ln2_g"], dec["ln2_b"],
        dec["ln3_g"], dec["ln3_b"],
    ], axis=0).astype(jnp.float32)                                  # (10, H) f32

    return {"emb": params["embedding"].astype(jnp.float32),
            "wmat": wmat, "bvec": bvec, "ln": lnvec}


@functools.partial(jax.jit, static_argnames="num_heads")
def bert_forward(packed, input_ids, attention_mask, *, num_heads):
    H = packed["emb"].shape[1]
    S = input_ids.shape[0]
    ids2d = input_ids.reshape(S, 1).astype(jnp.int32)

    kernel = functools.partial(_fused_bert_kernel, num_heads=num_heads)

    return pl.pallas_call(
        kernel,
        out_shape=jax.ShapeDtypeStruct((S, H), jnp.float32),
        grid=(1,),
        in_specs=[_full_block(ids2d.shape),
                  _full_block(attention_mask.shape),
                  _full_block(packed["emb"].shape),
                  _full_block(packed["wmat"].shape),
                  _full_block(packed["bvec"].shape),
                  _full_block(packed["ln"].shape)],
        out_specs=_full_block((S, H)),
        compiler_params=pltpu.CompilerParams(
            dimension_semantics=("arbitrary",)),
    )(ids2d, attention_mask, packed["emb"], packed["wmat"],
      packed["bvec"], packed["ln"])


# ----------------------------- parameter init ------------------------------

def _attn_params(key, H, scale=0.1):
    ks = jax.random.split(key, 8)
    return {
        "wq": scale * jax.random.normal(ks[0], (H, H), jnp.float32),
        "bq": scale * jax.random.normal(ks[1], (1, H), jnp.float32),
        "wk": scale * jax.random.normal(ks[2], (H, H), jnp.float32),
        "bk": scale * jax.random.normal(ks[3], (1, H), jnp.float32),
        "wv": scale * jax.random.normal(ks[4], (H, H), jnp.float32),
        "bv": scale * jax.random.normal(ks[5], (1, H), jnp.float32),
        "wo": scale * jax.random.normal(ks[6], (H, H), jnp.float32),
        "bo": scale * jax.random.normal(ks[7], (1, H), jnp.float32),
    }


def init_params(key, vocab_size, H):
    k_emb, k_enc, k_dec = jax.random.split(key, 3)
    ke = jax.random.split(k_enc, 2)
    kd = jax.random.split(k_dec, 3)
    scale = 0.1
    ones = jnp.ones((1, H), jnp.float32)
    zeros = jnp.zeros((1, H), jnp.float32)

    def ffn(k):
        k1, k2, k3, k4 = jax.random.split(k, 4)
        return {
            "w1": scale * jax.random.normal(k1, (H, H), jnp.float32),  # dim_feedforward == H
            "b1": scale * jax.random.normal(k2, (1, H), jnp.float32),
            "w2": scale * jax.random.normal(k3, (H, H), jnp.float32),
            "b2": scale * jax.random.normal(k4, (1, H), jnp.float32),
        }

    encoder = {
        "self_attn": _attn_params(ke[0], H),
        "ln1_g": ones, "ln1_b": zeros, "ln2_g": ones, "ln2_b": zeros,
        **ffn(ke[1]),
    }
    decoder = {
        "self_attn": _attn_params(kd[0], H),
        "cross_attn": _attn_params(kd[1], H),
        "ln1_g": ones, "ln1_b": zeros, "ln2_g": ones, "ln2_b": zeros,
        "ln3_g": ones, "ln3_b": zeros,
        **ffn(kd[2]),
    }
    return {
        "embedding": jax.random.normal(k_emb, (vocab_size, H), jnp.float32),
        "encoder": encoder,
        "decoder": decoder,
    }


# --------------------------------- main -------------------------------------

if __name__ == "__main__":
    vocab_size = 64
    hidden_size = 32
    num_layers = 2          # module builds exactly one encoder + one decoder layer
    num_heads = 4
    seq_len = hidden_size   # S must equal H (attention_mask doubles as decoder memory)

    key = jax.random.PRNGKey(0)
    k_p, k_ids, k_mask = jax.random.split(key, 3)

    params = init_params(k_p, vocab_size, hidden_size)
    packed = pack_params(params, num_heads)   # one-time, outside the jitted forward

    input_ids = jax.random.randint(k_ids, (seq_len,), 0, vocab_size, jnp.int32)
    attention_mask = 0.1 * jax.random.normal(k_mask, (seq_len, seq_len), jnp.float32)

    out = bert_forward(packed, input_ids, attention_mask, num_heads=num_heads)
    out = jax.block_until_ready(out)

    assert out.shape == (seq_len, hidden_size)
    assert bool(jnp.all(jnp.isfinite(out)))
    print("KERNEL_OK")
</pallas_src>

<mosaic_0001>
module attributes {stable_mosaic.version = 11 : i64} {
  func.func @_fused_bert_kernel(%arg0: i32, %arg1: memref<32x1xi32, #tpu.memory_space<vmem>>, %arg2: memref<32x32xf32, #tpu.memory_space<vmem>>, %arg3: memref<64x32xf32, #tpu.memory_space<vmem>>, %arg4: memref<32x512xbf16, #tpu.memory_space<vmem>>, %arg5: memref<1x512xf32, #tpu.memory_space<vmem>>, %arg6: memref<10x32xf32, #tpu.memory_space<vmem>>, %arg7: memref<32x32xf32, #tpu.memory_space<vmem>>) attributes {dimension_semantics = [#tpu.dimension_semantics<arbitrary>], iteration_bounds = array<i64: 1>, scalar_prefetch = 0 : i64, scratch_operands = 0 : i64, tpu.core_type = #tpu.core_type<tc>, window_params = [{pipeline_mode = #tpu.pipeline_mode<synchronous>, transform_indices = @transform_0, window_bounds = array<i64: 32, 1>}, {pipeline_mode = #tpu.pipeline_mode<synchronous>, transform_indices = @transform_1, window_bounds = array<i64: 32, 32>}, {pipeline_mode = #tpu.pipeline_mode<synchronous>, transform_indices = @transform_2, window_bounds = array<i64: 64, 32>}, {pipeline_mode = #tpu.pipeline_mode<synchronous>, transform_indices = @transform_3, window_bounds = array<i64: 32, 512>}, {pipeline_mode = #tpu.pipeline_mode<synchronous>, transform_indices = @transform_4, window_bounds = array<i64: 1, 512>}, {pipeline_mode = #tpu.pipeline_mode<synchronous>, transform_indices = @transform_5, window_bounds = array<i64: 10, 32>}, {pipeline_mode = #tpu.pipeline_mode<synchronous>, transform_indices = @transform_6, window_bounds = array<i64: 32, 32>}]} {
    %c0 = arith.constant 0 : index
    %c0_0 = arith.constant 0 : index
    %0 = vector.load %arg1[%c0, %c0_0] : memref<32x1xi32, #tpu.memory_space<vmem>>, vector<32x1xi32>
    %1 = tpu.iota {dimensions = array<i32: 1>} : vector<32x64xi32>
    %2 = vector.broadcast %0 : vector<32x1xi32> to vector<32x64xi32>
    %3 = arith.cmpi eq, %2, %1 : vector<32x64xi32>
    %4 = arith.extui %3 : vector<32x64xi1> to vector<32x64xi32>
    %5 = arith.sitofp %4 : vector<32x64xi32> to vector<32x64xf32>
    %c0_1 = arith.constant 0 : index
    %c0_2 = arith.constant 0 : index
    %6 = vector.load %arg3[%c0_1, %c0_2] : memref<64x32xf32, #tpu.memory_space<vmem>>, vector<64x32xf32>
    %cst = arith.constant dense<0.000000e+00> : vector<32x32xf32>
    %7 = tpu.matmul %5, %6, %cst {dimension_numbers = #tpu.dot_dimension_numbers<[1], [0], [0], [1], [0, 0, 1, 1], [], []>} : vector<32x64xf32>, vector<64x32xf32>, vector<32x32xf32> -> vector<32x32xf32>
    %c0_3 = arith.constant 0 : index
    %c0_4 = arith.constant 0 : index
    %8 = vector.load %arg2[%c0_3, %c0_4] : memref<32x32xf32, #tpu.memory_space<vmem>>, vector<32x32xf32>
    %c0_5 = arith.constant 0 : index
    %c0_6 = arith.constant 0 : index
    %9 = vector.load %arg4[%c0_5, %c0_6] : memref<32x512xbf16, #tpu.memory_space<vmem>>, vector<32x96xbf16>
    %c0_7 = arith.constant 0 : index
    %c0_8 = arith.constant 0 : index
    %10 = vector.load %arg5[%c0_7, %c0_8] : memref<1x512xf32, #tpu.memory_space<vmem>>, vector<1x96xf32>
    %11 = arith.truncf %7 : vector<32x32xf32> to vector<32x32xbf16>
    %cst_9 = arith.constant dense<0.000000e+00> : vector<32x96xf32>
    %12 = tpu.matmul %11, %9, %cst_9 {dimension_numbers = #tpu.dot_dimension_numbers<[1], [0], [0], [1], [0, 0, 1, 1], [], []>} : vector<32x32xbf16>, vector<32x96xbf16>, vector<32x96xf32> -> vector<32x96xf32>
    %13 = vector.broadcast %10 : vector<1x96xf32> to vector<32x96xf32>
    %14 = arith.addf %12, %13 : vector<32x96xf32>
    %15 = vector.extract_strided_slice %14 {offsets = [0, 0], sizes = [32, 32], strides = [1, 1]} : vector<32x96xf32> to vector<32x32xf32>
    %16 = vector.extract_strided_slice %14 {offsets = [0, 32], sizes = [32, 32], strides = [1, 1]} : vector<32x96xf32> to vector<32x32xf32>
    %17 = vector.extract_strided_slice %14 {offsets = [0, 64], sizes = [32, 32], strides = [1, 1]} : vector<32x96xf32> to vector<32x32xf32>
    %18 = vector.extract_strided_slice %15 {offsets = [0, 0], sizes = [32, 8], strides = [1, 1]} : vector<32x32xf32> to vector<32x8xf32>
    %19 = vector.extract_strided_slice %16 {offsets = [0, 0], sizes = [32, 8], strides = [1, 1]} : vector<32x32xf32> to vector<32x8xf32>
    %20 = vector.extract_strided_slice %17 {offsets = [0, 0], sizes = [32, 8], strides = [1, 1]} : vector<32x32xf32> to vector<32x8xf32>
    %21 = arith.truncf %18 : vector<32x8xf32> to vector<32x8xbf16>
    %22 = arith.truncf %19 : vector<32x8xf32> to vector<32x8xbf16>
    %cst_10 = arith.constant dense<0.000000e+00> : vector<32x32xf32>
    %23 = tpu.matmul %21, %22, %cst_10 {dimension_numbers = #tpu.dot_dimension_numbers<[1], [1], [0], [0], [0, 0, 1, 0], [], []>} : vector<32x8xbf16>, vector<32x8xbf16>, vector<32x32xf32> -> vector<32x32xf32>
    %24 = arith.addf %23, %8 : vector<32x32xf32>
    %cst_11 = arith.constant dense<0xFF800000> : vector<32xf32>
    %25 = vector.multi_reduction <maximumf>, %24, %cst_11 [1] : vector<32x32xf32> to vector<32xf32>
    %26 = vector.shape_cast %25 : vector<32xf32> to vector<32x1xf32>
    %27 = vector.broadcast %26 : vector<32x1xf32> to vector<32x32xf32>
    %28 = arith.subf %24, %27 : vector<32x32xf32>
    %29 = math.exp %28 : vector<32x32xf32>
    %cst_12 = arith.constant dense<0.000000e+00> : vector<32xf32>
    %30 = vector.multi_reduction <add>, %29, %cst_12 [1] : vector<32x32xf32> to vector<32xf32>
    %31 = vector.shape_cast %30 : vector<32xf32> to vector<32x1xf32>
    %32 = vector.broadcast %31 : vector<32x1xf32> to vector<32x32xf32>
    %33 = arith.divf %29, %32 : vector<32x32xf32>
    %34 = arith.truncf %33 : vector<32x32xf32> to vector<32x32xbf16>
    %35 = arith.truncf %20 : vector<32x8xf32> to vector<32x8xbf16>
    %cst_13 = arith.constant dense<0.000000e+00> : vector<32x8xf32>
    %36 = tpu.matmul %34, %35, %cst_13 {dimension_numbers = #tpu.dot_dimension_numbers<[1], [0], [0], [1], [0, 0, 1, 1], [], []>} : vector<32x32xbf16>, vector<32x8xbf16>, vector<32x8xf32> -> vector<32x8xf32>
    %37 = vector.extract_strided_slice %15 {offsets = [0, 8], sizes = [32, 8], strides = [1, 1]} : vector<32x32xf32> to vector<32x8xf32>
    %38 = vector.extract_strided_slice %16 {offsets = [0, 8], sizes = [32, 8], strides = [1, 1]} : vector<32x32xf32> to vector<32x8xf32>
    %39 = vector.extract_strided_slice %17 {offsets = [0, 8], sizes = [32, 8], strides = [1, 1]} : vector<32x32xf32> to vector<32x8xf32>
    %40 = arith.truncf %37 : vector<32x8xf32> to vector<32x8xbf16>
    %41 = arith.truncf %38 : vector<32x8xf32> to vector<32x8xbf16>
    %cst_14 = arith.constant dense<0.000000e+00> : vector<32x32xf32>
    %42 = tpu.matmul %40, %41, %cst_14 {dimension_numbers = #tpu.dot_dimension_numbers<[1], [1], [0], [0], [0, 0, 1, 0], [], []>} : vector<32x8xbf16>, vector<32x8xbf16>, vector<32x32xf32> -> vector<32x32xf32>
    %43 = arith.addf %42, %8 : vector<32x32xf32>
    %cst_15 = arith.constant dense<0xFF800000> : vector<32xf32>
    %44 = vector.multi_reduction <maximumf>, %43, %cst_15 [1] : vector<32x32xf32> to vector<32xf32>
    %45 = vector.shape_cast %44 : vector<32xf32> to vector<32x1xf32>
    %46 = vector.broadcast %45 : vector<32x1xf32> to vector<32x32xf32>
    %47 = arith.subf %43, %46 : vector<32x32xf32>
    %48 = math.exp %47 : vector<32x32xf32>
    %cst_16 = arith.constant dense<0.000000e+00> : vector<32xf32>
    %49 = vector.multi_reduction <add>, %48, %cst_16 [1] : vector<32x32xf32> to vector<32xf32>
    %50 = vector.shape_cast %49 : vector<32xf32> to vector<32x1xf32>
    %51 = vector.broadcast %50 : vector<32x1xf32> to vector<32x32xf32>
    %52 = arith.divf %48, %51 : vector<32x32xf32>
    %53 = arith.truncf %52 : vector<32x32xf32> to vector<32x32xbf16>
    %54 = arith.truncf %39 : vector<32x8xf32> to vector<32x8xbf16>
    %cst_17 = arith.constant dense<0.000000e+00> : vector<32x8xf32>
    %55 = tpu.matmul %53, %54, %cst_17 {dimension_numbers = #tpu.dot_dimension_numbers<[1], [0], [0], [1], [0, 0, 1, 1], [], []>} : vector<32x32xbf16>, vector<32x8xbf16>, vector<32x8xf32> -> vector<32x8xf32>
    %56 = vector.extract_strided_slice %15 {offsets = [0, 16], sizes = [32, 8], strides = [1, 1]} : vector<32x32xf32> to vector<32x8xf32>
    %57 = vector.extract_strided_slice %16 {offsets = [0, 16], sizes = [32, 8], strides = [1, 1]} : vector<32x32xf32> to vector<32x8xf32>
    %58 = vector.extract_strided_slice %17 {offsets = [0, 16], sizes = [32, 8], strides = [1, 1]} : vector<32x32xf32> to vector<32x8xf32>
    %59 = arith.truncf %56 : vector<32x8xf32> to vector<32x8xbf16>
    %60 = arith.truncf %57 : vector<32x8xf32> to vector<32x8xbf16>
    %cst_18 = arith.constant dense<0.000000e+00> : vector<32x32xf32>
    %61 = tpu.matmul %59, %60, %cst_18 {dimension_numbers = #tpu.dot_dimension_numbers<[1], [1], [0], [0], [0, 0, 1, 0], [], []>} : vector<32x8xbf16>, vector<32x8xbf16>, vector<32x32xf32> -> vector<32x32xf32>
    %62 = arith.addf %61, %8 : vector<32x32xf32>
    %cst_19 = arith.constant dense<0xFF800000> : vector<32xf32>
    %63 = vector.multi_reduction <maximumf>, %62, %cst_19 [1] : vector<32x32xf32> to vector<32xf32>
    %64 = vector.shape_cast %63 : vector<32xf32> to vector<32x1xf32>
    %65 = vector.broadcast %64 : vector<32x1xf32> to vector<32x32xf32>
    %66 = arith.subf %62, %65 : vector<32x32xf32>
    %67 = math.exp %66 : vector<32x32xf32>
    %cst_20 = arith.constant dense<0.000000e+00> : vector<32xf32>
    %68 = vector.multi_reduction <add>, %67, %cst_20 [1] : vector<32x32xf32> to vector<32xf32>
    %69 = vector.shape_cast %68 : vector<32xf32> to vector<32x1xf32>
    %70 = vector.broadcast %69 : vector<32x1xf32> to vector<32x32xf32>
    %71 = arith.divf %67, %70 : vector<32x32xf32>
    %72 = arith.truncf %71 : vector<32x32xf32> to vector<32x32xbf16>
    %73 = arith.truncf %58 : vector<32x8xf32> to vector<32x8xbf16>
    %cst_21 = arith.constant dense<0.000000e+00> : vector<32x8xf32>
    %74 = tpu.matmul %72, %73, %cst_21 {dimension_numbers = #tpu.dot_dimension_numbers<[1], [0], [0], [1], [0, 0, 1, 1], [], []>} : vector<32x32xbf16>, vector<32x8xbf16>, vector<32x8xf32> -> vector<32x8xf32>
    %75 = vector.extract_strided_slice %15 {offsets = [0, 24], sizes = [32, 8], strides = [1, 1]} : vector<32x32xf32> to vector<32x8xf32>
    %76 = vector.extract_strided_slice %16 {offsets = [0, 24], sizes = [32, 8], strides = [1, 1]} : vector<32x32xf32> to vector<32x8xf32>
    %77 = vector.extract_strided_slice %17 {offsets = [0, 24], sizes = [32, 8], strides = [1, 1]} : vector<32x32xf32> to vector<32x8xf32>
    %78 = arith.truncf %75 : vector<32x8xf32> to vector<32x8xbf16>
    %79 = arith.truncf %76 : vector<32x8xf32> to vector<32x8xbf16>
    %cst_22 = arith.constant dense<0.000000e+00> : vector<32x32xf32>
    %80 = tpu.matmul %78, %79, %cst_22 {dimension_numbers = #tpu.dot_dimension_numbers<[1], [1], [0], [0], [0, 0, 1, 0], [], []>} : vector<32x8xbf16>, vector<32x8xbf16>, vector<32x32xf32> -> vector<32x32xf32>
    %81 = arith.addf %80, %8 : vector<32x32xf32>
    %cst_23 = arith.constant dense<0xFF800000> : vector<32xf32>
    %82 = vector.multi_reduction <maximumf>, %81, %cst_23 [1] : vector<32x32xf32> to vector<32xf32>
    %83 = vector.shape_cast %82 : vector<32xf32> to vector<32x1xf32>
    %84 = vector.broadcast %83 : vector<32x1xf32> to vector<32x32xf32>
    %85 = arith.subf %81, %84 : vector<32x32xf32>
    %86 = math.exp %85 : vector<32x32xf32>
    %cst_24 = arith.constant dense<0.000000e+00> : vector<32xf32>
    %87 = vector.multi_reduction <add>, %86, %cst_24 [1] : vector<32x32xf32> to vector<32xf32>
    %88 = vector.shape_cast %87 : vector<32xf32> to vector<32x1xf32>
    %89 = vector.broadcast %88 : vector<32x1xf32> to vector<32x32xf32>
    %90 = arith.divf %86, %89 : vector<32x32xf32>
    %91 = arith.truncf %90 : vector<32x32xf32> to vector<32x32xbf16>
    %92 = arith.truncf %77 : vector<32x8xf32> to vector<32x8xbf16>
    %cst_25 = arith.constant dense<0.000000e+00> : vector<32x8xf32>
    %93 = tpu.matmul %91, %92, %cst_25 {dimension_numbers = #tpu.dot_dimension_numbers<[1], [0], [0], [1], [0, 0, 1, 1], [], []>} : vector<32x32xbf16>, vector<32x8xbf16>, vector<32x8xf32> -> vector<32x8xf32>
    %94 = tpu.concatenate %36, %55, %74, %93 in 1 : vector<32x8xf32>, vector<32x8xf32>, vector<32x8xf32>, vector<32x8xf32> -> vector<32x32xf32>
    %c0_26 = arith.constant 0 : index
    %c96 = arith.constant 96 : index
    %95 = vector.load %arg4[%c0_26, %c96] : memref<32x512xbf16, #tpu.memory_space<vmem>>, vector<32x32xbf16>
    %c0_27 = arith.constant 0 : index
    %c96_28 = arith.constant 96 : index
    %96 = vector.load %arg5[%c0_27, %c96_28] : memref<1x512xf32, #tpu.memory_space<vmem>>, vector<1x32xf32>
    %97 = arith.truncf %94 : vector<32x32xf32> to vector<32x32xbf16>
    %cst_29 = arith.constant dense<0.000000e+00> : vector<32x32xf32>
    %98 = tpu.matmul %97, %95, %cst_29 {dimension_numbers = #tpu.dot_dimension_numbers<[1], [0], [0], [1], [0, 0, 1, 1], [], []>} : vector<32x32xbf16>, vector<32x32xbf16>, vector<32x32xf32> -> vector<32x32xf32>
    %99 = vector.broadcast %96 : vector<1x32xf32> to vector<32x32xf32>
    %100 = arith.addf %98, %99 : vector<32x32xf32>
    %101 = arith.addf %7, %100 : vector<32x32xf32>
    %c0_30 = arith.constant 0 : index
    %c0_31 = arith.constant 0 : index
    %102 = vector.load %arg6[%c0_30, %c0_31] : memref<10x32xf32, #tpu.memory_space<vmem>>, vector<1x32xf32>
    %c1 = arith.constant 1 : index
    %c0_32 = arith.constant 0 : index
    %103 = vector.load %arg6[%c1, %c0_32] : memref<10x32xf32, #tpu.memory_space<vmem>>, vector<1x32xf32>
    %cst_33 = arith.constant dense<0.000000e+00> : vector<32xf32>
    %104 = vector.multi_reduction <add>, %101, %cst_33 [1] : vector<32x32xf32> to vector<32xf32>
    %105 = vector.shape_cast %104 : vector<32xf32> to vector<32x1xf32>
    %cst_34 = arith.constant 3.200000e+01 : f32
    %106 = vector.broadcast %cst_34 : f32 to vector<32x1xf32>
    %107 = arith.divf %105, %106 : vector<32x1xf32>
    %108 = vector.broadcast %107 : vector<32x1xf32> to vector<32x32xf32>
    %109 = arith.subf %101, %108 : vector<32x32xf32>
    %110 = arith.mulf %109, %109 : vector<32x32xf32>
    %cst_35 = arith.constant dense<0.000000e+00> : vector<32xf32>
    %111 = vector.multi_reduction <add>, %110, %cst_35 [1] : vector<32x32xf32> to vector<32xf32>
    %112 = vector.shape_cast %111 : vector<32xf32> to vector<32x1xf32>
    %cst_36 = arith.constant 3.200000e+01 : f32
    %113 = vector.broadcast %cst_36 : f32 to vector<32x1xf32>
    %114 = arith.divf %112, %113 : vector<32x1xf32>
    %cst_37 = arith.constant 9.99999974E-6 : f32
    %115 = vector.broadcast %cst_37 : f32 to vector<32x1xf32>
    %116 = arith.addf %114, %115 : vector<32x1xf32>
    %117 = math.rsqrt %116 : vector<32x1xf32>
    %118 = vector.broadcast %117 : vector<32x1xf32> to vector<32x32xf32>
    %119 = arith.mulf %109, %118 : vector<32x32xf32>
    %120 = vector.broadcast %102 : vector<1x32xf32> to vector<32x32xf32>
    %121 = arith.mulf %119, %120 : vector<32x32xf32>
    %122 = vector.broadcast %103 : vector<1x32xf32> to vector<32x32xf32>
    %123 = arith.addf %121, %122 : vector<32x32xf32>
    %c0_38 = arith.constant 0 : index
    %c128 = arith.constant 128 : index
    %124 = vector.load %arg4[%c0_38, %c128] : memref<32x512xbf16, #tpu.memory_space<vmem>>, vector<32x32xbf16>
    %c0_39 = arith.constant 0 : index
    %c128_40 = arith.constant 128 : index
    %125 = vector.load %arg5[%c0_39, %c128_40] : memref<1x512xf32, #tpu.memory_space<vmem>>, vector<1x32xf32>
    %126 = arith.truncf %123 : vector<32x32xf32> to vector<32x32xbf16>
    %cst_41 = arith.constant dense<0.000000e+00> : vector<32x32xf32>
    %127 = tpu.matmul %126, %124, %cst_41 {dimension_numbers = #tpu.dot_dimension_numbers<[1], [0], [0], [1], [0, 0, 1, 1], [], []>} : vector<32x32xbf16>, vector<32x32xbf16>, vector<32x32xf32> -> vector<32x32xf32>
    %128 = vector.broadcast %125 : vector<1x32xf32> to vector<32x32xf32>
    %129 = arith.addf %127, %128 : vector<32x32xf32>
    %cst_42 = arith.constant 0.000000e+00 : f32
    %130 = vector.broadcast %cst_42 : f32 to vector<32x32xf32>
    %131 = arith.maximumf %129, %130 : vector<32x32xf32>
    %c0_43 = arith.constant 0 : index
    %c160 = arith.constant 160 : index
    %132 = vector.load %arg4[%c0_43, %c160] : memref<32x512xbf16, #tpu.memory_space<vmem>>, vector<32x32xbf16>
    %c0_44 = arith.constant 0 : index
    %c160_45 = arith.constant 160 : index
    %133 = vector.load %arg5[%c0_44, %c160_45] : memref<1x512xf32, #tpu.memory_space<vmem>>, vector<1x32xf32>
    %134 = arith.truncf %131 : vector<32x32xf32> to vector<32x32xbf16>
    %cst_46 = arith.constant dense<0.000000e+00> : vector<32x32xf32>
    %135 = tpu.matmul %134, %132, %cst_46 {dimension_numbers = #tpu.dot_dimension_numbers<[1], [0], [0], [1], [0, 0, 1, 1], [], []>} : vector<32x32xbf16>, vector<32x32xbf16>, vector<32x32xf32> -> vector<32x32xf32>
    %136 = vector.broadcast %133 : vector<1x32xf32> to vector<32x32xf32>
    %137 = arith.addf %135, %136 : vector<32x32xf32>
    %138 = arith.addf %123, %137 : vector<32x32xf32>
    %c2 = arith.constant 2 : index
    %c0_47 = arith.constant 0 : index
    %139 = vector.load %arg6[%c2, %c0_47] : memref<10x32xf32, #tpu.memory_space<vmem>>, vector<1x32xf32>
    %c3 = arith.constant 3 : index
    %c0_48 = arith.constant 0 : index
    %140 = vector.load %arg6[%c3, %c0_48] : memref<10x32xf32, #tpu.memory_space<vmem>>, vector<1x32xf32>
    %cst_49 = arith.constant dense<0.000000e+00> : vector<32xf32>
    %141 = vector.multi_reduction <add>, %138, %cst_49 [1] : vector<32x32xf32> to vector<32xf32>
    %142 = vector.shape_cast %141 : vector<32xf32> to vector<32x1xf32>
    %cst_50 = arith.constant 3.200000e+01 : f32
    %143 = vector.broadcast %cst_50 : f32 to vector<32x1xf32>
    %144 = arith.divf %142, %143 : vector<32x1xf32>
    %145 = vector.broadcast %144 : vector<32x1xf32> to vector<32x32xf32>
    %146 = arith.subf %138, %145 : vector<32x32xf32>
    %147 = arith.mulf %146, %146 : vector<32x32xf32>
    %cst_51 = arith.constant dense<0.000000e+00> : vector<32xf32>
    %148 = vector.multi_reduction <add>, %147, %cst_51 [1] : vector<32x32xf32> to vector<32xf32>
    %149 = vector.shape_cast %148 : vector<32xf32> to vector<32x1xf32>
    %cst_52 = arith.constant 3.200000e+01 : f32
    %150 = vector.broadcast %cst_52 : f32 to vector<32x1xf32>
    %151 = arith.divf %149, %150 : vector<32x1xf32>
    %cst_53 = arith.constant 9.99999974E-6 : f32
    %152 = vector.broadcast %cst_53 : f32 to vector<32x1xf32>
    %153 = arith.addf %151, %152 : vector<32x1xf32>
    %154 = math.rsqrt %153 : vector<32x1xf32>
    %155 = vector.broadcast %154 : vector<32x1xf32> to vector<32x32xf32>
    %156 = arith.mulf %146, %155 : vector<32x32xf32>
    %157 = vector.broadcast %139 : vector<1x32xf32> to vector<32x32xf32>
    %158 = arith.mulf %156, %157 : vector<32x32xf32>
    %159 = vector.broadcast %140 : vector<1x32xf32> to vector<32x32xf32>
    %160 = arith.addf %158, %159 : vector<32x32xf32>
    %c0_54 = arith.constant 0 : index
    %c192 = arith.constant 192 : index
    %161 = vector.load %arg4[%c0_54, %c192] : memref<32x512xbf16, #tpu.memory_space<vmem>>, vector<32x96xbf16>
    %c0_55 = arith.constant 0 : index
    %c192_56 = arith.constant 192 : index
    %162 = vector.load %arg5[%c0_55, %c192_56] : memref<1x512xf32, #tpu.memory_space<vmem>>, vector<1x96xf32>
    %163 = arith.truncf %160 : vector<32x32xf32> to vector<32x32xbf16>
    %cst_57 = arith.constant dense<0.000000e+00> : vector<32x96xf32>
    %164 = tpu.matmul %163, %161, %cst_57 {dimension_numbers = #tpu.dot_dimension_numbers<[1], [0], [0], [1], [0, 0, 1, 1], [], []>} : vector<32x32xbf16>, vector<32x96xbf16>, vector<32x96xf32> -> vector<32x96xf32>
    %165 = vector.broadcast %162 : vector<1x96xf32> to vector<32x96xf32>
    %166 = arith.addf %164, %165 : vector<32x96xf32>
    %167 = vector.extract_strided_slice %166 {offsets = [0, 0], sizes = [32, 32], strides = [1, 1]} : vector<32x96xf32> to vector<32x32xf32>
    %168 = vector.extract_strided_slice %166 {offsets = [0, 32], sizes = [32, 32], strides = [1, 1]} : vector<32x96xf32> to vector<32x32xf32>
    %169 = vector.extract_strided_slice %166 {offsets = [0, 64], sizes = [32, 32], strides = [1, 1]} : vector<32x96xf32> to vector<32x32xf32>
    %170 = vector.extract_strided_slice %167 {offsets = [0, 0], sizes = [32, 8], strides = [1, 1]} : vector<32x32xf32> to vector<32x8xf32>
    %171 = vector.extract_strided_slice %168 {offsets = [0, 0], sizes = [32, 8], strides = [1, 1]} : vector<32x32xf32> to vector<32x8xf32>
    %172 = vector.extract_strided_slice %169 {offsets = [0, 0], sizes = [32, 8], strides = [1, 1]} : vector<32x32xf32> to vector<32x8xf32>
    %173 = arith.truncf %170 : vector<32x8xf32> to vector<32x8xbf16>
    %174 = arith.truncf %171 : vector<32x8xf32> to vector<32x8xbf16>
    %cst_58 = arith.constant dense<0.000000e+00> : vector<32x32xf32>
    %175 = tpu.matmul %173, %174, %cst_58 {dimension_numbers = #tpu.dot_dimension_numbers<[1], [1], [0], [0], [0, 0, 1, 0], [], []>} : vector<32x8xbf16>, vector<32x8xbf16>, vector<32x32xf32> -> vector<32x32xf32>
    %cst_59 = arith.constant dense<0xFF800000> : vector<32xf32>
    %176 = vector.multi_reduction <maximumf>, %175, %cst_59 [1] : vector<32x32xf32> to vector<32xf32>
    %177 = vector.shape_cast %176 : vector<32xf32> to vector<32x1xf32>
    %178 = vector.broadcast %177 : vector<32x1xf32> to vector<32x32xf32>
    %179 = arith.subf %175, %178 : vector<32x32xf32>
    %180 = math.exp %179 : vector<32x32xf32>
    %cst_60 = arith.constant dense<0.000000e+00> : vector<32xf32>
    %181 = vector.multi_reduction <add>, %180, %cst_60 [1] : vector<32x32xf32> to vector<32xf32>
    %182 = vector.shape_cast %181 : vector<32xf32> to vector<32x1xf32>
    %183 = vector.broadcast %182 : vector<32x1xf32> to vector<32x32xf32>
    %184 = arith.divf %180, %183 : vector<32x32xf32>
    %185 = arith.truncf %184 : vector<32x32xf32> to vector<32x32xbf16>
    %186 = arith.truncf %172 : vector<32x8xf32> to vector<32x8xbf16>
    %cst_61 = arith.constant dense<0.000000e+00> : vector<32x8xf32>
    %187 = tpu.matmul %185, %186, %cst_61 {dimension_numbers = #tpu.dot_dimension_numbers<[1], [0], [0], [1], [0, 0, 1, 1], [], []>} : vector<32x32xbf16>, vector<32x8xbf16>, vector<32x8xf32> -> vector<32x8xf32>
    %188 = vector.extract_strided_slice %167 {offsets = [0, 8], sizes = [32, 8], strides = [1, 1]} : vector<32x32xf32> to vector<32x8xf32>
    %189 = vector.extract_strided_slice %168 {offsets = [0, 8], sizes = [32, 8], strides = [1, 1]} : vector<32x32xf32> to vector<32x8xf32>
    %190 = vector.extract_strided_slice %169 {offsets = [0, 8], sizes = [32, 8], strides = [1, 1]} : vector<32x32xf32> to vector<32x8xf32>
    %191 = arith.truncf %188 : vector<32x8xf32> to vector<32x8xbf16>
    %192 = arith.truncf %189 : vector<32x8xf32> to vector<32x8xbf16>
    %cst_62 = arith.constant dense<0.000000e+00> : vector<32x32xf32>
    %193 = tpu.matmul %191, %192, %cst_62 {dimension_numbers = #tpu.dot_dimension_numbers<[1], [1], [0], [0], [0, 0, 1, 0], [], []>} : vector<32x8xbf16>, vector<32x8xbf16>, vector<32x32xf32> -> vector<32x32xf32>
    %cst_63 = arith.constant dense<0xFF800000> : vector<32xf32>
    %194 = vector.multi_reduction <maximumf>, %193, %cst_63 [1] : vector<32x32xf32> to vector<32xf32>
    %195 = vector.shape_cast %194 : vector<32xf32> to vector<32x1xf32>
    %196 = vector.broadcast %195 : vector<32x1xf32> to vector<32x32xf32>
    %197 = arith.subf %193, %196 : vector<32x32xf32>
    %198 = math.exp %197 : vector<32x32xf32>
    %cst_64 = arith.constant dense<0.000000e+00> : vector<32xf32>
    %199 = vector.multi_reduction <add>, %198, %cst_64 [1] : vector<32x32xf32> to vector<32xf32>
    %200 = vector.shape_cast %199 : vector<32xf32> to vector<32x1xf32>
    %201 = vector.broadcast %200 : vector<32x1xf32> to vector<32x32xf32>
    %202 = arith.divf %198, %201 : vector<32x32xf32>
    %203 = arith.truncf %202 : vector<32x32xf32> to vector<32x32xbf16>
    %204 = arith.truncf %190 : vector<32x8xf32> to vector<32x8xbf16>
    %cst_65 = arith.constant dense<0.000000e+00> : vector<32x8xf32>
    %205 = tpu.matmul %203, %204, %cst_65 {dimension_numbers = #tpu.dot_dimension_numbers<[1], [0], [0], [1], [0, 0, 1, 1], [], []>} : vector<32x32xbf16>, vector<32x8xbf16>, vector<32x8xf32> -> vector<32x8xf32>
    %206 = vector.extract_strided_slice %167 {offsets = [0, 16], sizes = [32, 8], strides = [1, 1]} : vector<32x32xf32> to vector<32x8xf32>
    %207 = vector.extract_strided_slice %168 {offsets = [0, 16], sizes = [32, 8], strides = [1, 1]} : vector<32x32xf32> to vector<32x8xf32>
    %208 = vector.extract_strided_slice %169 {offsets = [0, 16], sizes = [32, 8], strides = [1, 1]} : vector<32x32xf32> to vector<32x8xf32>
    %209 = arith.truncf %206 : vector<32x8xf32> to vector<32x8xbf16>
    %210 = arith.truncf %207 : vector<32x8xf32> to vector<32x8xbf16>
    %cst_66 = arith.constant dense<0.000000e+00> : vector<32x32xf32>
    %211 = tpu.matmul %209, %210, %cst_66 {dimension_numbers = #tpu.dot_dimension_numbers<[1], [1], [0], [0], [0, 0, 1, 0], [], []>} : vector<32x8xbf16>, vector<32x8xbf16>, vector<32x32xf32> -> vector<32x32xf32>
    %cst_67 = arith.constant dense<0xFF800000> : vector<32xf32>
    %212 = vector.multi_reduction <maximumf>, %211, %cst_67 [1] : vector<32x32xf32> to vector<32xf32>
    %213 = vector.shape_cast %212 : vector<32xf32> to vector<32x1xf32>
    %214 = vector.broadcast %213 : vector<32x1xf32> to vector<32x32xf32>
    %215 = arith.subf %211, %214 : vector<32x32xf32>
    %216 = math.exp %215 : vector<32x32xf32>
    %cst_68 = arith.constant dense<0.000000e+00> : vector<32xf32>
    %217 = vector.multi_reduction <add>, %216, %cst_68 [1] : vector<32x32xf32> to vector<32xf32>
    %218 = vector.shape_cast %217 : vector<32xf32> to vector<32x1xf32>
    %219 = vector.broadcast %218 : vector<32x1xf32> to vector<32x32xf32>
    %220 = arith.divf %216, %219 : vector<32x32xf32>
    %221 = arith.truncf %220 : vector<32x32xf32> to vector<32x32xbf16>
    %222 = arith.truncf %208 : vector<32x8xf32> to vector<32x8xbf16>
    %cst_69 = arith.constant dense<0.000000e+00> : vector<32x8xf32>
    %223 = tpu.matmul %221, %222, %cst_69 {dimension_numbers = #tpu.dot_dimension_numbers<[1], [0], [0], [1], [0, 0, 1, 1], [], []>} : vector<32x32xbf16>, vector<32x8xbf16>, vector<32x8xf32> -> vector<32x8xf32>
    %224 = vector.extract_strided_slice %167 {offsets = [0, 24], sizes = [32, 8], strides = [1, 1]} : vector<32x32xf32> to vector<32x8xf32>
    %225 = vector.extract_strided_slice %168 {offsets = [0, 24], sizes = [32, 8], strides = [1, 1]} : vector<32x32xf32> to vector<32x8xf32>
    %226 = vector.extract_strided_slice %169 {offsets = [0, 24], sizes = [32, 8], strides = [1, 1]} : vector<32x32xf32> to vector<32x8xf32>
    %227 = arith.truncf %224 : vector<32x8xf32> to vector<32x8xbf16>
    %228 = arith.truncf %225 : vector<32x8xf32> to vector<32x8xbf16>
    %cst_70 = arith.constant dense<0.000000e+00> : vector<32x32xf32>
    %229 = tpu.matmul %227, %228, %cst_70 {dimension_numbers = #tpu.dot_dimension_numbers<[1], [1], [0], [0], [0, 0, 1, 0], [], []>} : vector<32x8xbf16>, vector<32x8xbf16>, vector<32x32xf32> -> vector<32x32xf32>
    %cst_71 = arith.constant dense<0xFF800000> : vector<32xf32>
    %230 = vector.multi_reduction <maximumf>, %229, %cst_71 [1] : vector<32x32xf32> to vector<32xf32>
    %231 = vector.shape_cast %230 : vector<32xf32> to vector<32x1xf32>
    %232 = vector.broadcast %231 : vector<32x1xf32> to vector<32x32xf32>
    %233 = arith.subf %229, %232 : vector<32x32xf32>
    %234 = math.exp %233 : vector<32x32xf32>
    %cst_72 = arith.constant dense<0.000000e+00> : vector<32xf32>
    %235 = vector.multi_reduction <add>, %234, %cst_72 [1] : vector<32x32xf32> to vector<32xf32>
    %236 = vector.shape_cast %235 : vector<32xf32> to vector<32x1xf32>
    %237 = vector.broadcast %236 : vector<32x1xf32> to vector<32x32xf32>
    %238 = arith.divf %234, %237 : vector<32x32xf32>
    %239 = arith.truncf %238 : vector<32x32xf32> to vector<32x32xbf16>
    %240 = arith.truncf %226 : vector<32x8xf32> to vector<32x8xbf16>
    %cst_73 = arith.constant dense<0.000000e+00> : vector<32x8xf32>
    %241 = tpu.matmul %239, %240, %cst_73 {dimension_numbers = #tpu.dot_dimension_numbers<[1], [0], [0], [1], [0, 0, 1, 1], [], []>} : vector<32x32xbf16>, vector<32x8xbf16>, vector<32x8xf32> -> vector<32x8xf32>
    %242 = tpu.concatenate %187, %205, %223, %241 in 1 : vector<32x8xf32>, vector<32x8xf32>, vector<32x8xf32>, vector<32x8xf32> -> vector<32x32xf32>
    %c0_74 = arith.constant 0 : index
    %c288 = arith.constant 288 : index
    %243 = vector.load %arg4[%c0_74, %c288] : memref<32x512xbf16, #tpu.memory_space<vmem>>, vector<32x32xbf16>
    %c0_75 = arith.constant 0 : index
    %c288_76 = arith.constant 288 : index
    %244 = vector.load %arg5[%c0_75, %c288_76] : memref<1x512xf32, #tpu.memory_space<vmem>>, vector<1x32xf32>
    %245 = arith.truncf %242 : vector<32x32xf32> to vector<32x32xbf16>
    %cst_77 = arith.constant dense<0.000000e+00> : vector<32x32xf32>
    %246 = tpu.matmul %245, %243, %cst_77 {dimension_numbers = #tpu.dot_dimension_numbers<[1], [0], [0], [1], [0, 0, 1, 1], [], []>} : vector<32x32xbf16>, vector<32x32xbf16>, vector<32x32xf32> -> vector<32x32xf32>
    %247 = vector.broadcast %244 : vector<1x32xf32> to vector<32x32xf32>
    %248 = arith.addf %246, %247 : vector<32x32xf32>
    %249 = arith.addf %160, %248 : vector<32x32xf32>
    %c4 = arith.constant 4 : index
    %c0_78 = arith.constant 0 : index
    %250 = vector.load %arg6[%c4, %c0_78] : memref<10x32xf32, #tpu.memory_space<vmem>>, vector<1x32xf32>
    %c5 = arith.constant 5 : index
    %c0_79 = arith.constant 0 : index
    %251 = vector.load %arg6[%c5, %c0_79] : memref<10x32xf32, #tpu.memory_space<vmem>>, vector<1x32xf32>
    %cst_80 = arith.constant dense<0.000000e+00> : vector<32xf32>
    %252 = vector.multi_reduction <add>, %249, %cst_80 [1] : vector<32x32xf32> to vector<32xf32>
    %253 = vector.shape_cast %252 : vector<32xf32> to vector<32x1xf32>
    %cst_81 = arith.constant 3.200000e+01 : f32
    %254 = vector.broadcast %cst_81 : f32 to vector<32x1xf32>
    %255 = arith.divf %253, %254 : vector<32x1xf32>
    %256 = vector.broadcast %255 : vector<32x1xf32> to vector<32x32xf32>
    %257 = arith.subf %249, %256 : vector<32x32xf32>
    %258 = arith.mulf %257, %257 : vector<32x32xf32>
    %cst_82 = arith.constant dense<0.000000e+00> : vector<32xf32>
    %259 = vector.multi_reduction <add>, %258, %cst_82 [1] : vector<32x32xf32> to vector<32xf32>
    %260 = vector.shape_cast %259 : vector<32xf32> to vector<32x1xf32>
    %cst_83 = arith.constant 3.200000e+01 : f32
    %261 = vector.broadcast %cst_83 : f32 to vector<32x1xf32>
    %262 = arith.divf %260, %261 : vector<32x1xf32>
    %cst_84 = arith.constant 9.99999974E-6 : f32
    %263 = vector.broadcast %cst_84 : f32 to vector<32x1xf32>
    %264 = arith.addf %262, %263 : vector<32x1xf32>
    %265 = math.rsqrt %264 : vector<32x1xf32>
    %266 = vector.broadcast %265 : vector<32x1xf32> to vector<32x32xf32>
    %267 = arith.mulf %257, %266 : vector<32x32xf32>
    %268 = vector.broadcast %250 : vector<1x32xf32> to vector<32x32xf32>
    %269 = arith.mulf %267, %268 : vector<32x32xf32>
    %270 = vector.broadcast %251 : vector<1x32xf32> to vector<32x32xf32>
    %271 = arith.addf %269, %270 : vector<32x32xf32>
    %c0_85 = arith.constant 0 : index
    %c320 = arith.constant 320 : index
    %272 = vector.load %arg4[%c0_85, %c320] : memref<32x512xbf16, #tpu.memory_space<vmem>>, vector<32x32xbf16>
    %c0_86 = arith.constant 0 : index
    %c320_87 = arith.constant 320 : index
    %273 = vector.load %arg5[%c0_86, %c320_87] : memref<1x512xf32, #tpu.memory_space<vmem>>, vector<1x32xf32>
    %274 = arith.truncf %271 : vector<32x32xf32> to vector<32x32xbf16>
    %cst_88 = arith.constant dense<0.000000e+00> : vector<32x32xf32>
    %275 = tpu.matmul %274, %272, %cst_88 {dimension_numbers = #tpu.dot_dimension_numbers<[1], [0], [0], [1], [0, 0, 1, 1], [], []>} : vector<32x32xbf16>, vector<32x32xbf16>, vector<32x32xf32> -> vector<32x32xf32>
    %276 = vector.broadcast %273 : vector<1x32xf32> to vector<32x32xf32>
    %277 = arith.addf %275, %276 : vector<32x32xf32>
    %c0_89 = arith.constant 0 : index
    %c352 = arith.constant 352 : index
    %278 = vector.load %arg4[%c0_89, %c352] : memref<32x512xbf16, #tpu.memory_space<vmem>>, vector<32x64xbf16>
    %c0_90 = arith.constant 0 : index
    %c352_91 = arith.constant 352 : index
    %279 = vector.load %arg5[%c0_90, %c352_91] : memref<1x512xf32, #tpu.memory_space<vmem>>, vector<1x64xf32>
    %280 = arith.truncf %8 : vector<32x32xf32> to vector<32x32xbf16>
    %cst_92 = arith.constant dense<0.000000e+00> : vector<32x64xf32>
    %281 = tpu.matmul %280, %278, %cst_92 {dimension_numbers = #tpu.dot_dimension_numbers<[1], [0], [0], [1], [0, 0, 1, 1], [], []>} : vector<32x32xbf16>, vector<32x64xbf16>, vector<32x64xf32> -> vector<32x64xf32>
    %282 = vector.broadcast %279 : vector<1x64xf32> to vector<32x64xf32>
    %283 = arith.addf %281, %282 : vector<32x64xf32>
    %284 = vector.extract_strided_slice %283 {offsets = [0, 0], sizes = [32, 32], strides = [1, 1]} : vector<32x64xf32> to vector<32x32xf32>
    %285 = vector.extract_strided_slice %283 {offsets = [0, 32], sizes = [32, 32], strides = [1, 1]} : vector<32x64xf32> to vector<32x32xf32>
    %286 = vector.extract_strided_slice %277 {offsets = [0, 0], sizes = [32, 8], strides = [1, 1]} : vector<32x32xf32> to vector<32x8xf32>
    %287 = vector.extract_strided_slice %284 {offsets = [0, 0], sizes = [32, 8], strides = [1, 1]} : vector<32x32xf32> to vector<32x8xf32>
    %288 = vector.extract_strided_slice %285 {offsets = [0, 0], sizes = [32, 8], strides = [1, 1]} : vector<32x32xf32> to vector<32x8xf32>
    %289 = arith.truncf %286 : vector<32x8xf32> to vector<32x8xbf16>
    %290 = arith.truncf %287 : vector<32x8xf32> to vector<32x8xbf16>
    %cst_93 = arith.constant dense<0.000000e+00> : vector<32x32xf32>
    %291 = tpu.matmul %289, %290, %cst_93 {dimension_numbers = #tpu.dot_dimension_numbers<[1], [1], [0], [0], [0, 0, 1, 0], [], []>} : vector<32x8xbf16>, vector<32x8xbf16>, vector<32x32xf32> -> vector<32x32xf32>
    %cst_94 = arith.constant dense<0xFF800000> : vector<32xf32>
    %292 = vector.multi_reduction <maximumf>, %291, %cst_94 [1] : vector<32x32xf32> to vector<32xf32>
    %293 = vector.shape_cast %292 : vector<32xf32> to vector<32x1xf32>
    %294 = vector.broadcast %293 : vector<32x1xf32> to vector<32x32xf32>
    %295 = arith.subf %291, %294 : vector<32x32xf32>
    %296 = math.exp %295 : vector<32x32xf32>
    %cst_95 = arith.constant dense<0.000000e+00> : vector<32xf32>
    %297 = vector.multi_reduction <add>, %296, %cst_95 [1] : vector<32x32xf32> to vector<32xf32>
    %298 = vector.shape_cast %297 : vector<32xf32> to vector<32x1xf32>
    %299 = vector.broadcast %298 : vector<32x1xf32> to vector<32x32xf32>
    %300 = arith.divf %296, %299 : vector<32x32xf32>
    %301 = arith.truncf %300 : vector<32x32xf32> to vector<32x32xbf16>
    %302 = arith.truncf %288 : vector<32x8xf32> to vector<32x8xbf16>
    %cst_96 = arith.constant dense<0.000000e+00> : vector<32x8xf32>
    %303 = tpu.matmul %301, %302, %cst_96 {dimension_numbers = #tpu.dot_dimension_numbers<[1], [0], [0], [1], [0, 0, 1, 1], [], []>} : vector<32x32xbf16>, vector<32x8xbf16>, vector<32x8xf32> -> vector<32x8xf32>
    %304 = vector.extract_strided_slice %277 {offsets = [0, 8], sizes = [32, 8], strides = [1, 1]} : vector<32x32xf32> to vector<32x8xf32>
    %305 = vector.extract_strided_slice %284 {offsets = [0, 8], sizes = [32, 8], strides = [1, 1]} : vector<32x32xf32> to vector<32x8xf32>
    %306 = vector.extract_strided_slice %285 {offsets = [0, 8], sizes = [32, 8], strides = [1, 1]} : vector<32x32xf32> to vector<32x8xf32>
    %307 = arith.truncf %304 : vector<32x8xf32> to vector<32x8xbf16>
    %308 = arith.truncf %305 : vector<32x8xf32> to vector<32x8xbf16>
    %cst_97 = arith.constant dense<0.000000e+00> : vector<32x32xf32>
    %309 = tpu.matmul %307, %308, %cst_97 {dimension_numbers = #tpu.dot_dimension_numbers<[1], [1], [0], [0], [0, 0, 1, 0], [], []>} : vector<32x8xbf16>, vector<32x8xbf16>, vector<32x32xf32> -> vector<32x32xf32>
    %cst_98 = arith.constant dense<0xFF800000> : vector<32xf32>
    %310 = vector.multi_reduction <maximumf>, %309, %cst_98 [1] : vector<32x32xf32> to vector<32xf32>
    %311 = vector.shape_cast %310 : vector<32xf32> to vector<32x1xf32>
    %312 = vector.broadcast %311 : vector<32x1xf32> to vector<32x32xf32>
    %313 = arith.subf %309, %312 : vector<32x32xf32>
    %314 = math.exp %313 : vector<32x32xf32>
    %cst_99 = arith.constant dense<0.000000e+00> : vector<32xf32>
    %315 = vector.multi_reduction <add>, %314, %cst_99 [1] : vector<32x32xf32> to vector<32xf32>
    %316 = vector.shape_cast %315 : vector<32xf32> to vector<32x1xf32>
    %317 = vector.broadcast %316 : vector<32x1xf32> to vector<32x32xf32>
    %318 = arith.divf %314, %317 : vector<32x32xf32>
    %319 = arith.truncf %318 : vector<32x32xf32> to vector<32x32xbf16>
    %320 = arith.truncf %306 : vector<32x8xf32> to vector<32x8xbf16>
    %cst_100 = arith.constant dense<0.000000e+00> : vector<32x8xf32>
    %321 = tpu.matmul %319, %320, %cst_100 {dimension_numbers = #tpu.dot_dimension_numbers<[1], [0], [0], [1], [0, 0, 1, 1], [], []>} : vector<32x32xbf16>, vector<32x8xbf16>, vector<32x8xf32> -> vector<32x8xf32>
    %322 = vector.extract_strided_slice %277 {offsets = [0, 16], sizes = [32, 8], strides = [1, 1]} : vector<32x32xf32> to vector<32x8xf32>
    %323 = vector.extract_strided_slice %284 {offsets = [0, 16], sizes = [32, 8], strides = [1, 1]} : vector<32x32xf32> to vector<32x8xf32>
    %324 = vector.extract_strided_slice %285 {offsets = [0, 16], sizes = [32, 8], strides = [1, 1]} : vector<32x32xf32> to vector<32x8xf32>
    %325 = arith.truncf %322 : vector<32x8xf32> to vector<32x8xbf16>
    %326 = arith.truncf %323 : vector<32x8xf32> to vector<32x8xbf16>
    %cst_101 = arith.constant dense<0.000000e+00> : vector<32x32xf32>
    %327 = tpu.matmul %325, %326, %cst_101 {dimension_numbers = #tpu.dot_dimension_numbers<[1], [1], [0], [0], [0, 0, 1, 0], [], []>} : vector<32x8xbf16>, vector<32x8xbf16>, vector<32x32xf32> -> vector<32x32xf32>
    %cst_102 = arith.constant dense<0xFF800000> : vector<32xf32>
    %328 = vector.multi_reduction <maximumf>, %327, %cst_102 [1] : vector<32x32xf32> to vector<32xf32>
    %329 = vector.shape_cast %328 : vector<32xf32> to vector<32x1xf32>
    %330 = vector.broadcast %329 : vector<32x1xf32> to vector<32x32xf32>
    %331 = arith.subf %327, %330 : vector<32x32xf32>
    %332 = math.exp %331 : vector<32x32xf32>
    %cst_103 = arith.constant dense<0.000000e+00> : vector<32xf32>
    %333 = vector.multi_reduction <add>, %332, %cst_103 [1] : vector<32x32xf32> to vector<32xf32>
    %334 = vector.shape_cast %333 : vector<32xf32> to vector<32x1xf32>
    %335 = vector.broadcast %334 : vector<32x1xf32> to vector<32x32xf32>
    %336 = arith.divf %332, %335 : vector<32x32xf32>
    %337 = arith.truncf %336 : vector<32x32xf32> to vector<32x32xbf16>
    %338 = arith.truncf %324 : vector<32x8xf32> to vector<32x8xbf16>
    %cst_104 = arith.constant dense<0.000000e+00> : vector<32x8xf32>
    %339 = tpu.matmul %337, %338, %cst_104 {dimension_numbers = #tpu.dot_dimension_numbers<[1], [0], [0], [1], [0, 0, 1, 1], [], []>} : vector<32x32xbf16>, vector<32x8xbf16>, vector<32x8xf32> -> vector<32x8xf32>
    %340 = vector.extract_strided_slice %277 {offsets = [0, 24], sizes = [32, 8], strides = [1, 1]} : vector<32x32xf32> to vector<32x8xf32>
    %341 = vector.extract_strided_slice %284 {offsets = [0, 24], sizes = [32, 8], strides = [1, 1]} : vector<32x32xf32> to vector<32x8xf32>
    %342 = vector.extract_strided_slice %285 {offsets = [0, 24], sizes = [32, 8], strides = [1, 1]} : vector<32x32xf32> to vector<32x8xf32>
    %343 = arith.truncf %340 : vector<32x8xf32> to vector<32x8xbf16>
    %344 = arith.truncf %341 : vector<32x8xf32> to vector<32x8xbf16>
    %cst_105 = arith.constant dense<0.000000e+00> : vector<32x32xf32>
    %345 = tpu.matmul %343, %344, %cst_105 {dimension_numbers = #tpu.dot_dimension_numbers<[1], [1], [0], [0], [0, 0, 1, 0], [], []>} : vector<32x8xbf16>, vector<32x8xbf16>, vector<32x32xf32> -> vector<32x32xf32>
    %cst_106 = arith.constant dense<0xFF800000> : vector<32xf32>
    %346 = vector.multi_reduction <maximumf>, %345, %cst_106 [1] : vector<32x32xf32> to vector<32xf32>
    %347 = vector.shape_cast %346 : vector<32xf32> to vector<32x1xf32>
    %348 = vector.broadcast %347 : vector<32x1xf32> to vector<32x32xf32>
    %349 = arith.subf %345, %348 : vector<32x32xf32>
    %350 = math.exp %349 : vector<32x32xf32>
    %cst_107 = arith.constant dense<0.000000e+00> : vector<32xf32>
    %351 = vector.multi_reduction <add>, %350, %cst_107 [1] : vector<32x32xf32> to vector<32xf32>
    %352 = vector.shape_cast %351 : vector<32xf32> to vector<32x1xf32>
    %353 = vector.broadcast %352 : vector<32x1xf32> to vector<32x32xf32>
    %354 = arith.divf %350, %353 : vector<32x32xf32>
    %355 = arith.truncf %354 : vector<32x32xf32> to vector<32x32xbf16>
    %356 = arith.truncf %342 : vector<32x8xf32> to vector<32x8xbf16>
    %cst_108 = arith.constant dense<0.000000e+00> : vector<32x8xf32>
    %357 = tpu.matmul %355, %356, %cst_108 {dimension_numbers = #tpu.dot_dimension_numbers<[1], [0], [0], [1], [0, 0, 1, 1], [], []>} : vector<32x32xbf16>, vector<32x8xbf16>, vector<32x8xf32> -> vector<32x8xf32>
    %358 = tpu.concatenate %303, %321, %339, %357 in 1 : vector<32x8xf32>, vector<32x8xf32>, vector<32x8xf32>, vector<32x8xf32> -> vector<32x32xf32>
    %c0_109 = arith.constant 0 : index
    %c416 = arith.constant 416 : index
    %359 = vector.load %arg4[%c0_109, %c416] : memref<32x512xbf16, #tpu.memory_space<vmem>>, vector<32x32xbf16>
    %c0_110 = arith.constant 0 : index
    %c416_111 = arith.constant 416 : index
    %360 = vector.load %arg5[%c0_110, %c416_111] : memref<1x512xf32, #tpu.memory_space<vmem>>, vector<1x32xf32>
    %361 = arith.truncf %358 : vector<32x32xf32> to vector<32x32xbf16>
    %cst_112 = arith.constant dense<0.000000e+00> : vector<32x32xf32>
    %362 = tpu.matmul %361, %359, %cst_112 {dimension_numbers = #tpu.dot_dimension_numbers<[1], [0], [0], [1], [0, 0, 1, 1], [], []>} : vector<32x32xbf16>, vector<32x32xbf16>, vector<32x32xf32> -> vector<32x32xf32>
    %363 = vector.broadcast %360 : vector<1x32xf32> to vector<32x32xf32>
    %364 = arith.addf %362, %363 : vector<32x32xf32>
    %365 = arith.addf %271, %364 : vector<32x32xf32>
    %c6 = arith.constant 6 : index
    %c0_113 = arith.constant 0 : index
    %366 = vector.load %arg6[%c6, %c0_113] : memref<10x32xf32, #tpu.memory_space<vmem>>, vector<1x32xf32>
    %c7 = arith.constant 7 : index
    %c0_114 = arith.constant 0 : index
    %367 = vector.load %arg6[%c7, %c0_114] : memref<10x32xf32, #tpu.memory_space<vmem>>, vector<1x32xf32>
    %cst_115 = arith.constant dense<0.000000e+00> : vector<32xf32>
    %368 = vector.multi_reduction <add>, %365, %cst_115 [1] : vector<32x32xf32> to vector<32xf32>
    %369 = vector.shape_cast %368 : vector<32xf32> to vector<32x1xf32>
    %cst_116 = arith.constant 3.200000e+01 : f32
    %370 = vector.broadcast %cst_116 : f32 to vector<32x1xf32>
    %371 = arith.divf %369, %370 : vector<32x1xf32>
    %372 = vector.broadcast %371 : vector<32x1xf32> to vector<32x32xf32>
    %373 = arith.subf %365, %372 : vector<32x32xf32>
    %374 = arith.mulf %373, %373 : vector<32x32xf32>
    %cst_117 = arith.constant dense<0.000000e+00> : vector<32xf32>
    %375 = vector.multi_reduction <add>, %374, %cst_117 [1] : vector<32x32xf32> to vector<32xf32>
    %376 = vector.shape_cast %375 : vector<32xf32> to vector<32x1xf32>
    %cst_118 = arith.constant 3.200000e+01 : f32
    %377 = vector.broadcast %cst_118 : f32 to vector<32x1xf32>
    %378 = arith.divf %376, %377 : vector<32x1xf32>
    %cst_119 = arith.constant 9.99999974E-6 : f32
    %379 = vector.broadcast %cst_119 : f32 to vector<32x1xf32>
    %380 = arith.addf %378, %379 : vector<32x1xf32>
    %381 = math.rsqrt %380 : vector<32x1xf32>
    %382 = vector.broadcast %381 : vector<32x1xf32> to vector<32x32xf32>
    %383 = arith.mulf %373, %382 : vector<32x32xf32>
    %384 = vector.broadcast %366 : vector<1x32xf32> to vector<32x32xf32>
    %385 = arith.mulf %383, %384 : vector<32x32xf32>
    %386 = vector.broadcast %367 : vector<1x32xf32> to vector<32x32xf32>
    %387 = arith.addf %385, %386 : vector<32x32xf32>
    %c0_120 = arith.constant 0 : index
    %c448 = arith.constant 448 : index
    %388 = vector.load %arg4[%c0_120, %c448] : memref<32x512xbf16, #tpu.memory_space<vmem>>, vector<32x32xbf16>
    %c0_121 = arith.constant 0 : index
    %c448_122 = arith.constant 448 : index
    %389 = vector.load %arg5[%c0_121, %c448_122] : memref<1x512xf32, #tpu.memory_space<vmem>>, vector<1x32xf32>
    %390 = arith.truncf %387 : vector<32x32xf32> to vector<32x32xbf16>
    %cst_123 = arith.constant dense<0.000000e+00> : vector<32x32xf32>
    %391 = tpu.matmul %390, %388, %cst_123 {dimension_numbers = #tpu.dot_dimension_numbers<[1], [0], [0], [1], [0, 0, 1, 1], [], []>} : vector<32x32xbf16>, vector<32x32xbf16>, vector<32x32xf32> -> vector<32x32xf32>
    %392 = vector.broadcast %389 : vector<1x32xf32> to vector<32x32xf32>
    %393 = arith.addf %391, %392 : vector<32x32xf32>
    %cst_124 = arith.constant 0.000000e+00 : f32
    %394 = vector.broadcast %cst_124 : f32 to vector<32x32xf32>
    %395 = arith.maximumf %393, %394 : vector<32x32xf32>
    %c0_125 = arith.constant 0 : index
    %c480 = arith.constant 480 : index
    %396 = vector.load %arg4[%c0_125, %c480] : memref<32x512xbf16, #tpu.memory_space<vmem>>, vector<32x32xbf16>
    %c0_126 = arith.constant 0 : index
    %c480_127 = arith.constant 480 : index
    %397 = vector.load %arg5[%c0_126, %c480_127] : memref<1x512xf32, #tpu.memory_space<vmem>>, vector<1x32xf32>
    %398 = arith.truncf %395 : vector<32x32xf32> to vector<32x32xbf16>
    %cst_128 = arith.constant dense<0.000000e+00> : vector<32x32xf32>
    %399 = tpu.matmul %398, %396, %cst_128 {dimension_numbers = #tpu.dot_dimension_numbers<[1], [0], [0], [1], [0, 0, 1, 1], [], []>} : vector<32x32xbf16>, vector<32x32xbf16>, vector<32x32xf32> -> vector<32x32xf32>
    %400 = vector.broadcast %397 : vector<1x32xf32> to vector<32x32xf32>
    %401 = arith.addf %399, %400 : vector<32x32xf32>
    %402 = arith.addf %387, %401 : vector<32x32xf32>
    %c8 = arith.constant 8 : index
    %c0_129 = arith.constant 0 : index
    %403 = vector.load %arg6[%c8, %c0_129] : memref<10x32xf32, #tpu.memory_space<vmem>>, vector<1x32xf32>
    %c9 = arith.constant 9 : index
    %c0_130 = arith.constant 0 : index
    %404 = vector.load %arg6[%c9, %c0_130] : memref<10x32xf32, #tpu.memory_space<vmem>>, vector<1x32xf32>
    %cst_131 = arith.constant dense<0.000000e+00> : vector<32xf32>
    %405 = vector.multi_reduction <add>, %402, %cst_131 [1] : vector<32x32xf32> to vector<32xf32>
    %406 = vector.shape_cast %405 : vector<32xf32> to vector<32x1xf32>
    %cst_132 = arith.constant 3.200000e+01 : f32
    %407 = vector.broadcast %cst_132 : f32 to vector<32x1xf32>
    %408 = arith.divf %406, %407 : vector<32x1xf32>
    %409 = vector.broadcast %408 : vector<32x1xf32> to vector<32x32xf32>
    %410 = arith.subf %402, %409 : vector<32x32xf32>
    %411 = arith.mulf %410, %410 : vector<32x32xf32>
    %cst_133 = arith.constant dense<0.000000e+00> : vector<32xf32>
    %412 = vector.multi_reduction <add>, %411, %cst_133 [1] : vector<32x32xf32> to vector<32xf32>
    %413 = vector.shape_cast %412 : vector<32xf32> to vector<32x1xf32>
    %cst_134 = arith.constant 3.200000e+01 : f32
    %414 = vector.broadcast %cst_134 : f32 to vector<32x1xf32>
    %415 = arith.divf %413, %414 : vector<32x1xf32>
    %cst_135 = arith.constant 9.99999974E-6 : f32
    %416 = vector.broadcast %cst_135 : f32 to vector<32x1xf32>
    %417 = arith.addf %415, %416 : vector<32x1xf32>
    %418 = math.rsqrt %417 : vector<32x1xf32>
    %419 = vector.broadcast %418 : vector<32x1xf32> to vector<32x32xf32>
    %420 = arith.mulf %410, %419 : vector<32x32xf32>
    %421 = vector.broadcast %403 : vector<1x32xf32> to vector<32x32xf32>
    %422 = arith.mulf %420, %421 : vector<32x32xf32>
    %423 = vector.broadcast %404 : vector<1x32xf32> to vector<32x32xf32>
    %424 = arith.addf %422, %423 : vector<32x32xf32>
    %c0_136 = arith.constant 0 : index
    %c0_137 = arith.constant 0 : index
    %425 = vector.load %arg7[%c0_136, %c0_137] : memref<32x32xf32, #tpu.memory_space<vmem>>, vector<32x32xf32>
    tpu.vector_store %arg7[%c0_136, %c0_137], %424 {strides = array<i32>} : memref<32x32xf32, #tpu.memory_space<vmem>>, vector<32x32xf32>,
    return
  }
  func.func @transform_0(%arg0: i32) -> (i32, i32) {
    %c0_i32 = arith.constant 0 : i32
    %c0_i32_0 = arith.constant 0 : i32
    %c0_i32_1 = arith.constant 0 : i32
    return %c0_i32, %c0_i32_0 : i32, i32
  }
  func.func @transform_1(%arg0: i32) -> (i32, i32) {
    %c0_i32 = arith.constant 0 : i32
    %c0_i32_0 = arith.constant 0 : i32
    %c0_i32_1 = arith.constant 0 : i32
    return %c0_i32, %c0_i32_0 : i32, i32
  }
  func.func @transform_2(%arg0: i32) -> (i32, i32) {
    %c0_i32 = arith.constant 0 : i32
    %c0_i32_0 = arith.constant 0 : i32
    %c0_i32_1 = arith.constant 0 : i32
    return %c0_i32, %c0_i32_0 : i32, i32
  }
  func.func @transform_3(%arg0: i32) -> (i32, i32) {
    %c0_i32 = arith.constant 0 : i32
    %c0_i32_0 = arith.constant 0 : i32
    %c0_i32_1 = arith.constant 0 : i32
    return %c0_i32, %c0_i32_0 : i32, i32
  }
  func.func @transform_4(%arg0: i32) -> (i32, i32) {
    %c0_i32 = arith.constant 0 : i32
    %c0_i32_0 = arith.constant 0 : i32
    %c0_i32_1 = arith.constant 0 : i32
    return %c0_i32, %c0_i32_0 : i32, i32
  }
  func.func @transform_5(%arg0: i32) -> (i32, i32) {
    %c0_i32 = arith.constant 0 : i32
    %c0_i32_0 = arith.constant 0 : i32
    %c0_i32_1 = arith.constant 0 : i32
    return %c0_i32, %c0_i32_0 : i32, i32
  }
  func.func @transform_6(%arg0: i32) -> (i32, i32) {
    %c0_i32 = arith.constant 0 : i32
    %c0_i32_0 = arith.constant 0 : i32
    %c0_i32_1 = arith.constant 0 : i32
    return %c0_i32, %c0_i32_0 : i32, i32
  }
}

</mosaic_0001>

<bundles_post_ra>
// kernel: bert_forward.1
= control target key start
LH: loop header
LB: loop body
LE: loop exit
PB: predicated region body
PF: predicated region fallthrough
CT: control target
= control target key end

     0   :  { %11 = vsyncpa [#allocation3], 0  ;;  %s5727_s0 = inlined_call_operand.vmem [shape: s32[32,1], index: 0, kind: input, shape index: {}]   ;;  %s5728_s1 = inlined_call_operand.vmem [shape: f32[32,32], index: 1, kind: input, shape index: {}]   ;;  %s5729_s2 = inlined_call_operand.vmem [shape: f32[64,32], index: 2, kind: input, shape index: {}]   ;;  %s5730_s3 = inlined_call_operand.vmem [shape: bf16[32,512], index: 3, kind: input, shape index: {}]   ;;  %s5731_s4 = inlined_call_operand.vmem [shape: f32[1,512], index: 4, kind: input, shape index: {}]   ;;  %s5732_s5 = inlined_call_operand.hbm [shape: f32[10,32], index: 5, kind: input, shape index: {}]   ;;  %s5733_s6 = inlined_call_operand.hbm [shape: f32[32,32], index: 6, kind: output, shape index: {}]  }
   0x1   :  { %12 = vsyncpa [#allocation4], 0  ;;  %s4767_s21 = smov [#allocation2]   ;;  %s4719_s25 = scalar_lea.hbm %s5732_s5, 256 }
   0x2   :  { %s28_s22 = sshll.u32 %s4767_s21, 4  ;;  %p4720_p0 = scmp.ne.s32.totalorder %s5732_s5, %s4719_s25  ;;  %s29_s22 = int_to_ptr.vmem [resolvable:$true] %s28_s22 }
   0x3   :  { %p4723_p1 = scmp.lt.u32.totalorder %s4719_s25, %s5732_s5 }
   0x5   :  { %p4725_p2 = pnand %p4723_p1, %p4720_p0 }
   0x7   :  { %4728 = shalt.err (!%p4725_p2)
}
   0x8   :  { %s4729_s30 = scalar_lea.vmem %s29_s22, 256  ;;  %p4734_p4 = scmp.lt.s32.totalorder %s29_s22, %s29_s22 }
   0x9   :  { %p4730_p3 = scmp.ne.s32.totalorder %s29_s22, %s4729_s30  ;;  %p4735_p5 = scmp.lt.s32.totalorder %s4729_s30, %s4729_s30 }
   0xb   :  { %p4736_p6 = por %p4735_p5, %p4734_p4 }
   0xd   :  { %p4737_p7 = pnand %p4736_p6, %p4730_p3 }
   0xf   :  { %4740 = shalt.err (!%p4737_p7)
}
  0x10   :  { %s4768_s7 = smov 128   ;;  %s4769_s8 = smov 8  }
  0x11   :  { %34 = dma.hbm_to_vmem [thread:$0]  %s5732_s5, 256, %s29_s22, [#allocation3], %s4768_s7, %s4768_s7, %s4769_s8  }
  0x12   :  { %4763 = dma.done.wait [#allocation3], 256  }
  0x13   :  { %4764 = vsyncadd [#allocation3], 4294967040  ;;  %v4770_v0 = vmov 0   ;;  %v41_v1 = vld [vmem:[%s5727_s0 + $0x10] sm:$0xff]  ;;  %v39_v2 = vld [vmem:[%s5727_s0] sm:$0xff]  ;;  %v43_v17 = vlaneseq  ;;  %vm77_vm0 = vcmask 523264  }
  0x14   :  { %4372 = vset.pattern.permute.xlu1 %v4770_v0  ;;  %4371 = vset.pattern.permute.xlu0 %v4770_v0  ;;  %v42_v3 = vld [vmem:[%s5727_s0 + $0x18] sm:$0xff]  ;;  %v69_v4 = vld [vmem:[%s5729_s2] sm:$0xff]  ;;  %v70_v5 = vld [vmem:[%s5729_s2 + $0x8] sm:$0xff]  ;;  %v4771_v21 = vmov 0.0   ;;  %vm204_vm5 = vcmask 261120   ;;  %vm268_vm6 = vcmask 64512  }
  0x15   :  { %52 = vperm.xlu1 %4372, %v41_v1   ;;  %46 = vperm.xlu0 %4371, %v39_v2   ;;  %v40_v6 = vld [vmem:[%s5727_s0 + $0x8] sm:$0xff]  ;;  %v4311_v7 = vpack.c.bf16 %v70_v5, %v69_v4  ;;  %v71_v8 = vld [vmem:[%s5729_s2 + $0x10] sm:$0xff]  ;;  %v72_v9 = vld [vmem:[%s5729_s2 + $0x18] sm:$0xff]  ;;  %v44_v18 = vand.u32 127, %v43_v17  ;;  %s4772_s16 = smov 96   ;;  %s4773_s24 = smov 64  }
  0x16   :  { %v4315_v10 = vpack.c.bf16 %v72_v9, %v71_v8  ;;  %v73_v11 = vld [vmem:[%s5729_s2 + $0x20] sm:$0xff]  ;;  %v74_v12 = vld [vmem:[%s5729_s2 + $0x28] sm:$0xff]  ;;  %v75_v13 = vld [vmem:[%s5729_s2 + $0x30] sm:$0xff]  ;;  %s4774_s25 = smov 88   ;;  %s4775_s26 = smov 120   ;;  %vm1017_vm7 = vcmask 130048  }
  0x17   :  { %4312 = vmatprep.subr.bf16.mxu0 %v4311_v7  ;;  %v76_v14 = vld [vmem:[%s5729_s2 + $0x38] sm:$0xff]  ;;  %v4319_v15 = vpack.c.bf16 %v74_v12, %v73_v11  ;;  %v4881_v28 = vld [vmem:[%s5730_s3] ss:$16 sps:$4 sm:$0xff]   ;;  %v4944_v55 = vld [vmem:[%s5728_s1 + $0x8] sm:$0xff]  ;;  %s4776_s27 = smov 56   ;;  %s4777_s28 = smov 80  }
  0x18   :  { %4314 = vmatpush3.bf16.msra.mxu0 %v4311_v7  ;;  %v4323_v16 = vpack.c.bf16 %v76_v14, %v75_v13  ;;  %4031 = vmatprep.subr.bf16.mxu1 %v4881_v28  ;;  %v4888_v29 = vld [vmem:[%s5730_s3 + $0x20] ss:$16 sps:$4 sm:$0xff]   ;;  %v4953_v62 = vld [vmem:[%s5728_s1 + $0x18] sm:$0xff]  ;;  %s4778_s29 = smov 112   ;;  %s4779_s0 = smov 48   ;;  %vm1022_vm8 = vcmask 195584  }
  0x19   :  { %55 = vperm.xlu1 %4372, %v42_v3   ;;  %49 = vperm.xlu0 %4371, %v40_v6   ;;  %v4909_v37 = vld [vmem:[%s5731_s4] ss:$0 sm:$0xff]  ;;  %v4939_v53 = vld [vmem:[%s5728_s1 + $0x10] sm:$0xff]  ;;  %s4780_s30 = smov 72   ;;  %s4781_s9 = smov 104  }
  0x1a   :  { %4316 = vmatprep.subr.bf16.mxu0 %v4315_v10  ;;  %4032 = vmatpush3.bf16.msra.mxu1 %v4881_v28  ;;  %v4934_v51 = vld [vmem:[%s5728_s1] sm:$0xff]  ;;  %s4782_s10 = smov 40   ;;  %s4783_s2 = smov 32  }
  0x1b   :  { %4033 = vmatprep.subr.bf16.mxu1 %v4888_v29  ;;  %s4784_s11 = smov 16   ;;  %s4785_s12 = smov 24  }
  0x1c   :  { %4318 = vmatpush3.bf16.msra.mxu0 %v4315_v10 }
  0x1d   :  { %4320 = vmatprep.subr.bf16.mxu0 %v4319_v15 }
  0x1e   :  { %4034 = vmatpush3.bf16.msra.mxu1 %v4888_v29 }
  0x20   :  { %4322 = vmatpush3.bf16.msra.mxu0 %v4319_v15 }
  0x21   :  { %4324 = vmatprep.subr.bf16.mxu0 %v4323_v16 }
  0x24   :  { %4326 = vmatpush3.bf16.msra.mxu0 %v4323_v16 }
  0x94   :  { %v53_v19 = vpop.permute.xlu1 %52  ;;  %v47_v20 = vpop.permute.xlu0 %46 }
  0x95   :  { %vm57_vm1 = vcmp.eq.s32.totalorder %v47_v20, %v44_v18  ;;  %vm59_vm2 = vcmp.eq.s32.totalorder %v53_v19, %v44_v18 }
  0x96   :  { %v3749_v22 = vsel %vm57_vm1, 1.0, %v4771_v21  ;;  %v3751_v25 = vsel %vm59_vm2, 1.0, %v4771_v21 }
  0x97   :  { %4025 = vmatprep.mubr.msk.f32.mxu0 %vm77_vm0, %v3749_v22 }
  0x98   :  { %v56_v23 = vpop.permute.xlu1 %55  ;;  %v50_v24 = vpop.permute.xlu0 %49 }
  0x99   :  { %vm58_vm3 = vcmp.eq.s32.totalorder %v50_v24, %v44_v18  ;;  %vm60_vm4 = vcmp.eq.s32.totalorder %v56_v23, %v44_v18 }
  0x9a   :  { %v3750_v26 = vsel %vm58_vm3, 1.0, %v4771_v21  ;;  %v3752_v27 = vsel %vm60_vm4, 1.0, %v4771_v21 }
  0x9b   :  { %4026 = vmatmul.mubr.msk.f32.vlgmr.msra.gmra.mrb[0].mxu0 %vm77_vm0, %v3750_v26 }
  0x9c   :  { %4028 = vmatprep.mubr.msk.f32.mxu0 %vm77_vm0, %v3751_v25 }
  0x9f   :  { %4029 = vmatmul.mubr.msk.f32.gmra.mrb[2].mxu0 %vm77_vm0, %v3752_v27 }
 0x16e   :  { %v4892_v30 = vpop.f32.mrb[0].mxu0 }
 0x16f   :  { %v4894_v31 = vpop.f32.mrb[1].mxu0 }
 0x170   :  { %v184_v32 = vpack.c.bf16 %v4892_v30, %v4894_v31 }
 0x172   :  { %v4898_v33 = vpop.f32.mrb[2].mxu0  ;;  %4035 = vmatprep.mubr.msk.bf16.mxu1 %vm204_vm5, %v184_v32 }
 0x173   :  { %v4901_v34 = vpop.f32.mrb[3].mxu0 }
 0x174   :  { %v185_v35 = vpack.c.bf16 %v4898_v33, %v4901_v34 }
 0x176   :  { %4036 = vmatmul.mubr.msk.bf16.vlgmr.msra.gmra.mrb[0].mxu1 %vm204_vm5, %v185_v35 }
 0x249   :  { %v4037_v36 = vpop.f32.mrb[0].mxu1 }
 0x24a   :  { %v245_v38 = vpop.f32.mrb[1].mxu1  ;;  %v254_v40 = vadd.f32 %v4037_v36, %v4909_v37 }
 0x24b   :  { %v4038_v39 = vpop.f32.mrb[2].mxu1  ;;  %v246_v43 = vadd.f32 %v4909_v37, %v245_v38 }
 0x24c   :  { %v257_v41 = vadd.f32 %v4038_v39, %v4909_v37  ;;  %v248_v42 = vpop.f32.mrb[3].mxu1 }
 0x24d   :  { %v249_v44 = vadd.f32 %v4909_v37, %v248_v42 }
 0x24e   :  { %v4915_v45 = vpack.c.bf16 %v257_v41, %v254_v40 }
 0x24f   :  { %v4917_v46 = vpack.c.bf16 %v249_v44, %v246_v43 }
 0x250   :  { %266 = vrot.lane.b32.xlu1 %v4915_v45, %s4772_s16 }
 0x251   :  { %264 = vrot.lane.b32.xlu0 %v4917_v46, %s4772_s16  ;;  %4043 = vmatprep.mubr.msk.bf16.mxu1 %vm268_vm6, %v4917_v46 }
 0x2c2   :  { %v267_v49 = vpop.permute.xlu1 %266 }
 0x2c3   :  { %v265_v47 = vpop.permute.xlu0 %264  ;;  %v279_v50 = vsel %vm268_vm6, %v267_v49, 0 }
 0x2c4   :  { %4327 = vmatprep.subr.msk.bf16.mxu1 %vm268_vm6, %v265_v47  ;;  %v276_v48 = vsel %vm268_vm6, %v265_v47, 0 }
 0x2c5   :  { %4040 = vmatpush3.bf16.xpose.msra.mxu1 %v276_v48 }
 0x2c6   :  { %4328 = vmatprep.subr.msk.bf16.mxu1 %vm268_vm6, %v267_v49 }
 0x2cd   :  { %4042 = vmatpush3.bf16.xpose.msra.mxu1 %v279_v50 }
 0x2d4   :  { %4044 = vmatmul.mubr.msk.bf16.vlgmr.msra.gmra.mrb[4].mxu1 %vm268_vm6, %v4915_v45 }
 0x3a7   :  { %v4045_v52 = vpop.f32.mrb[4].mxu1 }
 0x3a8   :  { %v315_v54 = vpop.f32.mrb[5].mxu1  ;;  %v324_v59 = vadd.f32 %v4045_v52, %v4939_v53 }
 0x3a9   :  { %v316_v56 = vadd.f32 %v315_v54, %v4934_v51  ;;  %v4046_v57 = vpop.f32.mrb[6].mxu1 }
 0x3aa   :  { %v318_v58 = vpop.f32.mrb[7].mxu1  ;;  %v327_v0 = vadd.f32 %v4046_v57, %v4953_v62  ;;  %v336_v1 = vsel %vm204_vm5, %v324_v59, -inf }
 0x3ab   :  { %v319_v60 = vadd.f32 %v318_v58, %v4944_v55  ;;  %v330_v61 = vsel %vm204_vm5, %v316_v56, -inf }
 0x3ac   :  { %331 = vmax.xlane.f32.xlu0 %v330_v61  ;;  %v339_v2 = vsel %vm204_vm5, %v327_v0, -inf }
 0x3ad   :  { %v333_v63 = vsel %vm204_vm5, %v319_v60, -inf }
 0x3ae   :  { %334 = vmax.xlane.f32.xlu1 %v333_v63 }
 0x3b0   :  { %337 = vmax.xlane.f32.xlu0 %v336_v1 }
 0x3b4   :  { %340 = vmax.xlane.f32.xlu0 %v339_v2 }
 0x3bf   :  { %376 = vrot.lane.b32.xlu1 %v4917_v46, %s4773_s24 }
 0x439   :  { %v332_v3 = vpop.xlane.xlu0 %331 }
 0x43a   :  { %v342_v5 = vsub.f32 %v316_v56, %v332_v3 }
 0x43b   :  { %v335_v4 = vpop.xlane.xlu1 %334 }
 0x43c   :  { %v346_v9 = vmul.f32 1.442695, %v342_v5  ;;  %v343_v10 = vsub.f32 %v319_v60, %v335_v4 }
 0x43d   :  { %v338_v6 = vpop.xlane.xlu0 %337 }
 0x43e   :  { %v344_v7 = vsub.f32 %v324_v59, %v338_v6  ;;  %v348_v14 = vmul.f32 1.442695, %v343_v10 }
 0x43f   :  { %v377_v8 = vpop.permute.xlu1 %376 }
 0x440   :  { %v350_v11 = vmul.f32 1.442695, %v344_v7  ;;  %4047 = vmatprep.subr.bf16.mxu0 %v377_v8 }
 0x441   :  { %4048 = vmatpush3.bf16.msra.mxu0 %v377_v8  ;;  %v341_v12 = vpop.xlane.xlu0 %340 }
 0x442   :  { %4483 = vpow2.f32 %v350_v11  ;;  %v345_v13 = vsub.f32 %v327_v0, %v341_v12 }
 0x443   :  { %4485 = vpow2.f32 %v346_v9 }
 0x444   :  { %v352_v15 = vmul.f32 1.442695, %v345_v13 }
 0x446   :  { %4487 = vpow2.f32 %v352_v15 }
 0x447   :  { %4489 = vpow2.f32 %v348_v14 }
 0x44c   :  { %v4484_v16 = vpop.eup %4483 }
 0x44d   :  { %v360_v18 = vsel %vm204_vm5, %v4484_v16, 0.0  ;;  %v4486_v19 = vpop.eup %4485 }
 0x44e   :  { %361 = vadd.xlane.f32.xlu1 %v360_v18  ;;  %v354_v21 = vsel %vm204_vm5, %v4486_v19, 0.0 }
 0x450   :  { %v4488_v20 = vpop.eup %4487 }
 0x451   :  { %v363_v22 = vsel %vm204_vm5, %v4488_v20, 0.0  ;;  %v4490_v23 = vpop.eup %4489 }
 0x452   :  { %355 = vadd.xlane.f32.xlu1 %v354_v21  ;;  %364 = vadd.xlane.f32.xlu0 %v363_v22  ;;  %v357_v24 = vsel %vm204_vm5, %v4490_v23, 0.0 }
 0x456   :  { %358 = vadd.xlane.f32.xlu0 %v357_v24 }
 0x463   :  { %441 = vrot.lane.b32.xlu1 %v4917_v46, %s4774_s25 }
 0x467   :  { %443 = vrot.lane.b32.xlu1 %v4915_v45, %s4774_s25 }
 0x46b   :  { %439 = vrot.lane.b32.xlu1 %v4915_v45, %s4775_s26 }
 0x46c   :  { %378 = vrot.lane.b32.xlu0 %v4915_v45, %s4773_s24 }
 0x470   :  { %437 = vrot.lane.b32.xlu0 %v4917_v46, %s4775_s26 }
 0x4db   :  { %v362_v25 = vpop.xlane.xlu1 %361 }
 0x4df   :  { %v356_v26 = vpop.xlane.xlu1 %355  ;;  %v365_v27 = vpop.xlane.xlu0 %364 }
 0x4e0   :  { %4491 = vrcp.f32 %v365_v27 }
 0x4e1   :  { %4493 = vrcp.f32 %v356_v26 }
 0x4e2   :  { %4495 = vrcp.f32 %v362_v25 }
 0x4e3   :  { %v359_v32 = vpop.xlane.xlu0 %358  ;;  %v442_v36 = vpop.permute.xlu1 %441 }
 0x4e4   :  { %4497 = vrcp.f32 %v359_v32  ;;  %v452_v52 = vsel %vm268_vm6, %v442_v36, 0 }
 0x4e7   :  { %v379_v35 = vpop.permute.xlu0 %378  ;;  %v444_v54 = vpop.permute.xlu1 %443 }
 0x4e8   :  { %4049 = vmatprep.subr.bf16.mxu0 %v379_v35  ;;  %v455_v56 = vsel %vm268_vm6, %v444_v54, 0 }
 0x4e9   :  { %4050 = vmatpush3.bf16.msra.mxu0 %v379_v35 }
 0x4ea   :  { %4329 = vmatprep.subr.msk.bf16.mxu0 %vm268_vm6, %v442_v36  ;;  %v4492_v38 = vpop.eup %4491 }
 0x4eb   :  { %v4494_v39 = vpop.eup %4493  ;;  %v373_v42 = vmul.f32 %v4492_v38, %v4488_v20  ;;  %v438_v50 = vpop.permute.xlu0 %437 }
 0x4ec   :  { %v4496_v40 = vpop.eup %4495  ;;  %v367_v43 = vmul.f32 %v4494_v39, %v4486_v19  ;;  %v440_v57 = vpop.permute.xlu1 %439 }
 0x4ed   :  { %v371_v47 = vmul.f32 %v4496_v40, %v4484_v16 }
 0x4ee   :  { %v4498_v41 = vpop.eup %4497 }
 0x4ef   :  { %v369_v44 = vmul.f32 %v4498_v41, %v4490_v23  ;;  %v375_v49 = vpack.c.bf16 %v373_v42, %v371_v47 }
 0x4f1   :  { %v374_v48 = vpack.c.bf16 %v369_v44, %v367_v43 }
 0x4f3   :  { %4051 = vmatprep.mubr.msk.bf16.mxu0 %vm204_vm5, %v374_v48 }
 0x4f4   :  { %4052 = vmatmul.mubr.msk.bf16.vlgmr.msra.gmra.mrb[4].mxu0 %vm204_vm5, %v375_v49 }
 0x4f5   :  { %4056 = vmatpush3.bf16.xpose.msra.mxu0 %v452_v52  ;;  %4059 = vmatprep.mubr.msk.bf16.mxu0 %vm268_vm6, %v438_v50 }
 0x4f6   :  { %4330 = vmatprep.subr.msk.bf16.mxu0 %vm268_vm6, %v444_v54 }
 0x4fd   :  { %4058 = vmatpush3.bf16.xpose.msra.mxu0 %v455_v56 }
 0x504   :  { %4060 = vmatmul.mubr.msk.bf16.vlgmr.msra.gmra.mrb[8].mxu0 %vm268_vm6, %v440_v57 }
 0x5c7   :  { %v4983_v58 = vpop.f32.mrb[4].mxu0 }
 0x5c8   :  { %v4985_v59 = vpop.f32.mrb[5].mxu0 }
 0x5c9   :  { %v4987_v60 = vpop.f32.mrb[6].mxu0 }
 0x5ca   :  { %v4989_v61 = vpop.f32.mrb[7].mxu0 }
 0x5d7   :  { %v4061_v63 = vpop.f32.mrb[8].mxu0 }
 0x5d8   :  { %v491_v0 = vpop.f32.mrb[9].mxu0  ;;  %v500_v4 = vadd.f32 %v4061_v63, %v4939_v53 }
 0x5d9   :  { %v492_v1 = vadd.f32 %v491_v0, %v4934_v51  ;;  %v4062_v2 = vpop.f32.mrb[10].mxu0 }
 0x5da   :  { %v494_v3 = vpop.f32.mrb[11].mxu0  ;;  %v503_v8 = vadd.f32 %v4062_v2, %v4953_v62  ;;  %v512_v9 = vsel %vm204_vm5, %v500_v4, -inf }
 0x5db   :  { %v495_v5 = vadd.f32 %v494_v3, %v4944_v55  ;;  %v506_v6 = vsel %vm204_vm5, %v492_v1, -inf }
 0x5dc   :  { %507 = vmax.xlane.f32.xlu0 %v506_v6  ;;  %v515_v10 = vsel %vm204_vm5, %v503_v8, -inf }
 0x5dd   :  { %v509_v7 = vsel %vm204_vm5, %v495_v5, -inf }
 0x5de   :  { %510 = vmax.xlane.f32.xlu1 %v509_v7 }
 0x5e0   :  { %513 = vmax.xlane.f32.xlu0 %v512_v9 }
 0x5e4   :  { %516 = vmax.xlane.f32.xlu0 %v515_v10 }
 0x5ef   :  { %552 = vrot.lane.b32.xlu1 %v4917_v46, %s4776_s27 }
 0x669   :  { %v508_v11 = vpop.xlane.xlu0 %507 }
 0x66a   :  { %v518_v13 = vsub.f32 %v492_v1, %v508_v11 }
 0x66b   :  { %v511_v12 = vpop.xlane.xlu1 %510 }
 0x66c   :  { %v522_v18 = vmul.f32 1.442695, %v518_v13  ;;  %v519_v19 = vsub.f32 %v495_v5, %v511_v12 }
 0x66d   :  { %v514_v14 = vpop.xlane.xlu0 %513 }
 0x66e   :  { %v520_v15 = vsub.f32 %v500_v4, %v514_v14  ;;  %v524_v23 = vmul.f32 1.442695, %v519_v19 }
 0x66f   :  { %v553_v16 = vpop.permute.xlu1 %552 }
 0x670   :  { %v526_v20 = vmul.f32 1.442695, %v520_v15  ;;  %4063 = vmatprep.subr.bf16.mxu1 %v553_v16 }
 0x671   :  { %4064 = vmatpush3.bf16.msra.mxu1 %v553_v16  ;;  %v517_v21 = vpop.xlane.xlu0 %516 }
 0x672   :  { %4499 = vpow2.f32 %v526_v20  ;;  %v521_v22 = vsub.f32 %v503_v8, %v517_v21 }
 0x673   :  { %4501 = vpow2.f32 %v522_v18 }
 0x674   :  { %v528_v24 = vmul.f32 1.442695, %v521_v22 }
 0x676   :  { %4503 = vpow2.f32 %v528_v24 }
 0x677   :  { %4505 = vpow2.f32 %v524_v23 }
 0x67c   :  { %v4500_v25 = vpop.eup %4499 }
 0x67d   :  { %v536_v26 = vsel %vm204_vm5, %v4500_v25, 0.0  ;;  %v4502_v27 = vpop.eup %4501 }
 0x67e   :  { %537 = vadd.xlane.f32.xlu1 %v536_v26  ;;  %v530_v35 = vsel %vm204_vm5, %v4502_v27, 0.0 }
 0x680   :  { %v4504_v32 = vpop.eup %4503 }
 0x681   :  { %v539_v36 = vsel %vm204_vm5, %v4504_v32, 0.0  ;;  %v4506_v38 = vpop.eup %4505 }
 0x682   :  { %531 = vadd.xlane.f32.xlu1 %v530_v35  ;;  %540 = vadd.xlane.f32.xlu0 %v539_v36  ;;  %v533_v39 = vsel %vm204_vm5, %v4506_v38, 0.0 }
 0x686   :  { %534 = vadd.xlane.f32.xlu0 %v533_v39 }
 0x693   :  { %617 = vrot.lane.b32.xlu1 %v4917_v46, %s4777_s28 }
 0x697   :  { %619 = vrot.lane.b32.xlu1 %v4915_v45, %s4777_s28 }
 0x69b   :  { %615 = vrot.lane.b32.xlu1 %v4915_v45, %s4778_s29 }
 0x69c   :  { %554 = vrot.lane.b32.xlu0 %v4915_v45, %s4776_s27 }
 0x6a0   :  { %613 = vrot.lane.b32.xlu0 %v4917_v46, %s4778_s29 }
 0x70b   :  { %v538_v40 = vpop.xlane.xlu1 %537 }
 0x70f   :  { %v532_v41 = vpop.xlane.xlu1 %531  ;;  %v541_v42 = vpop.xlane.xlu0 %540 }
 0x710   :  { %4507 = vrcp.f32 %v541_v42 }
 0x711   :  { %4509 = vrcp.f32 %v532_v41 }
 0x712   :  { %4511 = vrcp.f32 %v538_v40 }
 0x713   :  { %v535_v43 = vpop.xlane.xlu0 %534  ;;  %v618_v47 = vpop.permute.xlu1 %617 }
 0x714   :  { %4513 = vrcp.f32 %v535_v43  ;;  %v628_v3 = vsel %vm268_vm6, %v618_v47, 0 }
 0x717   :  { %v555_v44 = vpop.permute.xlu0 %554  ;;  %v620_v4 = vpop.permute.xlu1 %619 }
 0x718   :  { %4065 = vmatprep.subr.bf16.mxu1 %v555_v44  ;;  %v631_v5 = vsel %vm268_vm6, %v620_v4, 0 }
 0x719   :  { %4066 = vmatpush3.bf16.msra.mxu1 %v555_v44 }
 0x71a   :  { %4331 = vmatprep.subr.msk.bf16.mxu1 %vm268_vm6, %v618_v47  ;;  %v4508_v48 = vpop.eup %4507 }
 0x71b   :  { %v4510_v49 = vpop.eup %4509  ;;  %v549_v54 = vmul.f32 %v4508_v48, %v4504_v32  ;;  %v614_v2 = vpop.permute.xlu0 %613 }
 0x71c   :  { %v4512_v50 = vpop.eup %4511  ;;  %v543_v56 = vmul.f32 %v4510_v49, %v4502_v27  ;;  %v616_v6 = vpop.permute.xlu1 %615 }
 0x71d   :  { %v547_v63 = vmul.f32 %v4512_v50, %v4500_v25 }
 0x71e   :  { %v4514_v52 = vpop.eup %4513 }
 0x71f   :  { %v545_v57 = vmul.f32 %v4514_v52, %v4506_v38  ;;  %v551_v1 = vpack.c.bf16 %v549_v54, %v547_v63 }
 0x721   :  { %v550_v0 = vpack.c.bf16 %v545_v57, %v543_v56 }
 0x723   :  { %4067 = vmatprep.mubr.msk.bf16.mxu1 %vm204_vm5, %v550_v0 }
 0x724   :  { %4068 = vmatmul.mubr.msk.bf16.vlgmr.msra.gmra.mrb[8].mxu1 %vm204_vm5, %v551_v1 }
 0x725   :  { %4072 = vmatpush3.bf16.xpose.msra.mxu1 %v628_v3  ;;  %4075 = vmatprep.mubr.msk.bf16.mxu1 %vm268_vm6, %v614_v2 }
 0x726   :  { %4332 = vmatprep.subr.msk.bf16.mxu1 %vm268_vm6, %v620_v4 }
 0x72d   :  { %4074 = vmatpush3.bf16.xpose.msra.mxu1 %v631_v5 }
 0x734   :  { %4076 = vmatmul.mubr.msk.bf16.vlgmr.msra.gmra.mrb[12].mxu1 %vm268_vm6, %v616_v6 }
 0x7f7   :  { %v5023_v7 = vpop.f32.mrb[8].mxu1 }
 0x7f8   :  { %v5025_v8 = vpop.f32.mrb[9].mxu1 }
 0x7f9   :  { %v5027_v9 = vpop.f32.mrb[10].mxu1 }
 0x7fa   :  { %v4378_v10 = vpack.i.bf16 %v5027_v9, %v5023_v7  ;;  %v5031_v11 = vpop.f32.mrb[11].mxu1 }
 0x7fb   :  { %v4373_v12 = vpack.i.bf16 %v5031_v11, %v5025_v8 }
 0x807   :  { %v4077_v13 = vpop.f32.mrb[12].mxu1 }
 0x808   :  { %v667_v14 = vpop.f32.mrb[13].mxu1  ;;  %v676_v19 = vadd.f32 %v4077_v13, %v4939_v53 }
 0x809   :  { %v668_v15 = vadd.f32 %v667_v14, %v4934_v51  ;;  %v4078_v16 = vpop.f32.mrb[14].mxu1 }
 0x80a   :  { %v670_v18 = vpop.f32.mrb[15].mxu1  ;;  %v679_v23 = vadd.f32 %v4078_v16, %v4953_v62  ;;  %v688_v24 = vsel %vm204_vm5, %v676_v19, -inf }
 0x80b   :  { %v671_v20 = vadd.f32 %v670_v18, %v4944_v55  ;;  %v682_v21 = vsel %vm204_vm5, %v668_v15, -inf }
 0x80c   :  { %683 = vmax.xlane.f32.xlu0 %v682_v21  ;;  %v691_v25 = vsel %vm204_vm5, %v679_v23, -inf }
 0x80d   :  { %v685_v22 = vsel %vm204_vm5, %v671_v20, -inf }
 0x80e   :  { %686 = vmax.xlane.f32.xlu1 %v685_v22 }
 0x810   :  { %689 = vmax.xlane.f32.xlu0 %v688_v24 }
 0x814   :  { %692 = vmax.xlane.f32.xlu0 %v691_v25 }
 0x81f   :  { %728 = vrot.lane.b32.xlu1 %v4917_v46, %s4779_s0 }
 0x899   :  { %v684_v26 = vpop.xlane.xlu0 %683 }
 0x89a   :  { %v694_v32 = vsub.f32 %v668_v15, %v684_v26 }
 0x89b   :  { %v687_v27 = vpop.xlane.xlu1 %686 }
 0x89c   :  { %v698_v39 = vmul.f32 1.442695, %v694_v32  ;;  %v695_v40 = vsub.f32 %v671_v20, %v687_v27 }
 0x89d   :  { %v690_v35 = vpop.xlane.xlu0 %689 }
 0x89e   :  { %v696_v36 = vsub.f32 %v676_v19, %v690_v35  ;;  %v700_v44 = vmul.f32 1.442695, %v695_v40 }
 0x89f   :  { %v729_v38 = vpop.permute.xlu1 %728 }
 0x8a0   :  { %v702_v41 = vmul.f32 1.442695, %v696_v36  ;;  %4079 = vmatprep.subr.bf16.mxu0 %v729_v38 }
 0x8a1   :  { %4080 = vmatpush3.bf16.msra.mxu0 %v729_v38  ;;  %v693_v42 = vpop.xlane.xlu0 %692 }
 0x8a2   :  { %4515 = vpow2.f32 %v702_v41  ;;  %v697_v43 = vsub.f32 %v679_v23, %v693_v42 }
 0x8a3   :  { %4517 = vpow2.f32 %v698_v39 }
 0x8a4   :  { %v704_v47 = vmul.f32 1.442695, %v697_v43 }
 0x8a6   :  { %4519 = vpow2.f32 %v704_v47 }
 0x8a7   :  { %4521 = vpow2.f32 %v700_v44 }
 0x8ac   :  { %v4516_v48 = vpop.eup %4515 }
 0x8ad   :  { %v712_v49 = vsel %vm204_vm5, %v4516_v48, 0.0  ;;  %v4518_v50 = vpop.eup %4517 }
 0x8ae   :  { %713 = vadd.xlane.f32.xlu1 %v712_v49  ;;  %v706_v54 = vsel %vm204_vm5, %v4518_v50, 0.0 }
 0x8b0   :  { %v4520_v52 = vpop.eup %4519 }
 0x8b1   :  { %v715_v56 = vsel %vm204_vm5, %v4520_v52, 0.0  ;;  %v4522_v57 = vpop.eup %4521 }
 0x8b2   :  { %707 = vadd.xlane.f32.xlu1 %v706_v54  ;;  %716 = vadd.xlane.f32.xlu0 %v715_v56  ;;  %v709_v63 = vsel %vm204_vm5, %v4522_v57, 0.0 }
 0x8b6   :  { %710 = vadd.xlane.f32.xlu0 %v709_v63 }
 0x8c3   :  { %793 = vrot.lane.b32.xlu1 %v4917_v46, %s4780_s30 }
 0x8c7   :  { %795 = vrot.lane.b32.xlu1 %v4915_v45, %s4780_s30 }
 0x8cb   :  { %791 = vrot.lane.b32.xlu1 %v4915_v45, %s4781_s9 }
 0x8cc   :  { %730 = vrot.lane.b32.xlu0 %v4915_v45, %s4779_s0 }
 0x8d0   :  { %789 = vrot.lane.b32.xlu0 %v4917_v46, %s4781_s9 }
 0x93b   :  { %v714_v0 = vpop.xlane.xlu1 %713 }
 0x93f   :  { %v708_v1 = vpop.xlane.xlu1 %707  ;;  %v717_v2 = vpop.xlane.xlu0 %716 }
 0x940   :  { %4523 = vrcp.f32 %v717_v2 }
 0x941   :  { %4525 = vrcp.f32 %v708_v1 }
 0x942   :  { %4527 = vrcp.f32 %v714_v0 }
 0x943   :  { %v711_v3 = vpop.xlane.xlu0 %710  ;;  %v794_v5 = vpop.permute.xlu1 %793 }
 0x944   :  { %4529 = vrcp.f32 %v711_v3  ;;  %v804_v24 = vsel %vm268_vm6, %v794_v5, 0 }
 0x947   :  { %v731_v4 = vpop.permute.xlu0 %730  ;;  %v796_v25 = vpop.permute.xlu1 %795 }
 0x948   :  { %4081 = vmatprep.subr.bf16.mxu0 %v731_v4  ;;  %v807_v26 = vsel %vm268_vm6, %v796_v25, 0 }
 0x949   :  { %4082 = vmatpush3.bf16.msra.mxu0 %v731_v4 }
 0x94a   :  { %4333 = vmatprep.subr.msk.bf16.mxu0 %vm268_vm6, %v794_v5  ;;  %v4524_v6 = vpop.eup %4523 }
 0x94b   :  { %v4526_v13 = vpop.eup %4525  ;;  %v725_v16 = vmul.f32 %v4524_v6, %v4520_v52  ;;  %v790_v23 = vpop.permute.xlu0 %789 }
 0x94c   :  { %v4528_v14 = vpop.eup %4527  ;;  %v719_v18 = vmul.f32 %v4526_v13, %v4518_v50  ;;  %v792_v27 = vpop.permute.xlu1 %791 }
 0x94d   :  { %v723_v20 = vmul.f32 %v4528_v14, %v4516_v48 }
 0x94e   :  { %v4530_v15 = vpop.eup %4529 }
 0x94f   :  { %v721_v19 = vmul.f32 %v4530_v15, %v4522_v57  ;;  %v727_v22 = vpack.c.bf16 %v725_v16, %v723_v20 }
 0x951   :  { %v726_v21 = vpack.c.bf16 %v721_v19, %v719_v18 }
 0x953   :  { %4083 = vmatprep.mubr.msk.bf16.mxu0 %vm204_vm5, %v726_v21 }
 0x954   :  { %4084 = vmatmul.mubr.msk.bf16.vlgmr.msra.gmra.mrb[12].mxu0 %vm204_vm5, %v727_v22 }
 0x955   :  { %4088 = vmatpush3.bf16.xpose.msra.mxu0 %v804_v24  ;;  %4091 = vmatprep.mubr.msk.bf16.mxu0 %vm268_vm6, %v790_v23 }
 0x956   :  { %4334 = vmatprep.subr.msk.bf16.mxu0 %vm268_vm6, %v796_v25 }
 0x95d   :  { %4090 = vmatpush3.bf16.xpose.msra.mxu0 %v807_v26 }
 0x964   :  { %4092 = vmatmul.mubr.msk.bf16.vlgmr.msra.gmra.mrb[16].mxu0 %vm268_vm6, %v792_v27 }
 0xa27   :  { %v4085_v32 = vpop.f32.mrb[12].mxu0 }
 0xa28   :  { %v774_v35 = vpop.f32.mrb[13].mxu0 }
 0xa29   :  { %v4086_v36 = vpop.f32.mrb[14].mxu0 }
 0xa2a   :  { %v4388_v38 = vpack.i.bf16 %v4086_v36, %v4085_v32  ;;  %v777_v39 = vpop.f32.mrb[15].mxu0 }
 0xa2b   :  { %v4383_v40 = vpack.i.bf16 %v777_v39, %v774_v35 }
 0xa37   :  { %v4093_v41 = vpop.f32.mrb[16].mxu0 }
 0xa38   :  { %v843_v42 = vpop.f32.mrb[17].mxu0  ;;  %v852_v48 = vadd.f32 %v4093_v41, %v4939_v53 }
 0xa39   :  { %v844_v43 = vadd.f32 %v843_v42, %v4934_v51  ;;  %v4094_v44 = vpop.f32.mrb[18].mxu0 }
 0xa3a   :  { %v846_v47 = vpop.f32.mrb[19].mxu0  ;;  %v855_v54 = vadd.f32 %v4094_v44, %v4953_v62  ;;  %v864_v56 = vsel %vm204_vm5, %v852_v48, -inf }
 0xa3b   :  { %v847_v49 = vadd.f32 %v846_v47, %v4944_v55  ;;  %v858_v50 = vsel %vm204_vm5, %v844_v43, -inf }
 0xa3c   :  { %859 = vmax.xlane.f32.xlu0 %v858_v50  ;;  %v867_v57 = vsel %vm204_vm5, %v855_v54, -inf }
 0xa3d   :  { %v861_v52 = vsel %vm204_vm5, %v847_v49, -inf }
 0xa3e   :  { %862 = vmax.xlane.f32.xlu1 %v861_v52 }
 0xa40   :  { %865 = vmax.xlane.f32.xlu0 %v864_v56 }
 0xa44   :  { %868 = vmax.xlane.f32.xlu0 %v867_v57 }
 0xac9   :  { %v860_v51 = vpop.xlane.xlu0 %859 }
 0xaca   :  { %v870_v63 = vsub.f32 %v844_v43, %v860_v51 }
 0xacb   :  { %v863_v0 = vpop.xlane.xlu1 %862 }
 0xacc   :  { %v874_v55 = vmul.f32 1.442695, %v870_v63  ;;  %v871_v2 = vsub.f32 %v847_v49, %v863_v0 }
 0xacd   :  { %v866_v53 = vpop.xlane.xlu0 %865 }
 0xace   :  { %v872_v1 = vsub.f32 %v852_v48, %v866_v53  ;;  %v876_v6 = vmul.f32 1.442695, %v871_v2 }
 0xad0   :  { %v878_v3 = vmul.f32 1.442695, %v872_v1 }
 0xad1   :  { %v869_v4 = vpop.xlane.xlu0 %868 }
 0xad2   :  { %4531 = vpow2.f32 %v878_v3  ;;  %v873_v5 = vsub.f32 %v855_v54, %v869_v4 }
 0xad3   :  { %4533 = vpow2.f32 %v874_v55 }
 0xad4   :  { %v880_v62 = vmul.f32 1.442695, %v873_v5 }
 0xad6   :  { %4535 = vpow2.f32 %v880_v62 }
 0xad7   :  { %4537 = vpow2.f32 %v876_v6 }
 0xadc   :  { %v4532_v13 = vpop.eup %4531 }
 0xadd   :  { %v888_v14 = vsel %vm204_vm5, %v4532_v13, 0.0  ;;  %v4534_v15 = vpop.eup %4533 }
 0xade   :  { %889 = vadd.xlane.f32.xlu1 %v888_v14  ;;  %v882_v18 = vsel %vm204_vm5, %v4534_v15, 0.0 }
 0xae0   :  { %v4536_v16 = vpop.eup %4535 }
 0xae1   :  { %v891_v19 = vsel %vm204_vm5, %v4536_v16, 0.0  ;;  %v4538_v20 = vpop.eup %4537 }
 0xae2   :  { %883 = vadd.xlane.f32.xlu1 %v882_v18  ;;  %892 = vadd.xlane.f32.xlu0 %v891_v19  ;;  %v885_v21 = vsel %vm204_vm5, %v4538_v20, 0.0 }
 0xae6   :  { %886 = vadd.xlane.f32.xlu0 %v885_v21 }
 0xaf3   :  { %904 = vrot.lane.b32.xlu1 %v4917_v46, %s4782_s10 }
 0xaf7   :  { %1029 = vrot.lane.b32.xlu1 %v4881_v28, %s4783_s2 }
 0xafb   :  { %4374 = vrot.lane.b32.xlu1 %v4373_v12, %s4769_s8 }
 0xafc   :  { %906 = vrot.lane.b32.xlu0 %v4915_v45, %s4782_s10 }
 0xaff   :  { %4384 = vrot.lane.b32.xlu1 %v4383_v40, %s4784_s11 }
 0xb00   :  { %4379 = vrot.lane.b32.xlu0 %v4378_v10, %s4769_s8 }
 0xb04   :  { %4389 = vrot.lane.b32.xlu0 %v4388_v38, %s4784_s11 }
 0xb08   :  { %1031 = vrot.lane.b32.xlu0 %v4888_v29, %s4783_s2 }
 0xb0c   :  { %1035 = vrot.lane.b32.xlu0 %v4909_v37, %s4783_s2 }
 0xb6b   :  { %v890_v28 = vpop.xlane.xlu1 %889 }
 0xb6f   :  { %v884_v46 = vpop.xlane.xlu1 %883  ;;  %v893_v8 = vpop.xlane.xlu0 %892 }
 0xb70   :  { %4539 = vrcp.f32 %v893_v8 }
 0xb71   :  { %4541 = vrcp.f32 %v884_v46 }
 0xb72   :  { %4543 = vrcp.f32 %v890_v28 }
 0xb73   :  { %v905_v45 = vpop.permute.xlu1 %904  ;;  %v887_v11 = vpop.xlane.xlu0 %886 }
 0xb74   :  { %4545 = vrcp.f32 %v887_v11  ;;  %4095 = vmatprep.subr.bf16.mxu1 %v905_v45 }
 0xb75   :  { %4096 = vmatpush3.bf16.msra.mxu1 %v905_v45 }
 0xb77   :  { %v907_v7 = vpop.permute.xlu0 %906  ;;  %v1030_v9 = vpop.permute.xlu1 %1029 }
 0xb78   :  { %4097 = vmatprep.subr.bf16.mxu1 %v907_v7 }
 0xb79   :  { %4098 = vmatpush3.bf16.msra.mxu1 %v907_v7 }
 0xb7a   :  { %4103 = vmatprep.subr.bf16.mxu1 %v1030_v9  ;;  %v4540_v29 = vpop.eup %4539 }
 0xb7b   :  { %v4542_v10 = vpop.eup %4541  ;;  %v901_v22 = vmul.f32 %v4540_v29, %v4536_v16  ;;  %v4380_v32 = vpop.permute.xlu0 %4379 }
 0xb7c   :  { %v4544_v12 = vpop.eup %4543  ;;  %v895_v23 = vmul.f32 %v4542_v10, %v4534_v15  ;;  %v4375_v44 = vpop.permute.xlu1 %4374  ;;  %v4382_v54 = vunpack.i.h.bf16 %v4380_v32  ;;  %v4381_v56 = vunpack.i.l.bf16 %v4380_v32 }
 0xb7d   :  { %v899_v25 = vmul.f32 %v4544_v12, %v4532_v13  ;;  %v4377_v48 = vunpack.i.h.bf16 %v4375_v44  ;;  %v4376_v49 = vunpack.i.l.bf16 %v4375_v44 }
 0xb7e   :  { %v4546_v37 = vpop.eup %4545 }
 0xb7f   :  { %v897_v24 = vmul.f32 %v4546_v37, %v4538_v20  ;;  %v903_v27 = vpack.c.bf16 %v901_v22, %v899_v25  ;;  %v4390_v35 = vpop.permute.xlu0 %4389  ;;  %v1014_v51 = vsel %vm268_vm6, %v4989_v61, %v4377_v48  ;;  %v1013_v63 = vsel %vm268_vm6, %v4985_v59, %v4376_v49 }
 0xb80   :  { %v4385_v47 = vpop.permute.xlu1 %4384  ;;  %v4392_v2 = vunpack.i.h.bf16 %v4390_v35  ;;  %v4391_v3 = vunpack.i.l.bf16 %v4390_v35  ;;  %v1016_v61 = vsel %vm268_vm6, %v4987_v60, %v4382_v54  ;;  %v1015_v59 = vsel %vm268_vm6, %v4983_v58, %v4381_v56 }
 0xb81   :  { %v902_v26 = vpack.c.bf16 %v897_v24, %v895_v23  ;;  %v4387_v50 = vunpack.i.h.bf16 %v4385_v47  ;;  %v4386_v52 = vunpack.i.l.bf16 %v4385_v47 }
 0xb82   :  { %v1020_v15 = vsel %vm1017_vm7, %v1015_v59, %v4391_v3  ;;  %v1021_v16 = vsel %vm1017_vm7, %v1016_v61, %v4392_v2 }
 0xb83   :  { %4099 = vmatprep.mubr.msk.bf16.mxu1 %vm204_vm5, %v902_v26  ;;  %v1032_v36 = vpop.permute.xlu0 %1031  ;;  %v1018_v1 = vsel %vm1017_vm7, %v1013_v63, %v4386_v52  ;;  %v1019_v55 = vsel %vm1017_vm7, %v1014_v51, %v4387_v50  ;;  %v4465_v50 = vld [vmem:[%s5730_s3 + $0x4] ss:$16 sps:$4 sm:$0xff]  }
 0xb84   :  { %4100 = vmatmul.mubr.msk.bf16.vlgmr.msra.gmra.mrb[16].mxu1 %vm204_vm5, %v903_v27  ;;  %4111 = vmatprep.subr.bf16.mxu0 %v4465_v50  ;;  %v4466_v52 = vld [vmem:[%s5730_s3 + $0x24] ss:$16 sps:$4 sm:$0xff]  }
 0xb85   :  { %4104 = vmatpush3.bf16.msra.mxu1 %v1030_v9  ;;  %4112 = vmatpush3.bf16.msra.mxu0 %v4465_v50 }
 0xb86   :  { %4105 = vmatprep.subr.bf16.mxu1 %v1032_v36  ;;  %4113 = vmatprep.subr.bf16.mxu0 %v4466_v52 }
 0xb87   :  { %v1036_v21 = vpop.permute.xlu0 %1035 }
 0xb89   :  { %4106 = vmatpush3.bf16.msra.mxu1 %v1032_v36  ;;  %4114 = vmatpush3.bf16.msra.mxu0 %v4466_v52 }
 0xc57   :  { %v4101_v38 = vpop.f32.mrb[16].mxu1 }
 0xc58   :  { %v950_v39 = vpop.f32.mrb[17].mxu1 }
 0xc59   :  { %v4102_v40 = vpop.f32.mrb[18].mxu1 }
 0xc5a   :  { %v4398_v41 = vpack.i.bf16 %v4102_v40, %v4101_v38  ;;  %v953_v42 = vpop.f32.mrb[19].mxu1 }
 0xc5b   :  { %v4393_v43 = vpack.i.bf16 %v953_v42, %v950_v39 }
 0xc5d   :  { %4394 = vrot.lane.b32.xlu1 %v4393_v43, %s4785_s12 }
 0xc61   :  { %4399 = vrot.lane.b32.xlu1 %v4398_v41, %s4785_s12 }
 0xccf   :  { %v4395_v57 = vpop.permute.xlu1 %4394 }
 0xcd0   :  { %v4397_v0 = vunpack.i.h.bf16 %v4395_v57  ;;  %v4396_v53 = vunpack.i.l.bf16 %v4395_v57 }
 0xcd2   :  { %v1024_v4 = vsel %vm1022_vm8, %v1019_v55, %v4397_v0  ;;  %v1023_v5 = vsel %vm1022_vm8, %v1018_v1, %v4396_v53 }
 0xcd3   :  { %v4400_v6 = vpop.permute.xlu1 %4399  ;;  %v1027_v62 = vpack.c.bf16 %v1024_v4, %v1023_v5 }
 0xcd4   :  { %v4402_v13 = vunpack.i.h.bf16 %v4400_v6  ;;  %v4401_v14 = vunpack.i.l.bf16 %v4400_v6  ;;  %v3780_v6 = vld [vmem:[#allocation2] ss:$0 sm:$0xff] }
 0xcd5   :  { %4107 = vmatprep.mubr.msk.bf16.mxu1 %vm204_vm5, %v1027_v62 }
 0xcd6   :  { %v1025_v18 = vsel %vm1022_vm8, %v1020_v15, %v4401_v14  ;;  %v1026_v19 = vsel %vm1022_vm8, %v1021_v16, %v4402_v13  ;;  %v3781_v14 = vld [vmem:[#allocation2 + $0x1] ss:$0 sm:$0xff] }
 0xcd7   :  { %v1028_v20 = vpack.c.bf16 %v1026_v19, %v1025_v18 }
 0xcd9   :  { %4108 = vmatmul.mubr.msk.bf16.vlgmr.msra.gmra.mrb[20].mxu1 %vm204_vm5, %v1028_v20 }
 0xdac   :  { %v4109_v60 = vpop.f32.mrb[20].mxu1 }
 0xdad   :  { %v1087_v28 = vadd.f32 %v4109_v60, %v1036_v21  ;;  %v1078_v46 = vpop.f32.mrb[21].mxu1 }
 0xdae   :  { %v1079_v58 = vadd.f32 %v1078_v46, %v1036_v21  ;;  %v4110_v8 = vpop.f32.mrb[22].mxu1 }
 0xdaf   :  { %v1090_v45 = vadd.f32 %v4110_v8, %v1036_v21  ;;  %v1081_v11 = vpop.f32.mrb[23].mxu1  ;;  %v1095_v7 = vadd.f32 %v1087_v28, %v4901_v34 }
 0xdb0   :  { %v1082_v9 = vadd.f32 %v1081_v11, %v1036_v21  ;;  %v1093_v29 = vadd.f32 %v1079_v58, %v4894_v31 }
 0xdb1   :  { %v1096_v10 = vadd.f32 %v4898_v33, %v1090_v45  ;;  %v1105_v24 = vsel %vm204_vm5, %v1095_v7, 0.0 }
 0xdb2   :  { %v1099_v12 = vsel %vm204_vm5, %v1093_v29, 0.0  ;;  %v1094_v37 = vadd.f32 %v4892_v30, %v1082_v9 }
 0xdb3   :  { %1100 = vadd.xlane.f32.xlu1 %v1099_v12  ;;  %v1108_v23 = vsel %vm204_vm5, %v1096_v10, 0.0 }
 0xdb4   :  { %v1102_v22 = vsel %vm204_vm5, %v1094_v37, 0.0 }
 0xdb5   :  { %1103 = vadd.xlane.f32.xlu0 %v1102_v22 }
 0xdb7   :  { %1109 = vadd.xlane.f32.xlu1 %v1108_v23 }
 0xdb9   :  { %1106 = vadd.xlane.f32.xlu0 %v1105_v24 }
 0xe40   :  { %v1101_v34 = vpop.xlane.xlu1 %1100 }
 0xe41   :  { %v1112_v25 = vmul.f32 0.03125, %v1101_v34 }
 0xe42   :  { %v1104_v26 = vpop.xlane.xlu0 %1103 }
 0xe43   :  { %v1116_v31 = vsub.f32 %v1093_v29, %v1112_v25  ;;  %v1113_v27 = vmul.f32 0.03125, %v1104_v26 }
 0xe44   :  { %v1110_v33 = vpop.xlane.xlu1 %1109 }
 0xe45   :  { %v1117_v32 = vsub.f32 %v1094_v37, %v1113_v27  ;;  %v1115_v35 = vmul.f32 0.03125, %v1110_v33  ;;  %v1120_v36 = vmul.f32 %v1116_v31, %v1116_v31 }
 0xe46   :  { %v1107_v30 = vpop.xlane.xlu0 %1106 }
 0xe47   :  { %v1119_v38 = vsub.f32 %v1096_v10, %v1115_v35  ;;  %v1114_v39 = vmul.f32 0.03125, %v1107_v30  ;;  %v1124_v40 = vsel %vm204_vm5, %v1120_v36, 0.0  ;;  %v1121_v41 = vmul.f32 %v1117_v32, %v1117_v32 }
 0xe48   :  { %1125 = vadd.xlane.f32.xlu0 %v1124_v40 }
 0xe49   :  { %v1118_v42 = vsub.f32 %v1095_v7, %v1114_v39  ;;  %v1127_v43 = vsel %vm204_vm5, %v1121_v41, 0.0  ;;  %v1123_v44 = vmul.f32 %v1119_v38, %v1119_v38  ;;  %v3782_v7 = vld [vmem:[%s5731_s4 + $0x1] ss:$0 sm:$0xff] }
 0xe4a   :  { %1128 = vadd.xlane.f32.xlu1 %v1127_v43 }
 0xe4b   :  { %v1122_v47 = vmul.f32 %v1118_v42, %v1118_v42  ;;  %v1133_v49 = vsel %vm204_vm5, %v1123_v44, 0.0 }
 0xe4d   :  { %v1130_v48 = vsel %vm204_vm5, %v1122_v47, 0.0 }
 0xe4e   :  { %1131 = vadd.xlane.f32.xlu0 %v1130_v48  ;;  %1134 = vadd.xlane.f32.xlu1 %v1133_v49 }
 0xe5f   :  { %1256 = vrot.lane.b32.xlu1 %v4466_v52, %s4772_s16 }
 0xe63   :  { %1260 = vrot.lane.b32.xlu1 %v3782_v7, %s4772_s16 }
 0xe64   :  { %1254 = vrot.lane.b32.xlu0 %v4465_v50, %s4772_s16 }
 0xed5   :  { %v1126_v54 = vpop.xlane.xlu0 %1125 }
 0xed6   :  { %v1136_v56 = vmul.f32 0.03125, %v1126_v54 }
 0xed7   :  { %v1129_v57 = vpop.xlane.xlu1 %1128 }
 0xed8   :  { %v1140_v51 = vadd.f32 1e-05, %v1136_v56  ;;  %v1137_v63 = vmul.f32 0.03125, %v1129_v57 }
 0xeda   :  { %4547 = vrsqrt.f32 %v1140_v51  ;;  %v1141_v0 = vadd.f32 1e-05, %v1137_v63  ;;  %v4467_v51 = vld [vmem:[%s5730_s3 + $0x4] ss:$16 sps:$4 sm:$0xff]  }
 0xedb   :  { %v1132_v53 = vpop.xlane.xlu0 %1131  ;;  %v1135_v1 = vpop.xlane.xlu1 %1134 }
 0xedc   :  { %4549 = vrsqrt.f32 %v1141_v0  ;;  %v1138_v55 = vmul.f32 0.03125, %v1132_v53  ;;  %v1139_v2 = vmul.f32 0.03125, %v1135_v1 }
 0xede   :  { %v1142_v3 = vadd.f32 1e-05, %v1138_v55  ;;  %v1143_v4 = vadd.f32 1e-05, %v1139_v2 }
 0xedf   :  { %v1255_v9 = vpop.permute.xlu0 %1254  ;;  %v1257_v29 = vpop.permute.xlu1 %1256 }
 0xee0   :  { %4551 = vrsqrt.f32 %v1142_v3  ;;  %4119 = vmatprep.subr.bf16.mxu1 %v1255_v9 }
 0xee1   :  { %4553 = vrsqrt.f32 %v1143_v4  ;;  %4120 = vmatpush3.bf16.msra.mxu1 %v1255_v9 }
 0xee2   :  { %4121 = vmatprep.subr.bf16.mxu1 %v1257_v29 }
 0xee3   :  { %v1261_v36 = vpop.permute.xlu1 %1260 }
 0xee4   :  { %v4548_v5 = vpop.eup %4547 }
 0xee5   :  { %v1148_v62 = vmul.f32 %v4548_v5, %v1116_v31  ;;  %4122 = vmatpush3.bf16.msra.mxu1 %v1257_v29 }
 0xee6   :  { %v4550_v61 = vpop.eup %4549 }
 0xee7   :  { %v1149_v59 = vmul.f32 %v4550_v61, %v1117_v32  ;;  %v1156_v13 = vmul.f32 %v3780_v6, %v1148_v62 }
 0xee9   :  { %v1157_v15 = vmul.f32 %v3780_v6, %v1149_v59  ;;  %v1164_v20 = vadd.f32 %v3781_v14, %v1156_v13 }
 0xeea   :  { %v4552_v16 = vpop.eup %4551 }
 0xeeb   :  { %v4554_v18 = vpop.eup %4553  ;;  %v1150_v19 = vmul.f32 %v4552_v16, %v1118_v42  ;;  %v1165_v21 = vadd.f32 %v3781_v14, %v1157_v15 }
 0xeec   :  { %v1151_v60 = vmul.f32 %v4554_v18, %v1119_v38 }
 0xeed   :  { %v1173_v28 = vpack.c.bf16 %v1165_v21, %v1164_v20  ;;  %v1158_v46 = vmul.f32 %v3780_v6, %v1150_v19 }
 0xeee   :  { %v1159_v58 = vmul.f32 %v3780_v6, %v1151_v60  ;;  %v4472_v60 = vld [vmem:[%s5730_s3 + $0x28] ss:$16 sps:$4 sm:$0xff]  }
 0xeef   :  { %4115 = vmatprep.mubr.msk.bf16.mxu0 %vm204_vm5, %v1173_v28  ;;  %v1166_v8 = vadd.f32 %v3781_v14, %v1158_v46  ;;  %v4469_v28 = vld [vmem:[%s5730_s3 + $0x8] ss:$16 sps:$4 sm:$0xff]   ;;  %v5174_v46 = vshrl.u32 %v43_v17, 7 }
 0xef0   :  { %v1167_v45 = vadd.f32 %v3781_v14, %v1159_v58  ;;  %v1396_v58 = vld [vmem:[%s5731_s4 + $0x1] sm:$0x3] }
 0xef2   :  { %v1174_v11 = vpack.c.bf16 %v1167_v45, %v1166_v8 }
 0xef4   :  { %4116 = vmatmul.mubr.msk.bf16.vlgmr.msra.gmra.mrb[20].mxu0 %vm204_vm5, %v1174_v11 }
 0xfc7   :  { %v4117_v10 = vpop.f32.mrb[20].mxu0 }
 0xfc8   :  { %v1242_v12 = vadd.f32 %v4117_v10, %v3782_v7  ;;  %v1233_v37 = vpop.f32.mrb[21].mxu0 }
 0xfc9   :  { %v1234_v22 = vadd.f32 %v3782_v7, %v1233_v37  ;;  %v4118_v23 = vpop.f32.mrb[22].mxu0 }
 0xfca   :  { %v1245_v24 = vadd.f32 %v4118_v23, %v3782_v7  ;;  %v1236_v34 = vpop.f32.mrb[23].mxu0  ;;  %v1250_v26 = vmax.f32 %v1242_v12, 0.0 }
 0xfcb   :  { %v1237_v25 = vadd.f32 %v3782_v7, %v1236_v34  ;;  %v1248_v27 = vmax.f32 %v1234_v22, 0.0 }
 0xfcc   :  { %v1251_v31 = vmax.f32 %v1245_v24, 0.0 }
 0xfcd   :  { %v1249_v33 = vmax.f32 %v1237_v25, 0.0 }
 0xfce   :  { %v1253_v32 = vpack.c.bf16 %v1251_v31, %v1250_v26 }
 0xfcf   :  { %v1252_v35 = vpack.c.bf16 %v1249_v33, %v1248_v27 }
 0xfd1   :  { %4123 = vmatprep.mubr.msk.bf16.mxu1 %vm204_vm5, %v1252_v35 }
 0xfd2   :  { %4124 = vmatmul.mubr.msk.bf16.vlgmr.msra.gmra.mrb[24].mxu1 %vm204_vm5, %v1253_v32 }
0x10a5   :  { %v4125_v30 = vpop.f32.mrb[24].mxu1 }
0x10a6   :  { %v1303_v38 = vpop.f32.mrb[25].mxu1  ;;  %v1312_v41 = vadd.f32 %v4125_v30, %v1261_v36 }
0x10a7   :  { %v1304_v39 = vadd.f32 %v1303_v38, %v1261_v36  ;;  %v4126_v40 = vpop.f32.mrb[26].mxu1 }
0x10a8   :  { %v1306_v42 = vpop.f32.mrb[27].mxu1  ;;  %v1315_v47 = vadd.f32 %v4126_v40, %v1261_v36  ;;  %v1320_v50 = vadd.f32 %v1312_v41, %v1166_v8  ;;  %v1406_v8 = vsub.s32 1, %v5174_v46 }
0x10a9   :  { %v1307_v43 = vadd.f32 %v1306_v42, %v1261_v36  ;;  %v1318_v44 = vadd.f32 %v1304_v39, %v1164_v20 }
0x10aa   :  { %v1330_v54 = vsel %vm204_vm5, %v1320_v50, 0.0  ;;  %v1321_v56 = vadd.f32 %v1315_v47, %v1167_v45  ;;  %v1402_v45 = vsub.s32 0, %v5174_v46  ;;  %v1407_v11 = vrot.slane %v1396_v58, %v1406_v8 }
0x10ab   :  { %v1324_v48 = vsel %vm204_vm5, %v1318_v44, 0.0  ;;  %v1319_v49 = vadd.f32 %v1307_v43, %v1165_v21  ;;  %v4470_v21 = vld [vmem:[%s5730_s3 + $0x24] ss:$16 sps:$4 sm:$0xff]   ;;  %v3789_v43 = vld [vmem:[#allocation2 + $0x2] ss:$0 sm:$0xff] }
0x10ac   :  { %1325 = vadd.xlane.f32.xlu0 %v1324_v48  ;;  %v1333_v57 = vsel %vm204_vm5, %v1321_v56, 0.0  ;;  %v1403_v7 = vrot.slane %v1396_v58, %v1402_v45 }
0x10ad   :  { %v1327_v52 = vsel %vm204_vm5, %v1319_v49, 0.0 }
0x10ae   :  { %1328 = vadd.xlane.f32.xlu1 %v1327_v52  ;;  %v3790_v52 = vld [vmem:[#allocation2 + $0x3] ss:$0 sm:$0xff] }
0x10b0   :  { %1331 = vadd.xlane.f32.xlu0 %v1330_v54 }
0x10b4   :  { %1334 = vadd.xlane.f32.xlu0 %v1333_v57 }
0x10bf   :  { %1424 = vrot.lane.b32.xlu1 %v4467_v51, %s4773_s24 }
0x1139   :  { %v1326_v63 = vpop.xlane.xlu0 %1325 }
0x113a   :  { %v1336_v0 = vmul.f32 0.03125, %v1326_v63 }
0x113b   :  { %v1329_v53 = vpop.xlane.xlu1 %1328 }
0x113c   :  { %v1340_v2 = vsub.f32 %v1318_v44, %v1336_v0  ;;  %v1337_v3 = vmul.f32 0.03125, %v1329_v53 }
0x113d   :  { %v1332_v1 = vpop.xlane.xlu0 %1331 }
0x113e   :  { %v1338_v55 = vmul.f32 0.03125, %v1332_v1  ;;  %v1341_v61 = vsub.f32 %v1319_v49, %v1337_v3  ;;  %v1344_v14 = vmul.f32 %v1340_v2, %v1340_v2 }
0x113f   :  { %v1425_v17 = vpop.permute.xlu1 %1424 }
0x1140   :  { %v1342_v4 = vsub.f32 %v1320_v50, %v1338_v55  ;;  %v1348_v16 = vsel %vm204_vm5, %v1344_v14, 0.0  ;;  %v1345_v19 = vmul.f32 %v1341_v61, %v1341_v61 }
0x1141   :  { %v1335_v5 = vpop.xlane.xlu0 %1334 }
0x1142   :  { %v1339_v6 = vmul.f32 0.03125, %v1335_v5  ;;  %v1346_v62 = vmul.f32 %v1342_v4, %v1342_v4  ;;  %v1351_v20 = vsel %vm204_vm5, %v1345_v19, 0.0 }
0x1144   :  { %v1343_v59 = vsub.f32 %v1321_v56, %v1339_v6  ;;  %v1354_v13 = vsel %vm204_vm5, %v1346_v62, 0.0 }
0x1145   :  { %1355 = vadd.xlane.f32.xlu1 %v1354_v13 }
0x1146   :  { %v1347_v15 = vmul.f32 %v1343_v59, %v1343_v59 }
0x1148   :  { %v1357_v18 = vsel %vm204_vm5, %v1347_v15, 0.0 }
0x1149   :  { %1349 = vadd.xlane.f32.xlu1 %v1348_v16  ;;  %1358 = vadd.xlane.f32.xlu0 %v1357_v18 }
0x114d   :  { %1352 = vadd.xlane.f32.xlu0 %v1351_v20 }
0x115a   :  { %1428 = vrot.lane.b32.xlu1 %v4470_v21, %s4773_s24 }
0x115e   :  { %1430 = vrot.lane.b32.xlu1 %v4472_v60, %s4773_s24 }
0x1162   :  { %1439 = vrot.lane.b32.xlu1 %v1407_v11, %s4773_s24 }
0x1163   :  { %1426 = vrot.lane.b32.xlu0 %v4469_v28, %s4773_s24 }
0x1167   :  { %1437 = vrot.lane.b32.xlu0 %v1403_v7, %s4773_s24 }
0x11d2   :  { %v1356_v9 = vpop.xlane.xlu1 %1355 }
0x11d3   :  { %v1362_v29 = vmul.f32 0.03125, %v1356_v9 }
0x11d5   :  { %v1366_v10 = vadd.f32 1e-05, %v1362_v29 }
0x11d6   :  { %v1350_v12 = vpop.xlane.xlu1 %1349  ;;  %v1359_v37 = vpop.xlane.xlu0 %1358 }
0x11d7   :  { %v1360_v22 = vmul.f32 0.03125, %v1350_v12  ;;  %v1363_v23 = vmul.f32 0.03125, %v1359_v37  ;;  %4555 = vrsqrt.f32 %v1366_v10 }
0x11d9   :  { %v1364_v24 = vadd.f32 1e-05, %v1360_v22  ;;  %v1367_v34 = vadd.f32 1e-05, %v1363_v23 }
0x11da   :  { %v1353_v25 = vpop.xlane.xlu0 %1352  ;;  %v1429_v26 = vpop.permute.xlu1 %1428 }
0x11db   :  { %4557 = vrsqrt.f32 %v1364_v24  ;;  %v1361_v31 = vmul.f32 0.03125, %v1353_v25 }
0x11dc   :  { %4559 = vrsqrt.f32 %v1367_v34 }
0x11dd   :  { %v1365_v27 = vadd.f32 1e-05, %v1361_v31 }
0x11de   :  { %v1427_v33 = vpop.permute.xlu0 %1426  ;;  %v1431_v32 = vpop.permute.xlu1 %1430 }
0x11df   :  { %4561 = vrsqrt.f32 %v1365_v27  ;;  %v1433_v35 = vsel %vm77_vm0, %v1425_v17, %v1427_v33  ;;  %v1434_v36 = vsel %vm77_vm0, %v1429_v26, %v1431_v32 }
0x11e0   :  { %4127 = vmatprep.subr.bf16.mxu0 %v1433_v35 }
0x11e1   :  { %4128 = vmatpush3.bf16.msra.mxu0 %v1433_v35  ;;  %v4556_v30 = vpop.eup %4555 }
0x11e2   :  { %4129 = vmatprep.subr.bf16.mxu0 %v1434_v36  ;;  %v1374_v41 = vmul.f32 %v4556_v30, %v1342_v4  ;;  %v1440_v1 = vpop.permute.xlu1 %1439  ;;  %v1438_v55 = vpop.permute.xlu0 %1437 }
0x11e4   :  { %v1382_v50 = vmul.f32 %v3789_v43, %v1374_v41 }
0x11e5   :  { %v4558_v38 = vpop.eup %4557  ;;  %4130 = vmatpush3.bf16.msra.mxu0 %v1434_v36 }
0x11e6   :  { %v4560_v39 = vpop.eup %4559  ;;  %v1372_v40 = vmul.f32 %v4558_v38, %v1340_v2  ;;  %v5195_v63 = vadd.f32 %v3790_v52, %v1382_v50  ;;  %v1441_v2 = vsel %vm77_vm0, %v1438_v55, %v1440_v1 }
0x11e7   :  { %v1375_v42 = vmul.f32 %v4560_v39, %v1343_v59 }
0x11e8   :  { %v1380_v49 = vmul.f32 %v3789_v43, %v1372_v40 }
0x11e9   :  { %v4562_v44 = vpop.eup %4561  ;;  %v1383_v47 = vmul.f32 %v3789_v43, %v1375_v42 }
0x11ea   :  { %v1373_v48 = vmul.f32 %v4562_v44, %v1341_v61  ;;  %v5191_v57 = vadd.f32 %v3790_v52, %v1380_v49 }
0x11eb   :  { %v5189_v56 = vadd.f32 %v3790_v52, %v1383_v47 }
0x11ec   :  { %v1381_v54 = vmul.f32 %v3789_v43, %v1373_v48 }
0x11ed   :  { %v1398_v53 = vpack.c.bf16 %v5189_v56, %v5195_v63 }
0x11ee   :  { %v5193_v51 = vadd.f32 %v3790_v52, %v1381_v54 }
0x11f0   :  { %v1397_v0 = vpack.c.bf16 %v5193_v51, %v5191_v57 }
0x11f2   :  { %4131 = vmatprep.mubr.msk.bf16.mxu0 %vm204_vm5, %v1397_v0 }
0x11f3   :  { %4132 = vmatmul.mubr.msk.bf16.vlgmr.msra.gmra.mrb[24].mxu0 %vm204_vm5, %v1398_v53 }
0x12c6   :  { %v4133_v3 = vpop.f32.mrb[24].mxu0 }
0x12c7   :  { %v1483_v4 = vpop.f32.mrb[25].mxu0  ;;  %v1492_v6 = vadd.f32 %v4133_v3, %v1441_v2 }
0x12c8   :  { %v4134_v5 = vpop.f32.mrb[26].mxu0  ;;  %v1484_v59 = vadd.f32 %v1483_v4, %v1441_v2 }
0x12c9   :  { %v1495_v62 = vadd.f32 %v4134_v5, %v1441_v2  ;;  %v1486_v61 = vpop.f32.mrb[27].mxu0 }
0x12ca   :  { %v1487_v13 = vadd.f32 %v1486_v61, %v1441_v2 }
0x12cb   :  { %v5204_v14 = vpack.c.bf16 %v1495_v62, %v1492_v6 }
0x12cc   :  { %v5206_v15 = vpack.c.bf16 %v1487_v13, %v1484_v59 }
0x12cd   :  { %1504 = vrot.lane.b32.xlu1 %v5204_v14, %s4772_s16 }
0x12ce   :  { %1502 = vrot.lane.b32.xlu0 %v5206_v15, %s4772_s16  ;;  %4139 = vmatprep.mubr.msk.bf16.mxu1 %vm268_vm6, %v5206_v15 }
0x133f   :  { %v1505_v19 = vpop.permute.xlu1 %1504 }
0x1340   :  { %v1503_v16 = vpop.permute.xlu0 %1502  ;;  %v1516_v20 = vsel %vm268_vm6, %v1505_v19, 0 }
0x1341   :  { %4335 = vmatprep.subr.msk.bf16.mxu1 %vm268_vm6, %v1503_v16  ;;  %v1513_v18 = vsel %vm268_vm6, %v1503_v16, 0 }
0x1342   :  { %4136 = vmatpush3.bf16.xpose.msra.mxu1 %v1513_v18 }
0x1343   :  { %4336 = vmatprep.subr.msk.bf16.mxu1 %vm268_vm6, %v1505_v19 }
0x134a   :  { %4138 = vmatpush3.bf16.xpose.msra.mxu1 %v1516_v20 }
0x1351   :  { %4140 = vmatmul.mubr.msk.bf16.vlgmr.msra.gmra.mrb[28].mxu1 %vm268_vm6, %v5204_v14 }
0x1424   :  { %v4141_v21 = vpop.f32.mrb[28].mxu1 }
0x1425   :  { %v1552_v60 = vpop.f32.mrb[29].mxu1  ;;  %v1573_v17 = vsel %vm204_vm5, %v4141_v21, -inf }
0x1426   :  { %v4142_v28 = vpop.f32.mrb[30].mxu1  ;;  %v1567_v58 = vsel %vm204_vm5, %v1552_v60, -inf }
0x1427   :  { %1568 = vmax.xlane.f32.xlu0 %v1567_v58  ;;  %v1555_v11 = vpop.f32.mrb[31].mxu1  ;;  %v1576_v9 = vsel %vm204_vm5, %v4142_v28, -inf }
0x1428   :  { %v1570_v7 = vsel %vm204_vm5, %v1555_v11, -inf }
0x1429   :  { %1571 = vmax.xlane.f32.xlu1 %v1570_v7 }
0x142b   :  { %1574 = vmax.xlane.f32.xlu0 %v1573_v17 }
0x142f   :  { %1577 = vmax.xlane.f32.xlu0 %v1576_v9 }
0x143a   :  { %1613 = vrot.lane.b32.xlu1 %v5206_v15, %s4773_s24 }
0x14b4   :  { %v1569_v29 = vpop.xlane.xlu0 %1568 }
0x14b5   :  { %v1579_v12 = vsub.f32 %v1552_v60, %v1569_v29 }
0x14b6   :  { %v1572_v10 = vpop.xlane.xlu1 %1571 }
0x14b7   :  { %v1583_v24 = vmul.f32 1.442695, %v1579_v12  ;;  %v1580_v34 = vsub.f32 %v1555_v11, %v1572_v10 }
0x14b8   :  { %v1575_v37 = vpop.xlane.xlu0 %1574 }
0x14b9   :  { %v1581_v22 = vsub.f32 %v4141_v21, %v1575_v37  ;;  %v1585_v27 = vmul.f32 1.442695, %v1580_v34 }
0x14ba   :  { %v1614_v23 = vpop.permute.xlu1 %1613 }
0x14bb   :  { %v1587_v25 = vmul.f32 1.442695, %v1581_v22  ;;  %4143 = vmatprep.subr.bf16.mxu0 %v1614_v23 }
0x14bc   :  { %v1578_v26 = vpop.xlane.xlu0 %1577  ;;  %4144 = vmatpush3.bf16.msra.mxu0 %v1614_v23 }
0x14bd   :  { %4563 = vpow2.f32 %v1587_v25  ;;  %v1582_v31 = vsub.f32 %v4142_v28, %v1578_v26 }
0x14be   :  { %4565 = vpow2.f32 %v1583_v24 }
0x14bf   :  { %v1589_v33 = vmul.f32 1.442695, %v1582_v31 }
0x14c1   :  { %4567 = vpow2.f32 %v1589_v33 }
0x14c2   :  { %4569 = vpow2.f32 %v1585_v27 }
0x14c7   :  { %v4564_v32 = vpop.eup %4563 }
0x14c8   :  { %v1597_v35 = vsel %vm204_vm5, %v4564_v32, 0.0  ;;  %v4566_v36 = vpop.eup %4565 }
0x14c9   :  { %1598 = vadd.xlane.f32.xlu1 %v1597_v35  ;;  %v1591_v39 = vsel %vm204_vm5, %v4566_v36, 0.0 }
0x14cb   :  { %v4568_v30 = vpop.eup %4567 }
0x14cc   :  { %v1600_v38 = vsel %vm204_vm5, %v4568_v30, 0.0  ;;  %v4570_v40 = vpop.eup %4569 }
0x14cd   :  { %1601 = vadd.xlane.f32.xlu0 %v1600_v38  ;;  %1592 = vadd.xlane.f32.xlu1 %v1591_v39  ;;  %v1594_v41 = vsel %vm204_vm5, %v4570_v40, 0.0 }
0x14d1   :  { %1595 = vadd.xlane.f32.xlu0 %v1594_v41 }
0x14de   :  { %1678 = vrot.lane.b32.xlu1 %v5206_v15, %s4774_s25 }
0x14e2   :  { %1680 = vrot.lane.b32.xlu1 %v5204_v14, %s4774_s25 }
0x14e6   :  { %1676 = vrot.lane.b32.xlu1 %v5204_v14, %s4775_s26 }
0x14e7   :  { %1615 = vrot.lane.b32.xlu0 %v5204_v14, %s4773_s24 }
0x14eb   :  { %1674 = vrot.lane.b32.xlu0 %v5206_v15, %s4775_s26 }
0x1556   :  { %v1599_v42 = vpop.xlane.xlu1 %1598 }
0x155a   :  { %v1602_v43 = vpop.xlane.xlu0 %1601  ;;  %v1593_v44 = vpop.xlane.xlu1 %1592 }
0x155b   :  { %4571 = vrcp.f32 %v1602_v43 }
0x155c   :  { %4573 = vrcp.f32 %v1593_v44 }
0x155d   :  { %4575 = vrcp.f32 %v1599_v42 }
0x155e   :  { %v1596_v47 = vpop.xlane.xlu0 %1595  ;;  %v1679_v49 = vpop.permute.xlu1 %1678 }
0x155f   :  { %4577 = vrcp.f32 %v1596_v47  ;;  %v1689_v6 = vsel %vm268_vm6, %v1679_v49, 0 }
0x1562   :  { %v1616_v48 = vpop.permute.xlu0 %1615  ;;  %v1681_v62 = vpop.permute.xlu1 %1680 }
0x1563   :  { %4145 = vmatprep.subr.bf16.mxu0 %v1616_v48  ;;  %v1692_v61 = vsel %vm268_vm6, %v1681_v62, 0 }
0x1564   :  { %4146 = vmatpush3.bf16.msra.mxu0 %v1616_v48 }
0x1565   :  { %4337 = vmatprep.subr.msk.bf16.mxu0 %vm268_vm6, %v1679_v49  ;;  %v4572_v50 = vpop.eup %4571 }
0x1566   :  { %v4574_v52 = vpop.eup %4573  ;;  %v1610_v53 = vmul.f32 %v4572_v50, %v4568_v30  ;;  %v1675_v5 = vpop.permute.xlu0 %1674 }
0x1567   :  { %v4576_v54 = vpop.eup %4575  ;;  %v1604_v1 = vmul.f32 %v4574_v52, %v4566_v36  ;;  %v1677_v59 = vpop.permute.xlu1 %1676 }
0x1568   :  { %v1608_v2 = vmul.f32 %v4576_v54, %v4564_v32 }
0x1569   :  { %v4578_v0 = vpop.eup %4577 }
0x156a   :  { %v1606_v55 = vmul.f32 %v4578_v0, %v4570_v40  ;;  %v1612_v4 = vpack.c.bf16 %v1610_v53, %v1608_v2 }
0x156c   :  { %v1611_v3 = vpack.c.bf16 %v1606_v55, %v1604_v1 }
0x156e   :  { %4147 = vmatprep.mubr.msk.bf16.mxu0 %vm204_vm5, %v1611_v3 }
0x156f   :  { %4148 = vmatmul.mubr.msk.bf16.vlgmr.msra.gmra.mrb[28].mxu0 %vm204_vm5, %v1612_v4 }
0x1570   :  { %4152 = vmatpush3.bf16.xpose.msra.mxu0 %v1689_v6  ;;  %4155 = vmatprep.mubr.msk.bf16.mxu0 %vm268_vm6, %v1675_v5 }
0x1571   :  { %4338 = vmatprep.subr.msk.bf16.mxu0 %vm268_vm6, %v1681_v62 }
0x1578   :  { %4154 = vmatpush3.bf16.xpose.msra.mxu0 %v1692_v61 }
0x157f   :  { %4156 = vmatmul.mubr.msk.bf16.vlgmr.msra.gmra.mrb[32].mxu0 %vm268_vm6, %v1677_v59 }
0x1642   :  { %v5248_v13 = vpop.f32.mrb[28].mxu0 }
0x1643   :  { %v5250_v16 = vpop.f32.mrb[29].mxu0 }
0x1644   :  { %v5252_v18 = vpop.f32.mrb[30].mxu0 }
0x1645   :  { %v5254_v19 = vpop.f32.mrb[31].mxu0 }
0x1652   :  { %v4157_v20 = vpop.f32.mrb[32].mxu0 }
0x1653   :  { %v1728_v21 = vpop.f32.mrb[33].mxu0  ;;  %v1749_v7 = vsel %vm204_vm5, %v4157_v20, -inf }
0x1654   :  { %v4158_v60 = vpop.f32.mrb[34].mxu0  ;;  %v1743_v28 = vsel %vm204_vm5, %v1728_v21, -inf }
0x1655   :  { %1744 = vmax.xlane.f32.xlu0 %v1743_v28  ;;  %v1731_v58 = vpop.f32.mrb[35].mxu0  ;;  %v1752_v17 = vsel %vm204_vm5, %v4158_v60, -inf }
0x1656   :  { %v1746_v11 = vsel %vm204_vm5, %v1731_v58, -inf }
0x1657   :  { %1747 = vmax.xlane.f32.xlu1 %v1746_v11 }
0x1659   :  { %1750 = vmax.xlane.f32.xlu0 %v1749_v7 }
0x165d   :  { %1753 = vmax.xlane.f32.xlu0 %v1752_v17 }
0x1668   :  { %1789 = vrot.lane.b32.xlu1 %v5206_v15, %s4776_s27 }
0x16e2   :  { %v1745_v9 = vpop.xlane.xlu0 %1744 }
0x16e3   :  { %v1755_v10 = vsub.f32 %v1728_v21, %v1745_v9 }
0x16e4   :  { %v1748_v29 = vpop.xlane.xlu1 %1747 }
0x16e5   :  { %v1759_v23 = vmul.f32 1.442695, %v1755_v10  ;;  %v1756_v24 = vsub.f32 %v1731_v58, %v1748_v29 }
0x16e6   :  { %v1751_v12 = vpop.xlane.xlu0 %1750 }
0x16e7   :  { %v1757_v37 = vsub.f32 %v4157_v20, %v1751_v12  ;;  %v1761_v31 = vmul.f32 1.442695, %v1756_v24 }
0x16e8   :  { %v1790_v22 = vpop.permute.xlu1 %1789 }
0x16e9   :  { %v1763_v34 = vmul.f32 1.442695, %v1757_v37  ;;  %4159 = vmatprep.subr.bf16.mxu1 %v1790_v22 }
0x16ea   :  { %v1754_v25 = vpop.xlane.xlu0 %1753  ;;  %4160 = vmatpush3.bf16.msra.mxu1 %v1790_v22 }
0x16eb   :  { %4579 = vpow2.f32 %v1763_v34  ;;  %v1758_v26 = vsub.f32 %v4158_v60, %v1754_v25 }
0x16ec   :  { %4581 = vpow2.f32 %v1759_v23 }
0x16ed   :  { %v1765_v27 = vmul.f32 1.442695, %v1758_v26 }
0x16ef   :  { %4583 = vpow2.f32 %v1765_v27 }
0x16f0   :  { %4585 = vpow2.f32 %v1761_v31 }
0x16f5   :  { %v4580_v33 = vpop.eup %4579 }
0x16f6   :  { %v1773_v32 = vsel %vm204_vm5, %v4580_v33, 0.0  ;;  %v4582_v35 = vpop.eup %4581 }
0x16f7   :  { %1774 = vadd.xlane.f32.xlu1 %v1773_v32  ;;  %v1767_v38 = vsel %vm204_vm5, %v4582_v35, 0.0 }
0x16f9   :  { %v4584_v36 = vpop.eup %4583 }
0x16fa   :  { %v1776_v30 = vsel %vm204_vm5, %v4584_v36, 0.0  ;;  %v4586_v39 = vpop.eup %4585 }
0x16fb   :  { %1777 = vadd.xlane.f32.xlu0 %v1776_v30  ;;  %1768 = vadd.xlane.f32.xlu1 %v1767_v38  ;;  %v1770_v40 = vsel %vm204_vm5, %v4586_v39, 0.0 }
0x16ff   :  { %1771 = vadd.xlane.f32.xlu0 %v1770_v40 }
0x170c   :  { %1854 = vrot.lane.b32.xlu1 %v5206_v15, %s4777_s28 }
0x1710   :  { %1856 = vrot.lane.b32.xlu1 %v5204_v14, %s4777_s28 }
0x1714   :  { %1852 = vrot.lane.b32.xlu1 %v5204_v14, %s4778_s29 }
0x1715   :  { %1791 = vrot.lane.b32.xlu0 %v5204_v14, %s4776_s27 }
0x1719   :  { %1850 = vrot.lane.b32.xlu0 %v5206_v15, %s4778_s29 }
0x1784   :  { %v1775_v41 = vpop.xlane.xlu1 %1774 }
0x1788   :  { %v1778_v42 = vpop.xlane.xlu0 %1777  ;;  %v1769_v43 = vpop.xlane.xlu1 %1768 }
0x1789   :  { %4587 = vrcp.f32 %v1778_v42 }
0x178a   :  { %4589 = vrcp.f32 %v1769_v43 }
0x178b   :  { %4591 = vrcp.f32 %v1775_v41 }
0x178c   :  { %v1772_v44 = vpop.xlane.xlu0 %1771  ;;  %v1855_v48 = vpop.permute.xlu1 %1854 }
0x178d   :  { %4593 = vrcp.f32 %v1772_v44  ;;  %v1865_v5 = vsel %vm268_vm6, %v1855_v48, 0 }
0x1790   :  { %v1792_v47 = vpop.permute.xlu0 %1791  ;;  %v1857_v6 = vpop.permute.xlu1 %1856 }
0x1791   :  { %4161 = vmatprep.subr.bf16.mxu1 %v1792_v47  ;;  %v1868_v62 = vsel %vm268_vm6, %v1857_v6, 0 }
0x1792   :  { %4162 = vmatpush3.bf16.msra.mxu1 %v1792_v47 }
0x1793   :  { %4339 = vmatprep.subr.msk.bf16.mxu1 %vm268_vm6, %v1855_v48  ;;  %v4588_v49 = vpop.eup %4587 }
0x1794   :  { %v4590_v50 = vpop.eup %4589  ;;  %v1786_v0 = vmul.f32 %v4588_v49, %v4584_v36  ;;  %v1851_v4 = vpop.permute.xlu0 %1850 }
0x1795   :  { %v4592_v52 = vpop.eup %4591  ;;  %v1780_v53 = vmul.f32 %v4590_v50, %v4582_v35  ;;  %v1853_v61 = vpop.permute.xlu1 %1852 }
0x1796   :  { %v1784_v55 = vmul.f32 %v4592_v52, %v4580_v33 }
0x1797   :  { %v4594_v54 = vpop.eup %4593 }
0x1798   :  { %v1782_v1 = vmul.f32 %v4594_v54, %v4586_v39  ;;  %v1788_v3 = vpack.c.bf16 %v1786_v0, %v1784_v55 }
0x179a   :  { %v1787_v2 = vpack.c.bf16 %v1782_v1, %v1780_v53 }
0x179c   :  { %4163 = vmatprep.mubr.msk.bf16.mxu1 %vm204_vm5, %v1787_v2 }
0x179d   :  { %4164 = vmatmul.mubr.msk.bf16.vlgmr.msra.gmra.mrb[32].mxu1 %vm204_vm5, %v1788_v3 }
0x179e   :  { %4168 = vmatpush3.bf16.xpose.msra.mxu1 %v1865_v5  ;;  %4171 = vmatprep.mubr.msk.bf16.mxu1 %vm268_vm6, %v1851_v4 }
0x179f   :  { %4340 = vmatprep.subr.msk.bf16.mxu1 %vm268_vm6, %v1857_v6 }
0x17a6   :  { %4170 = vmatpush3.bf16.xpose.msra.mxu1 %v1868_v62 }
0x17ad   :  { %4172 = vmatmul.mubr.msk.bf16.vlgmr.msra.gmra.mrb[36].mxu1 %vm268_vm6, %v1853_v61 }
0x1870   :  { %v5284_v59 = vpop.f32.mrb[32].mxu1 }
0x1871   :  { %v5286_v20 = vpop.f32.mrb[33].mxu1 }
0x1872   :  { %v5288_v21 = vpop.f32.mrb[34].mxu1 }
0x1873   :  { %v4408_v60 = vpack.i.bf16 %v5288_v21, %v5284_v59  ;;  %v5292_v28 = vpop.f32.mrb[35].mxu1 }
0x1874   :  { %v4403_v58 = vpack.i.bf16 %v5292_v28, %v5286_v20 }
0x1880   :  { %v4173_v11 = vpop.f32.mrb[36].mxu1 }
0x1881   :  { %v1904_v7 = vpop.f32.mrb[37].mxu1  ;;  %v1925_v12 = vsel %vm204_vm5, %v4173_v11, -inf }
0x1882   :  { %v4174_v17 = vpop.f32.mrb[38].mxu1  ;;  %v1919_v9 = vsel %vm204_vm5, %v1904_v7, -inf }
0x1883   :  { %1920 = vmax.xlane.f32.xlu0 %v1919_v9  ;;  %v1907_v29 = vpop.f32.mrb[39].mxu1  ;;  %v1928_v37 = vsel %vm204_vm5, %v4174_v17, -inf }
0x1884   :  { %v1922_v10 = vsel %vm204_vm5, %v1907_v29, -inf }
0x1885   :  { %1923 = vmax.xlane.f32.xlu1 %v1922_v10 }
0x1887   :  { %1926 = vmax.xlane.f32.xlu0 %v1925_v12 }
0x188b   :  { %1929 = vmax.xlane.f32.xlu0 %v1928_v37 }
0x1896   :  { %1965 = vrot.lane.b32.xlu1 %v5206_v15, %s4779_s0 }
0x1910   :  { %v1921_v22 = vpop.xlane.xlu0 %1920 }
0x1911   :  { %v1931_v24 = vsub.f32 %v1904_v7, %v1921_v22 }
0x1912   :  { %v1924_v23 = vpop.xlane.xlu1 %1923 }
0x1913   :  { %v1935_v31 = vmul.f32 1.442695, %v1931_v24  ;;  %v1932_v27 = vsub.f32 %v1907_v29, %v1924_v23 }
0x1914   :  { %v1927_v34 = vpop.xlane.xlu0 %1926 }
0x1915   :  { %v1933_v25 = vsub.f32 %v4173_v11, %v1927_v34  ;;  %v1937_v36 = vmul.f32 1.442695, %v1932_v27 }
0x1916   :  { %v1966_v26 = vpop.permute.xlu1 %1965 }
0x1917   :  { %v1939_v33 = vmul.f32 1.442695, %v1933_v25  ;;  %4175 = vmatprep.subr.bf16.mxu0 %v1966_v26 }
0x1918   :  { %v1930_v32 = vpop.xlane.xlu0 %1929  ;;  %4176 = vmatpush3.bf16.msra.mxu0 %v1966_v26 }
0x1919   :  { %4595 = vpow2.f32 %v1939_v33  ;;  %v1934_v35 = vsub.f32 %v4174_v17, %v1930_v32 }
0x191a   :  { %4597 = vpow2.f32 %v1935_v31 }
0x191b   :  { %v1941_v30 = vmul.f32 1.442695, %v1934_v35 }
0x191d   :  { %4599 = vpow2.f32 %v1941_v30 }
0x191e   :  { %4601 = vpow2.f32 %v1937_v36 }
0x1923   :  { %v4596_v38 = vpop.eup %4595 }
0x1924   :  { %v1949_v39 = vsel %vm204_vm5, %v4596_v38, 0.0  ;;  %v4598_v40 = vpop.eup %4597 }
0x1925   :  { %1950 = vadd.xlane.f32.xlu1 %v1949_v39  ;;  %v1943_v43 = vsel %vm204_vm5, %v4598_v40, 0.0 }
0x1927   :  { %v4600_v41 = vpop.eup %4599 }
0x1928   :  { %v1952_v42 = vsel %vm204_vm5, %v4600_v41, 0.0  ;;  %v4602_v44 = vpop.eup %4601 }
0x1929   :  { %1953 = vadd.xlane.f32.xlu0 %v1952_v42  ;;  %1944 = vadd.xlane.f32.xlu1 %v1943_v43  ;;  %v1946_v47 = vsel %vm204_vm5, %v4602_v44, 0.0 }
0x192d   :  { %1947 = vadd.xlane.f32.xlu0 %v1946_v47 }
0x193a   :  { %2030 = vrot.lane.b32.xlu1 %v5206_v15, %s4780_s30 }
0x193e   :  { %2032 = vrot.lane.b32.xlu1 %v5204_v14, %s4780_s30 }
0x1942   :  { %2028 = vrot.lane.b32.xlu1 %v5204_v14, %s4781_s9 }
0x1943   :  { %1967 = vrot.lane.b32.xlu0 %v5204_v14, %s4779_s0 }
0x1947   :  { %2026 = vrot.lane.b32.xlu0 %v5206_v15, %s4781_s9 }
0x19b2   :  { %v1951_v48 = vpop.xlane.xlu1 %1950 }
0x19b6   :  { %v1954_v49 = vpop.xlane.xlu0 %1953  ;;  %v1945_v50 = vpop.xlane.xlu1 %1944 }
0x19b7   :  { %4603 = vrcp.f32 %v1954_v49 }
0x19b8   :  { %4605 = vrcp.f32 %v1945_v50 }
0x19b9   :  { %4607 = vrcp.f32 %v1951_v48 }
0x19ba   :  { %v1948_v52 = vpop.xlane.xlu0 %1947  ;;  %v2031_v0 = vpop.permute.xlu1 %2030 }
0x19bb   :  { %4609 = vrcp.f32 %v1948_v52  ;;  %v2041_v7 = vsel %vm268_vm6, %v2031_v0, 0 }
0x19be   :  { %v1968_v54 = vpop.permute.xlu0 %1967  ;;  %v2033_v17 = vpop.permute.xlu1 %2032 }
0x19bf   :  { %4177 = vmatprep.subr.bf16.mxu0 %v1968_v54  ;;  %v2044_v9 = vsel %vm268_vm6, %v2033_v17, 0 }
0x19c0   :  { %4178 = vmatpush3.bf16.msra.mxu0 %v1968_v54 }
0x19c1   :  { %4341 = vmatprep.subr.msk.bf16.mxu0 %vm268_vm6, %v2031_v0  ;;  %v4604_v53 = vpop.eup %4603 }
0x19c2   :  { %v4606_v1 = vpop.eup %4605  ;;  %v1962_v3 = vmul.f32 %v4604_v53, %v4600_v41  ;;  %v2027_v11 = vpop.permute.xlu0 %2026 }
0x19c3   :  { %v4608_v55 = vpop.eup %4607  ;;  %v1956_v4 = vmul.f32 %v4606_v1, %v4598_v40  ;;  %v2029_v29 = vpop.permute.xlu1 %2028 }
0x19c4   :  { %v1960_v6 = vmul.f32 %v4608_v55, %v4596_v38 }
0x19c5   :  { %v4610_v2 = vpop.eup %4609 }
0x19c6   :  { %v1958_v5 = vmul.f32 %v4610_v2, %v4602_v44  ;;  %v1964_v61 = vpack.c.bf16 %v1962_v3, %v1960_v6  ;;  %v5337_v3 = vld [vmem:[%s5730_s3 + $0x8] ss:$16 sps:$4 sm:$0xff]  }
0x19c8   :  { %v1963_v62 = vpack.c.bf16 %v1958_v5, %v1956_v4 }
0x19ca   :  { %4179 = vmatprep.mubr.msk.bf16.mxu0 %vm204_vm5, %v1963_v62 }
0x19cb   :  { %4180 = vmatmul.mubr.msk.bf16.vlgmr.msra.gmra.mrb[36].mxu0 %vm204_vm5, %v1964_v61 }
0x19cc   :  { %4184 = vmatpush3.bf16.xpose.msra.mxu0 %v2041_v7  ;;  %4187 = vmatprep.mubr.msk.bf16.mxu0 %vm268_vm6, %v2027_v11 }
0x19cd   :  { %4342 = vmatprep.subr.msk.bf16.mxu0 %vm268_vm6, %v2033_v17 }
0x19d4   :  { %4186 = vmatpush3.bf16.xpose.msra.mxu0 %v2044_v9 }
0x19db   :  { %4188 = vmatmul.mubr.msk.bf16.vlgmr.msra.gmra.mrb[40].mxu0 %vm268_vm6, %v2029_v29  ;;  %v5358_v29 = vld [vmem:[%s5730_s3 + $0x28] ss:$16 sps:$4 sm:$0xff]  }
0x1a9e   :  { %v4181_v10 = vpop.f32.mrb[36].mxu0 }
0x1a9f   :  { %v2011_v12 = vpop.f32.mrb[37].mxu0 }
0x1aa0   :  { %v4182_v37 = vpop.f32.mrb[38].mxu0 }
0x1aa1   :  { %v4418_v22 = vpack.i.bf16 %v4182_v37, %v4181_v10  ;;  %v2014_v23 = vpop.f32.mrb[39].mxu0 }
0x1aa2   :  { %v4413_v24 = vpack.i.bf16 %v2014_v23, %v2011_v12 }
0x1aae   :  { %v4189_v34 = vpop.f32.mrb[40].mxu0 }
0x1aaf   :  { %v2080_v25 = vpop.f32.mrb[41].mxu0  ;;  %v2101_v32 = vsel %vm204_vm5, %v4189_v34, -inf }
0x1ab0   :  { %v4190_v26 = vpop.f32.mrb[42].mxu0  ;;  %v2095_v31 = vsel %vm204_vm5, %v2080_v25, -inf }
0x1ab1   :  { %2096 = vmax.xlane.f32.xlu0 %v2095_v31  ;;  %v2083_v27 = vpop.f32.mrb[43].mxu0  ;;  %v2104_v35 = vsel %vm204_vm5, %v4190_v26, -inf }
0x1ab2   :  { %v2098_v33 = vsel %vm204_vm5, %v2083_v27, -inf }
0x1ab3   :  { %2099 = vmax.xlane.f32.xlu1 %v2098_v33 }
0x1ab5   :  { %2102 = vmax.xlane.f32.xlu0 %v2101_v32 }
0x1ab9   :  { %2105 = vmax.xlane.f32.xlu0 %v2104_v35 }
0x1b3e   :  { %v2097_v36 = vpop.xlane.xlu0 %2096 }
0x1b3f   :  { %v2107_v30 = vsub.f32 %v2080_v25, %v2097_v36 }
0x1b40   :  { %v2100_v38 = vpop.xlane.xlu1 %2099 }
0x1b41   :  { %v2111_v41 = vmul.f32 1.442695, %v2107_v30  ;;  %v2108_v42 = vsub.f32 %v2083_v27, %v2100_v38 }
0x1b42   :  { %v2103_v39 = vpop.xlane.xlu0 %2102 }
0x1b43   :  { %v2109_v40 = vsub.f32 %v4189_v34, %v2103_v39  ;;  %v2113_v48 = vmul.f32 1.442695, %v2108_v42  ;;  %v5365_v34 = vld [vmem:[%s5731_s4 + $0x2] ss:$0 sm:$0xff] }
0x1b45   :  { %v2115_v43 = vmul.f32 1.442695, %v2109_v40 }
0x1b46   :  { %v2106_v44 = vpop.xlane.xlu0 %2105 }
0x1b47   :  { %4611 = vpow2.f32 %v2115_v43  ;;  %v2110_v47 = vsub.f32 %v4190_v26, %v2106_v44 }
0x1b48   :  { %4613 = vpow2.f32 %v2111_v41 }
0x1b49   :  { %v2117_v49 = vmul.f32 1.442695, %v2110_v47 }
0x1b4b   :  { %4615 = vpow2.f32 %v2117_v49 }
0x1b4c   :  { %4617 = vpow2.f32 %v2113_v48 }
0x1b51   :  { %v4612_v50 = vpop.eup %4611 }
0x1b52   :  { %v2125_v52 = vsel %vm204_vm5, %v4612_v50, 0.0  ;;  %v4614_v54 = vpop.eup %4613 }
0x1b53   :  { %2126 = vadd.xlane.f32.xlu1 %v2125_v52  ;;  %v2119_v1 = vsel %vm204_vm5, %v4614_v54, 0.0 }
0x1b55   :  { %v4616_v0 = vpop.eup %4615 }
0x1b56   :  { %v2128_v53 = vsel %vm204_vm5, %v4616_v0, 0.0  ;;  %v4618_v55 = vpop.eup %4617 }
0x1b57   :  { %2129 = vadd.xlane.f32.xlu0 %v2128_v53  ;;  %2120 = vadd.xlane.f32.xlu1 %v2119_v1  ;;  %v2122_v2 = vsel %vm204_vm5, %v4618_v55, 0.0 }
0x1b5b   :  { %2123 = vadd.xlane.f32.xlu0 %v2122_v2 }
0x1b68   :  { %2141 = vrot.lane.b32.xlu1 %v5206_v15, %s4782_s10 }
0x1b6c   :  { %2284 = vrot.lane.b32.xlu1 %v5337_v3, %s4772_s16 }
0x1b70   :  { %4404 = vrot.lane.b32.xlu1 %v4403_v58, %s4769_s8 }
0x1b71   :  { %2143 = vrot.lane.b32.xlu0 %v5204_v14, %s4782_s10 }
0x1b74   :  { %4414 = vrot.lane.b32.xlu1 %v4413_v24, %s4784_s11 }
0x1b75   :  { %4409 = vrot.lane.b32.xlu0 %v4408_v60, %s4769_s8 }
0x1b79   :  { %4419 = vrot.lane.b32.xlu0 %v4418_v22, %s4784_s11 }
0x1b7d   :  { %2286 = vrot.lane.b32.xlu0 %v5358_v29, %s4772_s16 }
0x1b81   :  { %2290 = vrot.lane.b32.xlu0 %v5365_v34, %s4772_s16 }
0x1be0   :  { %v2127_v15 = vpop.xlane.xlu1 %2126 }
0x1be4   :  { %v2130_v4 = vpop.xlane.xlu0 %2129  ;;  %v2121_v5 = vpop.xlane.xlu1 %2120 }
0x1be5   :  { %4619 = vrcp.f32 %v2130_v4 }
0x1be6   :  { %4621 = vrcp.f32 %v2121_v5 }
0x1be7   :  { %4623 = vrcp.f32 %v2127_v15 }
0x1be8   :  { %v2124_v20 = vpop.xlane.xlu0 %2123  ;;  %v2142_v28 = vpop.permute.xlu1 %2141 }
0x1be9   :  { %4625 = vrcp.f32 %v2124_v20  ;;  %4191 = vmatprep.subr.bf16.mxu1 %v2142_v28 }
0x1bea   :  { %4192 = vmatpush3.bf16.msra.mxu1 %v2142_v28 }
0x1bec   :  { %v2144_v14 = vpop.permute.xlu0 %2143  ;;  %v2285_v58 = vpop.permute.xlu1 %2284 }
0x1bed   :  { %4193 = vmatprep.subr.bf16.mxu1 %v2144_v14 }
0x1bee   :  { %4194 = vmatpush3.bf16.msra.mxu1 %v2144_v14 }
0x1bef   :  { %4199 = vmatprep.subr.bf16.mxu1 %v2285_v58  ;;  %v4620_v59 = vpop.eup %4619 }
0x1bf0   :  { %v4622_v21 = vpop.eup %4621  ;;  %v2138_v62 = vmul.f32 %v4620_v59, %v4616_v0  ;;  %v4410_v10 = vpop.permute.xlu0 %4409 }
0x1bf1   :  { %v4624_v60 = vpop.eup %4623  ;;  %v2132_v61 = vmul.f32 %v4622_v21, %v4614_v54  ;;  %v4405_v27 = vpop.permute.xlu1 %4404  ;;  %v4412_v38 = vunpack.i.h.bf16 %v4410_v10  ;;  %v4411_v39 = vunpack.i.l.bf16 %v4410_v10 }
0x1bf2   :  { %v2136_v7 = vmul.f32 %v4624_v60, %v4612_v50  ;;  %v4407_v32 = vunpack.i.h.bf16 %v4405_v27  ;;  %v4406_v35 = vunpack.i.l.bf16 %v4405_v27 }
0x1bf3   :  { %v4626_v6 = vpop.eup %4625 }
0x1bf4   :  { %v2134_v11 = vmul.f32 %v4626_v6, %v4618_v55  ;;  %v2140_v9 = vpack.c.bf16 %v2138_v62, %v2136_v7  ;;  %v4420_v12 = vpop.permute.xlu0 %4419  ;;  %v2251_v41 = vsel %vm268_vm6, %v5254_v19, %v4407_v32  ;;  %v2250_v42 = vsel %vm268_vm6, %v5250_v16, %v4406_v35 }
0x1bf5   :  { %v4415_v33 = vpop.permute.xlu1 %4414  ;;  %v4422_v47 = vunpack.i.h.bf16 %v4420_v12  ;;  %v4421_v48 = vunpack.i.l.bf16 %v4420_v12  ;;  %v2253_v19 = vsel %vm268_vm6, %v5252_v18, %v4412_v38  ;;  %v2252_v16 = vsel %vm268_vm6, %v5248_v13, %v4411_v39 }
0x1bf6   :  { %v2139_v17 = vpack.c.bf16 %v2134_v11, %v2132_v61  ;;  %v4417_v36 = vunpack.i.h.bf16 %v4415_v33  ;;  %v4416_v30 = vunpack.i.l.bf16 %v4415_v33 }
0x1bf7   :  { %v2256_v2 = vsel %vm1017_vm7, %v2252_v16, %v4421_v48  ;;  %v2257_v15 = vsel %vm1017_vm7, %v2253_v19, %v4422_v47 }
0x1bf8   :  { %4195 = vmatprep.mubr.msk.bf16.mxu1 %vm204_vm5, %v2139_v17  ;;  %v2287_v37 = vpop.permute.xlu0 %2286  ;;  %v2254_v49 = vsel %vm1017_vm7, %v2250_v42, %v4416_v30  ;;  %v2255_v50 = vsel %vm1017_vm7, %v2251_v41, %v4417_v36 }
0x1bf9   :  { %4196 = vmatmul.mubr.msk.bf16.vlgmr.msra.gmra.mrb[40].mxu1 %vm204_vm5, %v2140_v9 }
0x1bfa   :  { %4200 = vmatpush3.bf16.msra.mxu1 %v2285_v58 }
0x1bfb   :  { %4201 = vmatprep.subr.bf16.mxu1 %v2287_v37 }
0x1bfc   :  { %v2291_v28 = vpop.permute.xlu0 %2290 }
0x1bfe   :  { %4202 = vmatpush3.bf16.msra.mxu1 %v2287_v37 }
0x1ccc   :  { %v4197_v22 = vpop.f32.mrb[40].mxu1 }
0x1ccd   :  { %v2187_v23 = vpop.f32.mrb[41].mxu1 }
0x1cce   :  { %v4198_v24 = vpop.f32.mrb[42].mxu1 }
0x1ccf   :  { %v4428_v25 = vpack.i.bf16 %v4198_v24, %v4197_v22  ;;  %v2190_v26 = vpop.f32.mrb[43].mxu1 }
0x1cd0   :  { %v4423_v31 = vpack.i.bf16 %v2190_v26, %v2187_v23 }
0x1cd2   :  { %4424 = vrot.lane.b32.xlu1 %v4423_v31, %s4785_s12 }
0x1cd6   :  { %4429 = vrot.lane.b32.xlu1 %v4428_v25, %s4785_s12 }
0x1d44   :  { %v4425_v40 = vpop.permute.xlu1 %4424 }
0x1d45   :  { %v4427_v43 = vunpack.i.h.bf16 %v4425_v40  ;;  %v4426_v44 = vunpack.i.l.bf16 %v4425_v40 }
0x1d47   :  { %v2258_v52 = vsel %vm1022_vm8, %v2254_v49, %v4426_v44  ;;  %v2259_v54 = vsel %vm1022_vm8, %v2255_v50, %v4427_v43  ;;  %v4480_v49 = vld [vmem:[%s5730_s3 + $0x2c] ss:$16 sps:$4 sm:$0xff]   ;;  %v4715_v50 = vld [vmem:[%s5728_s1] sm:$0xff] }
0x1d48   :  { %v4430_v0 = vpop.permute.xlu1 %4429  ;;  %v2267_v53 = vpack.c.bf16 %v2259_v54, %v2258_v52  ;;  %v4716_v52 = vld [vmem:[%s5728_s1 + $0x8] sm:$0xff] }
0x1d49   :  { %v4432_v1 = vunpack.i.h.bf16 %v4430_v0  ;;  %v4431_v55 = vunpack.i.l.bf16 %v4430_v0  ;;  %v2493_v54 = vpack.c.bf16 %v4716_v52, %v4715_v50 }
0x1d4a   :  { %4203 = vmatprep.mubr.msk.bf16.mxu1 %vm204_vm5, %v2267_v53 }
0x1d4b   :  { %v2261_v4 = vsel %vm1022_vm8, %v2257_v15, %v4432_v1  ;;  %v2260_v5 = vsel %vm1022_vm8, %v2256_v2, %v4431_v55 }
0x1d4c   :  { %v2268_v20 = vpack.c.bf16 %v2261_v4, %v2260_v5 }
0x1d4e   :  { %4204 = vmatmul.mubr.msk.bf16.vlgmr.msra.gmra.mrb[44].mxu1 %vm204_vm5, %v2268_v20 }
0x1d4f   :  { %4219 = vmatprep.mubr.msk.bf16.mxu1 %vm204_vm5, %v2493_v54 }
0x1e21   :  { %v4205_v18 = vpop.f32.mrb[44].mxu1 }
0x1e22   :  { %v2333_v14 = vpop.f32.mrb[45].mxu1  ;;  %v2342_v60 = vadd.f32 %v4205_v18, %v2291_v28 }
0x1e23   :  { %v2334_v58 = vadd.f32 %v2333_v14, %v2291_v28  ;;  %v4206_v13 = vpop.f32.mrb[46].mxu1  ;;  %v4717_v14 = vld [vmem:[%s5728_s1 + $0x10] sm:$0xff] }
0x1e24   :  { %v2345_v59 = vadd.f32 %v4206_v13, %v2291_v28  ;;  %v2336_v21 = vpop.f32.mrb[47].mxu1  ;;  %v2350_v17 = vadd.f32 %v2342_v60, %v5195_v63 }
0x1e25   :  { %v2348_v6 = vadd.f32 %v2334_v58, %v5191_v57  ;;  %v2337_v62 = vadd.f32 %v2336_v21, %v2291_v28  ;;  %v4478_v57 = vld [vmem:[%s5730_s3 + $0x28] ss:$16 sps:$4 sm:$0xff]  }
0x1e26   :  { %v2351_v61 = vadd.f32 %v2345_v59, %v5189_v56  ;;  %v2360_v12 = vsel %vm204_vm5, %v2350_v17, 0.0  ;;  %v4475_v56 = vld [vmem:[%s5730_s3 + $0xc] ss:$16 sps:$4 sm:$0xff]  }
0x1e27   :  { %v2349_v11 = vadd.f32 %v2337_v62, %v5193_v51  ;;  %v2354_v7 = vsel %vm204_vm5, %v2348_v6, 0.0  ;;  %v4477_v51 = vld [vmem:[%s5730_s3 + $0x8] ss:$16 sps:$4 sm:$0xff]  }
0x1e28   :  { %2355 = vadd.xlane.f32.xlu1 %v2354_v7  ;;  %v2363_v10 = vsel %vm204_vm5, %v2351_v61, 0.0  ;;  %v4718_v58 = vld [vmem:[%s5728_s1 + $0x18] sm:$0xff] }
0x1e29   :  { %v2357_v9 = vsel %vm204_vm5, %v2349_v11, 0.0  ;;  %v2494_v13 = vpack.c.bf16 %v4718_v58, %v4717_v14 }
0x1e2a   :  { %2358 = vadd.xlane.f32.xlu0 %v2357_v9 }
0x1e2c   :  { %2364 = vadd.xlane.f32.xlu1 %v2363_v10 }
0x1e2e   :  { %2361 = vadd.xlane.f32.xlu0 %v2360_v12 }
0x1e3d   :  { %2522 = vrot.lane.b32.xlu1 %v4475_v56, %s4783_s2 }
0x1e41   :  { %2524 = vrot.lane.b32.xlu1 %v4478_v57, %s4783_s2  ;;  %v3819_v57 = vld [vmem:[#allocation2 + $0x5] ss:$0 sm:$0xff] }
0x1e44   :  { %2520 = vrot.lane.b32.xlu0 %v4477_v51, %s4783_s2 }
0x1eb5   :  { %v2356_v63 = vpop.xlane.xlu1 %2355 }
0x1eb6   :  { %v2366_v24 = vmul.f32 0.03125, %v2356_v63 }
0x1eb7   :  { %v2359_v37 = vpop.xlane.xlu0 %2358 }
0x1eb8   :  { %v2367_v22 = vmul.f32 0.03125, %v2359_v37  ;;  %v5413_v35 = vsub.f32 %v2348_v6, %v2366_v24 }
0x1eb9   :  { %v2365_v23 = vpop.xlane.xlu1 %2364 }
0x1eba   :  { %v2369_v25 = vmul.f32 0.03125, %v2365_v23  ;;  %v5409_v31 = vsub.f32 %v2349_v11, %v2367_v22  ;;  %v2374_v44 = vmul.f32 %v5413_v35, %v5413_v35  ;;  %v3818_v11 = vld [vmem:[#allocation2 + $0x4] ss:$0 sm:$0xff] }
0x1ebb   :  { %v2362_v26 = vpop.xlane.xlu0 %2361 }
0x1ebc   :  { %v5411_v27 = vsub.f32 %v2351_v61, %v2369_v25  ;;  %v2368_v33 = vmul.f32 0.03125, %v2362_v26  ;;  %v2375_v41 = vmul.f32 %v5409_v31, %v5409_v31  ;;  %v2378_v48 = vsel %vm204_vm5, %v2374_v44, 0.0 }
0x1ebd   :  { %v2523_v32 = vpop.permute.xlu1 %2522 }
0x1ebe   :  { %v5415_v36 = vsub.f32 %v2350_v17, %v2368_v33  ;;  %v2377_v30 = vmul.f32 %v5411_v27, %v5411_v27  ;;  %v2381_v47 = vsel %vm204_vm5, %v2375_v41, 0.0 }
0x1ebf   :  { %v2521_v38 = vpop.permute.xlu0 %2520 }
0x1ec0   :  { %v2387_v39 = vsel %vm204_vm5, %v2377_v30, 0.0  ;;  %v2376_v40 = vmul.f32 %v5415_v36, %v5415_v36  ;;  %v2529_v42 = vsel %vm204_vm5, %v2521_v38, %v2523_v32 }
0x1ec1   :  { %2388 = vadd.xlane.f32.xlu1 %v2387_v39  ;;  %4215 = vmatprep.subr.bf16.mxu1 %v2529_v42  ;;  %v2525_v19 = vpop.permute.xlu1 %2524 }
0x1ec2   :  { %v2384_v43 = vsel %vm204_vm5, %v2376_v40, 0.0  ;;  %4216 = vmatpush3.bf16.msra.mxu1 %v2529_v42 }
0x1ec3   :  { %2385 = vadd.xlane.f32.xlu0 %v2384_v43 }
0x1ec5   :  { %2382 = vadd.xlane.f32.xlu1 %v2381_v47 }
0x1ec7   :  { %2379 = vadd.xlane.f32.xlu0 %v2378_v48 }
0x1ed6   :  { %2424 = vrot.lane.b32.xlu1 %v5337_v3, %s4773_s24  ;;  %v2492_v3 = vld [vmem:[%s5731_s4 + $0x2] sm:$0x3] }
0x1ed7   :  { %v2503_v0 = vrot.slane %v2492_v3, %v1406_v8  ;;  %v2499_v53 = vrot.slane %v2492_v3, %v1402_v45 }
0x1eda   :  { %2533 = vrot.lane.b32.xlu1 %v2499_v53, %s4783_s2 }
0x1edd   :  { %2526 = vrot.lane.b32.xlu0 %v4480_v49, %s4783_s2 }
0x1ede   :  { %2430 = vrot.lane.b32.xlu1 %v5365_v34, %s4773_s24 }
0x1ee1   :  { %2426 = vrot.lane.b32.xlu0 %v5358_v29, %s4773_s24 }
0x1ee5   :  { %2535 = vrot.lane.b32.xlu0 %v2503_v0, %s4783_s2 }
0x1f4e   :  { %v2389_v16 = vpop.xlane.xlu1 %2388 }
0x1f4f   :  { %v2393_v29 = vmul.f32 0.03125, %v2389_v16 }
0x1f50   :  { %v2386_v1 = vpop.xlane.xlu0 %2385 }
0x1f51   :  { %v2397_v55 = vadd.f32 1e-05, %v2393_v29  ;;  %v2392_v2 = vmul.f32 0.03125, %v2386_v1 }
0x1f52   :  { %v2383_v15 = vpop.xlane.xlu1 %2382 }
0x1f53   :  { %v2396_v4 = vadd.f32 1e-05, %v2392_v2  ;;  %v2391_v5 = vmul.f32 0.03125, %v2383_v15  ;;  %4627 = vrsqrt.f32 %v2397_v55 }
0x1f54   :  { %v2380_v8 = vpop.xlane.xlu0 %2379 }
0x1f55   :  { %4629 = vrsqrt.f32 %v2396_v4  ;;  %v2395_v46 = vadd.f32 1e-05, %v2391_v5  ;;  %v2390_v45 = vmul.f32 0.03125, %v2380_v8 }
0x1f56   :  { %v2425_v20 = vpop.permute.xlu1 %2424 }
0x1f57   :  { %4631 = vrsqrt.f32 %v2395_v46  ;;  %v2394_v28 = vadd.f32 1e-05, %v2390_v45  ;;  %4207 = vmatprep.subr.bf16.mxu0 %v2425_v20 }
0x1f58   :  { %v2527_v18 = vpop.permute.xlu0 %2526  ;;  %4208 = vmatpush3.bf16.msra.mxu0 %v2425_v20 }
0x1f59   :  { %4633 = vrsqrt.f32 %v2394_v28  ;;  %v2530_v34 = vsel %vm204_vm5, %v2525_v19, %v2527_v18 }
0x1f5a   :  { %4217 = vmatprep.subr.bf16.mxu1 %v2530_v34 }
0x1f5b   :  { %4218 = vmatpush3.bf16.msra.mxu1 %v2530_v34 }
0x1f5c   :  { %v2427_v59 = vpop.permute.xlu0 %2426 }
0x1f5d   :  { %4209 = vmatprep.subr.bf16.mxu0 %v2427_v59  ;;  %v4628_v21 = vpop.eup %4627 }
0x1f5e   :  { %4220 = vmatmul.mubr.msk.bf16.vlgmr.msra.gmra.mrb[48].mxu1 %vm204_vm5, %v2494_v13  ;;  %4210 = vmatpush3.bf16.msra.mxu0 %v2427_v59  ;;  %v2405_v61 = vmul.f32 %v4628_v21, %v5411_v27 }
0x1f5f   :  { %v4630_v60 = vpop.eup %4629 }
0x1f60   :  { %v2404_v6 = vmul.f32 %v4630_v60, %v5415_v36  ;;  %v2413_v56 = vmul.f32 %v3818_v11, %v2405_v61  ;;  %v2536_v26 = vpop.permute.xlu0 %2535 }
0x1f61   :  { %v4632_v62 = vpop.eup %4631 }
0x1f62   :  { %v2403_v7 = vmul.f32 %v4632_v62, %v5409_v31  ;;  %v2412_v9 = vmul.f32 %v3818_v11, %v2404_v6  ;;  %v5474_v23 = vadd.f32 %v3819_v57, %v2413_v56  ;;  %v2534_v31 = vpop.permute.xlu1 %2533 }
0x1f63   :  { %v4634_v17 = vpop.eup %4633  ;;  %v2537_v33 = vsel %vm204_vm5, %v2534_v31, %v2536_v26 }
0x1f64   :  { %v2402_v10 = vmul.f32 %v4634_v17, %v5413_v35  ;;  %v2411_v12 = vmul.f32 %v3818_v11, %v2403_v7  ;;  %v5468_v63 = vadd.f32 %v3819_v57, %v2412_v9 }
0x1f66   :  { %v2410_v51 = vmul.f32 %v3818_v11, %v2402_v10  ;;  %v5472_v22 = vadd.f32 %v3819_v57, %v2411_v12  ;;  %v2423_v25 = vpack.c.bf16 %v5474_v23, %v5468_v63  ;;  %v2431_v47 = vpop.permute.xlu1 %2430 }
0x1f68   :  { %v5470_v37 = vadd.f32 %v3819_v57, %v2410_v51 }
0x1f6a   :  { %v2422_v24 = vpack.c.bf16 %v5472_v22, %v5470_v37 }
0x1f6c   :  { %4211 = vmatprep.mubr.msk.bf16.mxu0 %vm204_vm5, %v2422_v24 }
0x1f6d   :  { %4212 = vmatmul.mubr.msk.bf16.vlgmr.msra.gmra.mrb[44].mxu0 %vm204_vm5, %v2423_v25 }
0x2031   :  { %v4221_v27 = vpop.f32.mrb[48].mxu1 }
0x2032   :  { %v2579_v32 = vpop.f32.mrb[49].mxu1  ;;  %v2588_v36 = vadd.f32 %v4221_v27, %v2537_v33 }
0x2033   :  { %v4222_v35 = vpop.f32.mrb[50].mxu1  ;;  %v2580_v39 = vadd.f32 %v2579_v32, %v2537_v33 }
0x2034   :  { %v2591_v30 = vadd.f32 %v4222_v35, %v2537_v33  ;;  %v2582_v38 = vpop.f32.mrb[51].mxu1 }
0x2035   :  { %v2583_v40 = vadd.f32 %v2582_v38, %v2537_v33 }
0x2036   :  { %v5483_v41 = vpack.c.bf16 %v2591_v30, %v2588_v36 }
0x2037   :  { %v5485_v42 = vpack.c.bf16 %v2583_v40, %v2580_v39 }
0x2038   :  { %v2608_v49 = vsel %vm268_vm6, %v5483_v41, 0 }
0x2039   :  { %4343 = vmatprep.subr.msk.bf16.mxu0 %vm268_vm6, %v5485_v42  ;;  %v2605_v43 = vsel %vm268_vm6, %v5485_v42, 0 }
0x203a   :  { %4224 = vmatpush3.bf16.xpose.msra.mxu0 %v2605_v43 }
0x203b   :  { %4344 = vmatprep.subr.msk.bf16.mxu0 %vm268_vm6, %v5483_v41 }
0x2040   :  { %v4213_v44 = vpop.f32.mrb[44].mxu0 }
0x2041   :  { %v2473_v48 = vpop.f32.mrb[45].mxu0  ;;  %v2482_v52 = vadd.f32 %v4213_v44, %v2431_v47 }
0x2042   :  { %v4214_v50 = vpop.f32.mrb[46].mxu0  ;;  %4226 = vmatpush3.bf16.xpose.msra.mxu0 %v2608_v49  ;;  %v2474_v0 = vadd.f32 %v2473_v48, %v2431_v47 }
0x2043   :  { %v2485_v54 = vadd.f32 %v4214_v50, %v2431_v47  ;;  %v2476_v3 = vpop.f32.mrb[47].mxu0 }
0x2044   :  { %v2477_v53 = vadd.f32 %v2476_v3, %v2431_v47 }
0x2045   :  { %v5495_v19 = vpack.c.bf16 %v2485_v54, %v2482_v52 }
0x2046   :  { %v5497_v16 = vpack.c.bf16 %v2477_v53, %v2474_v0 }
0x2048   :  { %4227 = vmatprep.mubr.msk.bf16.mxu0 %vm268_vm6, %v5497_v16 }
0x2049   :  { %4228 = vmatmul.mubr.msk.bf16.vlgmr.msra.gmra.mrb[48].mxu0 %vm268_vm6, %v5495_v19 }
0x211c   :  { %v4229_v29 = vpop.f32.mrb[48].mxu0 }
0x211d   :  { %v2644_v1 = vpop.f32.mrb[49].mxu0  ;;  %v2665_v5 = vsel %vm204_vm5, %v4229_v29, -inf }
0x211e   :  { %v4230_v55 = vpop.f32.mrb[50].mxu0  ;;  %v2659_v2 = vsel %vm204_vm5, %v2644_v1, -inf }
0x211f   :  { %2660 = vmax.xlane.f32.xlu0 %v2659_v2  ;;  %v2647_v15 = vpop.f32.mrb[51].mxu0  ;;  %v2668_v8 = vsel %vm204_vm5, %v4230_v55, -inf }
0x2120   :  { %v2662_v4 = vsel %vm204_vm5, %v2647_v15, -inf }
0x2121   :  { %2663 = vmax.xlane.f32.xlu1 %v2662_v4 }
0x2123   :  { %2666 = vmax.xlane.f32.xlu0 %v2665_v5 }
0x2127   :  { %2669 = vmax.xlane.f32.xlu0 %v2668_v8 }
0x2132   :  { %2707 = vrot.lane.b32.xlu1 %v5485_v42, %s4772_s16 }
0x21ac   :  { %v2661_v46 = vpop.xlane.xlu0 %2660 }
0x21ad   :  { %v2671_v20 = vsub.f32 %v2644_v1, %v2661_v46 }
0x21ae   :  { %v2664_v45 = vpop.xlane.xlu1 %2663 }
0x21af   :  { %v2675_v14 = vmul.f32 1.442695, %v2671_v20  ;;  %v2672_v58 = vsub.f32 %v2647_v15, %v2664_v45 }
0x21b0   :  { %v2667_v28 = vpop.xlane.xlu0 %2666 }
0x21b1   :  { %v2673_v18 = vsub.f32 %v4229_v29, %v2667_v28  ;;  %v2677_v60 = vmul.f32 1.442695, %v2672_v58 }
0x21b2   :  { %v2708_v34 = vpop.permute.xlu1 %2707 }
0x21b3   :  { %v2679_v13 = vmul.f32 1.442695, %v2673_v18  ;;  %4231 = vmatprep.subr.bf16.mxu1 %v2708_v34 }
0x21b4   :  { %v2670_v59 = vpop.xlane.xlu0 %2669  ;;  %4232 = vmatpush3.bf16.msra.mxu1 %v2708_v34 }
0x21b5   :  { %4635 = vpow2.f32 %v2679_v13  ;;  %v2674_v21 = vsub.f32 %v4230_v55, %v2670_v59 }
0x21b6   :  { %4637 = vpow2.f32 %v2675_v14 }
0x21b7   :  { %v2681_v6 = vmul.f32 1.442695, %v2674_v21 }
0x21b9   :  { %4639 = vpow2.f32 %v2681_v6 }
0x21ba   :  { %4641 = vpow2.f32 %v2677_v60 }
0x21bf   :  { %v4636_v62 = vpop.eup %4635 }
0x21c0   :  { %v2689_v61 = vsel %vm204_vm5, %v4636_v62, 0.0  ;;  %v4638_v11 = vpop.eup %4637 }
0x21c1   :  { %2690 = vadd.xlane.f32.xlu1 %v2689_v61  ;;  %v2683_v9 = vsel %vm204_vm5, %v4638_v11, 0.0 }
0x21c3   :  { %v4640_v7 = vpop.eup %4639 }
0x21c4   :  { %v2692_v17 = vsel %vm204_vm5, %v4640_v7, 0.0  ;;  %v4642_v10 = vpop.eup %4641 }
0x21c5   :  { %2693 = vadd.xlane.f32.xlu0 %v2692_v17  ;;  %2684 = vadd.xlane.f32.xlu1 %v2683_v9  ;;  %v2686_v12 = vsel %vm204_vm5, %v4642_v10, 0.0 }
0x21c9   :  { %2687 = vadd.xlane.f32.xlu0 %v2686_v12 }
0x21d6   :  { %2774 = vrot.lane.b32.xlu1 %v5485_v42, %s4775_s26 }
0x21da   :  { %2776 = vrot.lane.b32.xlu1 %v5483_v41, %s4775_s26 }
0x21de   :  { %2772 = vrot.lane.b32.xlu1 %v5495_v19, %s4775_s26 }
0x21df   :  { %2709 = vrot.lane.b32.xlu0 %v5483_v41, %s4772_s16 }
0x21e3   :  { %2770 = vrot.lane.b32.xlu0 %v5497_v16, %s4775_s26 }
0x224e   :  { %v2691_v56 = vpop.xlane.xlu1 %2690 }
0x2252   :  { %v2694_v57 = vpop.xlane.xlu0 %2693  ;;  %v2685_v51 = vpop.xlane.xlu1 %2684 }
0x2253   :  { %4643 = vrcp.f32 %v2694_v57 }
0x2254   :  { %4645 = vrcp.f32 %v2685_v51 }
0x2255   :  { %4647 = vrcp.f32 %v2691_v56 }
0x2256   :  { %v2688_v24 = vpop.xlane.xlu0 %2687  ;;  %v2775_v26 = vpop.permute.xlu1 %2774 }
0x2257   :  { %4649 = vrcp.f32 %v2688_v24  ;;  %v2785_v43 = vsel %vm268_vm6, %v2775_v26, 0 }
0x225a   :  { %v2710_v25 = vpop.permute.xlu0 %2709  ;;  %v2777_v47 = vpop.permute.xlu1 %2776 }
0x225b   :  { %4233 = vmatprep.subr.bf16.mxu1 %v2710_v25  ;;  %v2788_v48 = vsel %vm268_vm6, %v2777_v47, 0 }
0x225c   :  { %4234 = vmatpush3.bf16.msra.mxu1 %v2710_v25 }
0x225d   :  { %4345 = vmatprep.subr.msk.bf16.mxu1 %vm268_vm6, %v2775_v26  ;;  %v4644_v31 = vpop.eup %4643 }
0x225e   :  { %v4646_v27 = vpop.eup %4645  ;;  %v2702_v35 = vmul.f32 %v4644_v31, %v4640_v7  ;;  %v2771_v44 = vpop.permute.xlu0 %2770 }
0x225f   :  { %v4648_v33 = vpop.eup %4647  ;;  %v2696_v36 = vmul.f32 %v4646_v27, %v4638_v11  ;;  %v2773_v49 = vpop.permute.xlu1 %2772 }
0x2260   :  { %v2700_v38 = vmul.f32 %v4648_v33, %v4636_v62 }
0x2261   :  { %v4650_v32 = vpop.eup %4649 }
0x2262   :  { %v2698_v30 = vmul.f32 %v4650_v32, %v4642_v10  ;;  %v2704_v40 = vpack.c.bf16 %v2702_v35, %v2700_v38 }
0x2264   :  { %v2703_v39 = vpack.c.bf16 %v2698_v30, %v2696_v36 }
0x2266   :  { %4235 = vmatprep.mubr.msk.bf16.mxu1 %vm204_vm5, %v2703_v39 }
0x2267   :  { %4236 = vmatmul.mubr.msk.bf16.vlgmr.msra.gmra.mrb[52].mxu1 %vm204_vm5, %v2704_v40 }
0x2268   :  { %4240 = vmatpush3.bf16.xpose.msra.mxu1 %v2785_v43  ;;  %4243 = vmatprep.mubr.msk.bf16.mxu1 %vm268_vm6, %v2771_v44 }
0x2269   :  { %4346 = vmatprep.subr.msk.bf16.mxu1 %vm268_vm6, %v2777_v47 }
0x2270   :  { %4242 = vmatpush3.bf16.xpose.msra.mxu1 %v2788_v48 }
0x2277   :  { %4244 = vmatmul.mubr.msk.bf16.vlgmr.msra.gmra.mrb[56].mxu1 %vm268_vm6, %v2773_v49 }
0x233a   :  { %v5531_v50 = vpop.f32.mrb[52].mxu1 }
0x233b   :  { %v5533_v52 = vpop.f32.mrb[53].mxu1 }
0x233c   :  { %v5535_v54 = vpop.f32.mrb[54].mxu1 }
0x233d   :  { %v5537_v3 = vpop.f32.mrb[55].mxu1 }
0x234a   :  { %v4245_v0 = vpop.f32.mrb[56].mxu1 }
0x234b   :  { %v2824_v53 = vpop.f32.mrb[57].mxu1  ;;  %v2845_v15 = vsel %vm204_vm5, %v4245_v0, -inf }
0x234c   :  { %v4246_v29 = vpop.f32.mrb[58].mxu1  ;;  %v2839_v1 = vsel %vm204_vm5, %v2824_v53, -inf }
0x234d   :  { %2840 = vmax.xlane.f32.xlu0 %v2839_v1  ;;  %v2827_v55 = vpop.f32.mrb[59].mxu1  ;;  %v2848_v4 = vsel %vm204_vm5, %v4246_v29, -inf }
0x234e   :  { %v2842_v2 = vsel %vm204_vm5, %v2827_v55, -inf }
0x234f   :  { %2843 = vmax.xlane.f32.xlu1 %v2842_v2 }
0x2351   :  { %2846 = vmax.xlane.f32.xlu0 %v2845_v15 }
0x2355   :  { %2849 = vmax.xlane.f32.xlu0 %v2848_v4 }
0x2360   :  { %2885 = vrot.lane.b32.xlu1 %v5485_v42, %s4774_s25 }
0x23da   :  { %v2841_v5 = vpop.xlane.xlu0 %2840 }
0x23db   :  { %v2851_v46 = vsub.f32 %v2824_v53, %v2841_v5 }
0x23dc   :  { %v2844_v8 = vpop.xlane.xlu1 %2843 }
0x23dd   :  { %v2855_v18 = vmul.f32 1.442695, %v2851_v46  ;;  %v2852_v34 = vsub.f32 %v2827_v55, %v2844_v8 }
0x23de   :  { %v2847_v45 = vpop.xlane.xlu0 %2846 }
0x23df   :  { %v2853_v20 = vsub.f32 %v4245_v0, %v2847_v45  ;;  %v2857_v59 = vmul.f32 1.442695, %v2852_v34 }
0x23e0   :  { %v2886_v28 = vpop.permute.xlu1 %2885 }
0x23e1   :  { %v2859_v14 = vmul.f32 1.442695, %v2853_v20  ;;  %4247 = vmatprep.subr.bf16.mxu0 %v2886_v28 }
0x23e2   :  { %v2850_v58 = vpop.xlane.xlu0 %2849  ;;  %4248 = vmatpush3.bf16.msra.mxu0 %v2886_v28 }
0x23e3   :  { %4651 = vpow2.f32 %v2859_v14  ;;  %v2854_v13 = vsub.f32 %v4246_v29, %v2850_v58 }
0x23e4   :  { %4653 = vpow2.f32 %v2855_v18 }
0x23e5   :  { %v2861_v21 = vmul.f32 1.442695, %v2854_v13 }
0x23e7   :  { %4655 = vpow2.f32 %v2861_v21 }
0x23e8   :  { %4657 = vpow2.f32 %v2857_v59 }
0x23ed   :  { %v4652_v60 = vpop.eup %4651 }
0x23ee   :  { %v2869_v6 = vsel %vm204_vm5, %v4652_v60, 0.0  ;;  %v4654_v62 = vpop.eup %4653 }
0x23ef   :  { %2870 = vadd.xlane.f32.xlu1 %v2869_v6  ;;  %v2863_v7 = vsel %vm204_vm5, %v4654_v62, 0.0 }
0x23f1   :  { %v4656_v61 = vpop.eup %4655 }
0x23f2   :  { %v2872_v11 = vsel %vm204_vm5, %v4656_v61, 0.0  ;;  %v4658_v17 = vpop.eup %4657 }
0x23f3   :  { %2873 = vadd.xlane.f32.xlu0 %v2872_v11  ;;  %2864 = vadd.xlane.f32.xlu1 %v2863_v7  ;;  %v2866_v9 = vsel %vm204_vm5, %v4658_v17, 0.0 }
0x23f7   :  { %2867 = vadd.xlane.f32.xlu0 %v2866_v9 }
0x2404   :  { %2950 = vrot.lane.b32.xlu1 %v5485_v42, %s4778_s29 }
0x2408   :  { %2952 = vrot.lane.b32.xlu1 %v5483_v41, %s4778_s29 }
0x240c   :  { %2948 = vrot.lane.b32.xlu1 %v5495_v19, %s4778_s29 }
0x240d   :  { %2887 = vrot.lane.b32.xlu0 %v5483_v41, %s4774_s25 }
0x2411   :  { %2946 = vrot.lane.b32.xlu0 %v5497_v16, %s4778_s29 }
0x247c   :  { %v2871_v10 = vpop.xlane.xlu1 %2870 }
0x2480   :  { %v2874_v12 = vpop.xlane.xlu0 %2873  ;;  %v2865_v56 = vpop.xlane.xlu1 %2864 }
0x2481   :  { %4659 = vrcp.f32 %v2874_v12 }
0x2482   :  { %4661 = vrcp.f32 %v2865_v56 }
0x2483   :  { %4663 = vrcp.f32 %v2871_v10 }
0x2484   :  { %v2868_v57 = vpop.xlane.xlu0 %2867  ;;  %v2951_v24 = vpop.permute.xlu1 %2950 }
0x2485   :  { %4665 = vrcp.f32 %v2868_v57  ;;  %v2961_v39 = vsel %vm268_vm6, %v2951_v24, 0 }
0x2488   :  { %v2888_v51 = vpop.permute.xlu0 %2887  ;;  %v2953_v43 = vpop.permute.xlu1 %2952 }
0x2489   :  { %4249 = vmatprep.subr.bf16.mxu0 %v2888_v51  ;;  %v2964_v44 = vsel %vm268_vm6, %v2953_v43, 0 }
0x248a   :  { %4250 = vmatpush3.bf16.msra.mxu0 %v2888_v51 }
0x248b   :  { %4347 = vmatprep.subr.msk.bf16.mxu0 %vm268_vm6, %v2951_v24  ;;  %v4660_v25 = vpop.eup %4659 }
0x248c   :  { %v4662_v26 = vpop.eup %4661  ;;  %v2882_v33 = vmul.f32 %v4660_v25, %v4656_v61  ;;  %v2947_v40 = vpop.permute.xlu0 %2946 }
0x248d   :  { %v4664_v31 = vpop.eup %4663  ;;  %v2876_v32 = vmul.f32 %v4662_v26, %v4654_v62  ;;  %v2949_v47 = vpop.permute.xlu1 %2948 }
0x248e   :  { %v2880_v36 = vmul.f32 %v4664_v31, %v4652_v60 }
0x248f   :  { %v4666_v27 = vpop.eup %4665 }
0x2490   :  { %v2878_v35 = vmul.f32 %v4666_v27, %v4658_v17  ;;  %v2884_v38 = vpack.c.bf16 %v2882_v33, %v2880_v36 }
0x2492   :  { %v2883_v30 = vpack.c.bf16 %v2878_v35, %v2876_v32 }
0x2494   :  { %4251 = vmatprep.mubr.msk.bf16.mxu0 %vm204_vm5, %v2883_v30 }
0x2495   :  { %4252 = vmatmul.mubr.msk.bf16.vlgmr.msra.gmra.mrb[52].mxu0 %vm204_vm5, %v2884_v38 }
0x2496   :  { %4256 = vmatpush3.bf16.xpose.msra.mxu0 %v2961_v39  ;;  %4259 = vmatprep.mubr.msk.bf16.mxu0 %vm268_vm6, %v2947_v40 }
0x2497   :  { %4348 = vmatprep.subr.msk.bf16.mxu0 %vm268_vm6, %v2953_v43 }
0x249e   :  { %4258 = vmatpush3.bf16.xpose.msra.mxu0 %v2964_v44 }
0x24a5   :  { %4260 = vmatmul.mubr.msk.bf16.vlgmr.msra.gmra.mrb[56].mxu0 %vm268_vm6, %v2949_v47 }
0x2568   :  { %v5567_v48 = vpop.f32.mrb[52].mxu0 }
0x2569   :  { %v5569_v49 = vpop.f32.mrb[53].mxu0 }
0x256a   :  { %v5571_v0 = vpop.f32.mrb[54].mxu0 }
0x256b   :  { %v4438_v53 = vpack.i.bf16 %v5571_v0, %v5567_v48  ;;  %v5575_v29 = vpop.f32.mrb[55].mxu0 }
0x256c   :  { %v4433_v1 = vpack.i.bf16 %v5575_v29, %v5569_v49 }
0x2578   :  { %v4261_v55 = vpop.f32.mrb[56].mxu0 }
0x2579   :  { %v3000_v2 = vpop.f32.mrb[57].mxu0  ;;  %v3021_v46 = vsel %vm204_vm5, %v4261_v55, -inf }
0x257a   :  { %v4262_v15 = vpop.f32.mrb[58].mxu0  ;;  %v3015_v4 = vsel %vm204_vm5, %v3000_v2, -inf }
0x257b   :  { %3016 = vmax.xlane.f32.xlu0 %v3015_v4  ;;  %v3003_v5 = vpop.f32.mrb[59].mxu0  ;;  %v3024_v45 = vsel %vm204_vm5, %v4262_v15, -inf }
0x257c   :  { %v3018_v8 = vsel %vm204_vm5, %v3003_v5, -inf }
0x257d   :  { %3019 = vmax.xlane.f32.xlu1 %v3018_v8 }
0x257f   :  { %3022 = vmax.xlane.f32.xlu0 %v3021_v46 }
0x2583   :  { %3025 = vmax.xlane.f32.xlu0 %v3024_v45 }
0x258e   :  { %3061 = vrot.lane.b32.xlu1 %v5485_v42, %s4777_s28 }
0x2608   :  { %v3017_v20 = vpop.xlane.xlu0 %3016 }
0x2609   :  { %v3027_v18 = vsub.f32 %v3000_v2, %v3017_v20 }
0x260a   :  { %v3020_v28 = vpop.xlane.xlu1 %3019 }
0x260b   :  { %v3031_v13 = vmul.f32 1.442695, %v3027_v18  ;;  %v3028_v59 = vsub.f32 %v3003_v5, %v3020_v28 }
0x260c   :  { %v3023_v34 = vpop.xlane.xlu0 %3022 }
0x260d   :  { %v3029_v14 = vsub.f32 %v4261_v55, %v3023_v34  ;;  %v3033_v62 = vmul.f32 1.442695, %v3028_v59 }
0x260e   :  { %v3062_v58 = vpop.permute.xlu1 %3061 }
0x260f   :  { %v3035_v21 = vmul.f32 1.442695, %v3029_v14  ;;  %4263 = vmatprep.subr.bf16.mxu1 %v3062_v58 }
0x2610   :  { %v3026_v60 = vpop.xlane.xlu0 %3025  ;;  %4264 = vmatpush3.bf16.msra.mxu1 %v3062_v58 }
0x2611   :  { %4667 = vpow2.f32 %v3035_v21  ;;  %v3030_v6 = vsub.f32 %v4262_v15, %v3026_v60 }
0x2612   :  { %4669 = vpow2.f32 %v3031_v13 }
0x2613   :  { %v3037_v61 = vmul.f32 1.442695, %v3030_v6 }
0x2615   :  { %4671 = vpow2.f32 %v3037_v61 }
0x2616   :  { %4673 = vpow2.f32 %v3033_v62 }
0x261b   :  { %v4668_v11 = vpop.eup %4667 }
0x261c   :  { %v3045_v7 = vsel %vm204_vm5, %v4668_v11, 0.0  ;;  %v4670_v17 = vpop.eup %4669 }
0x261d   :  { %3046 = vadd.xlane.f32.xlu1 %v3045_v7  ;;  %v3039_v12 = vsel %vm204_vm5, %v4670_v17, 0.0 }
0x261f   :  { %v4672_v9 = vpop.eup %4671 }
0x2620   :  { %v3048_v10 = vsel %vm204_vm5, %v4672_v9, 0.0  ;;  %v4674_v56 = vpop.eup %4673 }
0x2621   :  { %3049 = vadd.xlane.f32.xlu0 %v3048_v10  ;;  %3040 = vadd.xlane.f32.xlu1 %v3039_v12  ;;  %v3042_v57 = vsel %vm204_vm5, %v4674_v56, 0.0 }
0x2625   :  { %3043 = vadd.xlane.f32.xlu0 %v3042_v57 }
0x2632   :  { %3126 = vrot.lane.b32.xlu1 %v5485_v42, %s4781_s9 }
0x2636   :  { %3128 = vrot.lane.b32.xlu1 %v5483_v41, %s4781_s9 }
0x263a   :  { %3124 = vrot.lane.b32.xlu1 %v5495_v19, %s4781_s9 }
0x263b   :  { %3063 = vrot.lane.b32.xlu0 %v5483_v41, %s4777_s28 }
0x263f   :  { %3122 = vrot.lane.b32.xlu0 %v5497_v16, %s4781_s9 }
0x26aa   :  { %v3047_v51 = vpop.xlane.xlu1 %3046 }
0x26ae   :  { %v3050_v24 = vpop.xlane.xlu0 %3049  ;;  %v3041_v25 = vpop.xlane.xlu1 %3040 }
0x26af   :  { %4675 = vrcp.f32 %v3050_v24 }
0x26b0   :  { %4677 = vrcp.f32 %v3041_v25 }
0x26b1   :  { %4679 = vrcp.f32 %v3047_v51 }
0x26b2   :  { %v3044_v26 = vpop.xlane.xlu0 %3043  ;;  %v3127_v27 = vpop.permute.xlu1 %3126 }
0x26b3   :  { %4681 = vrcp.f32 %v3044_v26  ;;  %v3137_v43 = vsel %vm268_vm6, %v3127_v27, 0 }
0x26b6   :  { %v3064_v31 = vpop.permute.xlu0 %3063  ;;  %v3129_v47 = vpop.permute.xlu1 %3128 }
0x26b7   :  { %4265 = vmatprep.subr.bf16.mxu1 %v3064_v31  ;;  %v3140_v55 = vsel %vm268_vm6, %v3129_v47, 0 }
0x26b8   :  { %4266 = vmatpush3.bf16.msra.mxu1 %v3064_v31 }
0x26b9   :  { %4349 = vmatprep.subr.msk.bf16.mxu1 %vm268_vm6, %v3127_v27  ;;  %v4676_v19 = vpop.eup %4675 }
0x26ba   :  { %v4678_v33 = vpop.eup %4677  ;;  %v3058_v36 = vmul.f32 %v4676_v19, %v4672_v9  ;;  %v3123_v44 = vpop.permute.xlu0 %3122 }
0x26bb   :  { %v4680_v32 = vpop.eup %4679  ;;  %v3052_v16 = vmul.f32 %v4678_v33, %v4670_v17  ;;  %v3125_v2 = vpop.permute.xlu1 %3124  ;;  %v5620_v33 = vld [vmem:[%s5730_s3 + $0xc] ss:$16 sps:$4 sm:$0xff]  }
0x26bc   :  { %v3056_v38 = vmul.f32 %v4680_v32, %v4668_v11 }
0x26bd   :  { %v4682_v35 = vpop.eup %4681 }
0x26be   :  { %v3054_v30 = vmul.f32 %v4682_v35, %v4674_v56  ;;  %v3060_v40 = vpack.c.bf16 %v3058_v36, %v3056_v38 }
0x26c0   :  { %v3059_v39 = vpack.c.bf16 %v3054_v30, %v3052_v16 }
0x26c2   :  { %4267 = vmatprep.mubr.msk.bf16.mxu1 %vm204_vm5, %v3059_v39 }
0x26c3   :  { %4268 = vmatmul.mubr.msk.bf16.vlgmr.msra.gmra.mrb[60].mxu1 %vm204_vm5, %v3060_v40 }
0x26c4   :  { %4272 = vmatpush3.bf16.xpose.msra.mxu1 %v3137_v43  ;;  %4275 = vmatprep.mubr.msk.bf16.mxu1 %vm268_vm6, %v3123_v44 }
0x26c5   :  { %4350 = vmatprep.subr.msk.bf16.mxu1 %vm268_vm6, %v3129_v47 }
0x26cc   :  { %4274 = vmatpush3.bf16.xpose.msra.mxu1 %v3140_v55 }
0x26d3   :  { %4276 = vmatmul.mubr.msk.bf16.vlgmr.msra.gmra.mrb[64].mxu1 %vm268_vm6, %v3125_v2 }
0x2796   :  { %v4269_v15 = vpop.f32.mrb[60].mxu1 }
0x2797   :  { %v3107_v4 = vpop.f32.mrb[61].mxu1 }
0x2798   :  { %v4270_v5 = vpop.f32.mrb[62].mxu1 }
0x2799   :  { %v4448_v8 = vpack.i.bf16 %v4270_v5, %v4269_v15  ;;  %v3110_v46 = vpop.f32.mrb[63].mxu1 }
0x279a   :  { %v4443_v45 = vpack.i.bf16 %v3110_v46, %v3107_v4  ;;  %v5645_v4 = vld [vmem:[%s5730_s3 + $0x2c] ss:$16 sps:$4 sm:$0xff]   ;;  %s4786_s3 = smov [#allocation5]  }
0x27a6   :  { %v4277_v20 = vpop.f32.mrb[64].mxu1 }
0x27a7   :  { %v3176_v28 = vpop.f32.mrb[65].mxu1  ;;  %v3197_v13 = vsel %vm204_vm5, %v4277_v20, -inf }
0x27a8   :  { %v4278_v18 = vpop.f32.mrb[66].mxu1  ;;  %v3191_v34 = vsel %vm204_vm5, %v3176_v28, -inf }
0x27a9   :  { %3192 = vmax.xlane.f32.xlu0 %v3191_v34  ;;  %v3179_v14 = vpop.f32.mrb[67].mxu1  ;;  %v3200_v59 = vsel %vm204_vm5, %v4278_v18, -inf }
0x27aa   :  { %v3194_v58 = vsel %vm204_vm5, %v3179_v14, -inf }
0x27ab   :  { %3195 = vmax.xlane.f32.xlu1 %v3194_v58 }
0x27ad   :  { %3198 = vmax.xlane.f32.xlu0 %v3197_v13 }
0x27b1   :  { %3201 = vmax.xlane.f32.xlu0 %v3200_v59 }
0x2836   :  { %v3193_v21 = vpop.xlane.xlu0 %3192 }
0x2837   :  { %v3203_v60 = vsub.f32 %v3176_v28, %v3193_v21 }
0x2838   :  { %v3196_v6 = vpop.xlane.xlu1 %3195 }
0x2839   :  { %v3207_v11 = vmul.f32 1.442695, %v3203_v60  ;;  %v3204_v7 = vsub.f32 %v3179_v14, %v3196_v6 }
0x283a   :  { %v3199_v62 = vpop.xlane.xlu0 %3198 }
0x283b   :  { %v3205_v61 = vsub.f32 %v4277_v20, %v3199_v62  ;;  %v3209_v12 = vmul.f32 1.442695, %v3204_v7 }
0x283d   :  { %v3211_v17 = vmul.f32 1.442695, %v3205_v61 }
0x283e   :  { %v3202_v9 = vpop.xlane.xlu0 %3201 }
0x283f   :  { %4683 = vpow2.f32 %v3211_v17  ;;  %v3206_v10 = vsub.f32 %v4278_v18, %v3202_v9 }
0x2840   :  { %4685 = vpow2.f32 %v3207_v11 }
0x2841   :  { %v3213_v56 = vmul.f32 1.442695, %v3206_v10 }
0x2843   :  { %4687 = vpow2.f32 %v3213_v56 }
0x2844   :  { %4689 = vpow2.f32 %v3209_v12 }
0x2849   :  { %v4684_v57 = vpop.eup %4683 }
0x284a   :  { %v3221_v51 = vsel %vm204_vm5, %v4684_v57, 0.0  ;;  %v4686_v24 = vpop.eup %4685 }
0x284b   :  { %3222 = vadd.xlane.f32.xlu1 %v3221_v51  ;;  %v3215_v31 = vsel %vm204_vm5, %v4686_v24, 0.0 }
0x284d   :  { %v4688_v25 = vpop.eup %4687 }
0x284e   :  { %v3224_v26 = vsel %vm204_vm5, %v4688_v25, 0.0  ;;  %v4690_v27 = vpop.eup %4689 }
0x284f   :  { %3225 = vadd.xlane.f32.xlu0 %v3224_v26  ;;  %3216 = vadd.xlane.f32.xlu1 %v3215_v31  ;;  %v3218_v19 = vsel %vm204_vm5, %v4690_v27, 0.0 }
0x2853   :  { %3219 = vadd.xlane.f32.xlu0 %v3218_v19 }
0x2860   :  { %3237 = vrot.lane.b32.xlu1 %v5485_v42, %s4780_s30 }
0x2864   :  { %3380 = vrot.lane.b32.xlu1 %v5620_v33, %s4772_s16 }
0x2868   :  { %4434 = vrot.lane.b32.xlu1 %v4433_v1, %s4769_s8 }
0x2869   :  { %3239 = vrot.lane.b32.xlu0 %v5483_v41, %s4780_s30 }
0x286c   :  { %4444 = vrot.lane.b32.xlu1 %v4443_v45, %s4784_s11  ;;  %v5652_v45 = vld [vmem:[%s5731_s4 + $0x3] ss:$0 sm:$0xff]  ;;  %s3737_s4 = sshll.u32 %s4786_s3, 4  ;;  %s3738_s4 = int_to_ptr.vmem [resolvable:$true] %s3737_s4 }
0x286d   :  { %4439 = vrot.lane.b32.xlu0 %v4438_v53, %s4769_s8  ;;  %p4746_p9 = scmp.lt.s32.totalorder %s3738_s4, %s3738_s4 }
0x2871   :  { %4449 = vrot.lane.b32.xlu0 %v4448_v8, %s4784_s11 }
0x2875   :  { %3382 = vrot.lane.b32.xlu0 %v5645_v4, %s4772_s16 }
0x2879   :  { %3386 = vrot.lane.b32.xlu0 %v5652_v45, %s4772_s16  ;;  %s4741_s16 = scalar_lea.vmem %s3738_s4, 512 }
0x287a   :  { %p4742_p8 = scmp.ne.s32.totalorder %s3738_s4, %s4741_s16  ;;  %p4747_p10 = scmp.lt.s32.totalorder %s4741_s16, %s4741_s16 }
0x287c   :  { %p4748_p11 = por %p4747_p10, %p4746_p9 }
0x287e   :  { %p4749_p12 = pnand %p4748_p11, %p4742_p8 }
0x28d8   :  { %v3223_v42 = vpop.xlane.xlu1 %3222 }
0x28dc   :  { %v3226_v32 = vpop.xlane.xlu0 %3225  ;;  %v3217_v35 = vpop.xlane.xlu1 %3216 }
0x28dd   :  { %4691 = vrcp.f32 %v3226_v32 }
0x28de   :  { %4693 = vrcp.f32 %v3217_v35 }
0x28df   :  { %4695 = vrcp.f32 %v3223_v42 }
0x28e0   :  { %v3220_v49 = vpop.xlane.xlu0 %3219  ;;  %v3238_v29 = vpop.permute.xlu1 %3237 }
0x28e1   :  { %4697 = vrcp.f32 %v3220_v49  ;;  %4279 = vmatprep.subr.bf16.mxu0 %v3238_v29 }
0x28e2   :  { %4280 = vmatpush3.bf16.msra.mxu0 %v3238_v29 }
0x28e4   :  { %v3240_v41 = vpop.permute.xlu0 %3239  ;;  %v3381_v1 = vpop.permute.xlu1 %3380 }
0x28e5   :  { %4281 = vmatprep.subr.bf16.mxu0 %v3240_v41 }
0x28e6   :  { %4282 = vmatpush3.bf16.msra.mxu0 %v3240_v41 }
0x28e7   :  { %4287 = vmatprep.subr.bf16.mxu0 %v3381_v1  ;;  %v4692_v48 = vpop.eup %4691 }
0x28e8   :  { %v4440_v0 = vpop.permute.xlu0 %4439  ;;  %v4694_v53 = vpop.eup %4693  ;;  %v3234_v39 = vmul.f32 %v4692_v48, %v4688_v25 }
0x28e9   :  { %v4442_v36 = vunpack.i.h.bf16 %v4440_v0  ;;  %v4441_v16 = vunpack.i.l.bf16 %v4440_v0  ;;  %v4696_v30 = vpop.eup %4695  ;;  %v3228_v44 = vmul.f32 %v4694_v53, %v4686_v24  ;;  %v4435_v34 = vpop.permute.xlu1 %4434 }
0x28ea   :  { %v3232_v55 = vmul.f32 %v4696_v30, %v4684_v57  ;;  %v4437_v58 = vunpack.i.h.bf16 %v4435_v34  ;;  %v4436_v13 = vunpack.i.l.bf16 %v4435_v34 }
0x28eb   :  { %v4698_v38 = vpop.eup %4697  ;;  %v3349_v40 = vsel %vm268_vm6, %v5535_v54, %v4442_v36  ;;  %v3348_v43 = vsel %vm268_vm6, %v5531_v50, %v4441_v16 }
0x28ec   :  { %v3230_v47 = vmul.f32 %v4698_v38, %v4690_v27  ;;  %v3236_v15 = vpack.c.bf16 %v3234_v39, %v3232_v55  ;;  %v4450_v54 = vpop.permute.xlu0 %4449  ;;  %v3347_v6 = vsel %vm268_vm6, %v5537_v3, %v4437_v58  ;;  %v3346_v62 = vsel %vm268_vm6, %v5533_v52, %v4436_v13 }
0x28ed   :  { %v4445_v14 = vpop.permute.xlu1 %4444  ;;  %v4452_v7 = vunpack.i.h.bf16 %v4450_v54  ;;  %v4451_v17 = vunpack.i.l.bf16 %v4450_v54 }
0x28ee   :  { %v3235_v2 = vpack.c.bf16 %v3230_v47, %v3228_v44  ;;  %v4447_v59 = vunpack.i.h.bf16 %v4445_v14  ;;  %v4446_v21 = vunpack.i.l.bf16 %v4445_v14 }
0x28ef   :  { %v3352_v3 = vsel %vm1017_vm7, %v3348_v43, %v4451_v17  ;;  %v3353_v52 = vsel %vm1017_vm7, %v3349_v40, %v4452_v7 }
0x28f0   :  { %4283 = vmatprep.mubr.msk.bf16.mxu0 %vm204_vm5, %v3235_v2  ;;  %v3383_v50 = vpop.permute.xlu0 %3382  ;;  %v3350_v9 = vsel %vm1017_vm7, %v3346_v62, %v4446_v21  ;;  %v3351_v10 = vsel %vm1017_vm7, %v3347_v6, %v4447_v59 }
0x28f1   :  { %4284 = vmatmul.mubr.msk.bf16.vlgmr.msra.gmra.mrb[60].mxu0 %vm204_vm5, %v3236_v15 }
0x28f2   :  { %4288 = vmatpush3.bf16.msra.mxu0 %v3381_v1 }
0x28f3   :  { %4289 = vmatprep.subr.bf16.mxu0 %v3383_v50 }
0x28f4   :  { %v3387_v19 = vpop.permute.xlu0 %3386 }
0x28f6   :  { %4290 = vmatpush3.bf16.msra.mxu0 %v3383_v50 }
0x29c4   :  { %v4285_v5 = vpop.f32.mrb[60].mxu0 }
0x29c5   :  { %v3283_v8 = vpop.f32.mrb[61].mxu0 }
0x29c6   :  { %v4286_v46 = vpop.f32.mrb[62].mxu0 }
0x29c7   :  { %v4458_v20 = vpack.i.bf16 %v4286_v46, %v4285_v5  ;;  %v3286_v28 = vpop.f32.mrb[63].mxu0 }
0x29c8   :  { %v4453_v18 = vpack.i.bf16 %v3286_v28, %v3283_v8 }
0x29ca   :  { %4454 = vrot.lane.b32.xlu1 %v4453_v18, %s4785_s12 }
0x29ce   :  { %4459 = vrot.lane.b32.xlu1 %v4458_v20, %s4785_s12 }
0x2a3c   :  { %v4455_v60 = vpop.permute.xlu1 %4454 }
0x2a3d   :  { %v4457_v61 = vunpack.i.h.bf16 %v4455_v60  ;;  %v4456_v11 = vunpack.i.l.bf16 %v4455_v60 }
0x2a3f   :  { %v3354_v12 = vsel %vm1022_vm8, %v3350_v9, %v4456_v11  ;;  %v3355_v56 = vsel %vm1022_vm8, %v3351_v10, %v4457_v61 }
0x2a40   :  { %v3363_v57 = vpack.c.bf16 %v3355_v56, %v3354_v12  ;;  %v4460_v51 = vpop.permute.xlu1 %4459 }
0x2a41   :  { %v4462_v24 = vunpack.i.h.bf16 %v4460_v51  ;;  %v4461_v25 = vunpack.i.l.bf16 %v4460_v51  ;;  %v3849_v51 = vld [vmem:[#allocation2 + $0x6] ss:$0 sm:$0xff] }
0x2a42   :  { %4291 = vmatprep.mubr.msk.bf16.mxu0 %vm204_vm5, %v3363_v57 }
0x2a43   :  { %v3357_v26 = vsel %vm1022_vm8, %v3353_v52, %v4462_v24  ;;  %v3356_v31 = vsel %vm1022_vm8, %v3352_v3, %v4461_v25 }
0x2a44   :  { %v3364_v27 = vpack.c.bf16 %v3357_v26, %v3356_v31 }
0x2a46   :  { %4292 = vmatmul.mubr.msk.bf16.vlgmr.msra.gmra.mrb[64].mxu0 %vm204_vm5, %v3364_v27  ;;  %v3850_v27 = vld [vmem:[#allocation2 + $0x7] ss:$0 sm:$0xff] }
0x2b19   :  { %v4293_v42 = vpop.f32.mrb[64].mxu0 }
0x2b1a   :  { %v3429_v32 = vpop.f32.mrb[65].mxu0  ;;  %v3438_v1 = vadd.f32 %v4293_v42, %v3387_v19 }
0x2b1b   :  { %v3430_v35 = vadd.f32 %v3429_v32, %v3387_v19  ;;  %v4294_v49 = vpop.f32.mrb[66].mxu0 }
0x2b1c   :  { %v3441_v29 = vadd.f32 %v4294_v49, %v3387_v19  ;;  %v3432_v41 = vpop.f32.mrb[67].mxu0  ;;  %v3446_v30 = vadd.f32 %v3438_v1, %v5468_v63 }
0x2b1d   :  { %v3444_v48 = vadd.f32 %v3430_v35, %v5470_v37  ;;  %v3433_v0 = vadd.f32 %v3432_v41, %v3387_v19 }
0x2b1e   :  { %v3447_v53 = vadd.f32 %v3441_v29, %v5474_v23  ;;  %v3456_v40 = vsel %vm204_vm5, %v3446_v30, 0.0 }
0x2b1f   :  { %v3445_v36 = vadd.f32 %v3433_v0, %v5472_v22  ;;  %v3450_v16 = vsel %vm204_vm5, %v3444_v48, 0.0 }
0x2b20   :  { %3451 = vadd.xlane.f32.xlu1 %v3450_v16  ;;  %v3459_v39 = vsel %vm204_vm5, %v3447_v53, 0.0 }
0x2b21   :  { %v3453_v38 = vsel %vm204_vm5, %v3445_v36, 0.0 }
0x2b22   :  { %3454 = vadd.xlane.f32.xlu0 %v3453_v38 }
0x2b24   :  { %3460 = vadd.xlane.f32.xlu1 %v3459_v39 }
0x2b26   :  { %3457 = vadd.xlane.f32.xlu0 %v3456_v40 }
0x2bad   :  { %v3452_v37 = vpop.xlane.xlu1 %3451 }
0x2bae   :  { %v3462_v47 = vmul.f32 0.03125, %v3452_v37 }
0x2baf   :  { %v3455_v43 = vpop.xlane.xlu0 %3454 }
0x2bb0   :  { %v3463_v44 = vmul.f32 0.03125, %v3455_v43  ;;  %v3466_v63 = vsub.f32 %v3444_v48, %v3462_v47 }
0x2bb1   :  { %v3461_v23 = vpop.xlane.xlu1 %3460 }
0x2bb2   :  { %v3465_v22 = vmul.f32 0.03125, %v3461_v23  ;;  %v3467_v2 = vsub.f32 %v3445_v36, %v3463_v44  ;;  %v3470_v18 = vmul.f32 %v3466_v63, %v3466_v63 }
0x2bb3   :  { %v3458_v55 = vpop.xlane.xlu0 %3457 }
0x2bb4   :  { %v3469_v15 = vsub.f32 %v3447_v53, %v3465_v22  ;;  %v3464_v54 = vmul.f32 0.03125, %v3458_v55  ;;  %v3471_v20 = vmul.f32 %v3467_v2, %v3467_v2  ;;  %v3474_v14 = vsel %vm204_vm5, %v3470_v18, 0.0 }
0x2bb6   :  { %v3468_v50 = vsub.f32 %v3446_v30, %v3464_v54  ;;  %v3473_v5 = vmul.f32 %v3469_v15, %v3469_v15  ;;  %v3477_v34 = vsel %vm204_vm5, %v3471_v20, 0.0 }
0x2bb8   :  { %v3483_v8 = vsel %vm204_vm5, %v3473_v5, 0.0  ;;  %v3472_v46 = vmul.f32 %v3468_v50, %v3468_v50 }
0x2bb9   :  { %3484 = vadd.xlane.f32.xlu1 %v3483_v8 }
0x2bba   :  { %v3480_v28 = vsel %vm204_vm5, %v3472_v46, 0.0 }
0x2bbb   :  { %3481 = vadd.xlane.f32.xlu0 %v3480_v28 }
0x2bbd   :  { %3478 = vadd.xlane.f32.xlu1 %v3477_v34 }
0x2bbf   :  { %3475 = vadd.xlane.f32.xlu0 %v3474_v14 }
0x2bce   :  { %3522 = vrot.lane.b32.xlu1 %v5645_v4, %s4773_s24 }
0x2bd2   :  { %3590 = vrot.lane.b32.xlu1 %v5620_v33, %s4783_s2 }
0x2bd5   :  { %3520 = vrot.lane.b32.xlu0 %v5620_v33, %s4773_s24 }
0x2bd6   :  { %3592 = vrot.lane.b32.xlu1 %v5645_v4, %s4783_s2 }
0x2bd9   :  { %3526 = vrot.lane.b32.xlu0 %v5652_v45, %s4773_s24 }
0x2bdd   :  { %3596 = vrot.lane.b32.xlu0 %v5652_v45, %s4783_s2 }
0x2c46   :  { %v3485_v58 = vpop.xlane.xlu1 %3484 }
0x2c47   :  { %v3489_v13 = vmul.f32 0.03125, %v3485_v58 }
0x2c48   :  { %v3482_v59 = vpop.xlane.xlu0 %3481 }
0x2c49   :  { %v3493_v21 = vadd.f32 1e-05, %v3489_v13  ;;  %v3488_v60 = vmul.f32 0.03125, %v3482_v59 }
0x2c4a   :  { %v3479_v6 = vpop.xlane.xlu1 %3478 }
0x2c4b   :  { %v3492_v62 = vadd.f32 1e-05, %v3488_v60  ;;  %v3487_v61 = vmul.f32 0.03125, %v3479_v6  ;;  %4699 = vrsqrt.f32 %v3493_v21 }
0x2c4c   :  { %v3476_v11 = vpop.xlane.xlu0 %3475 }
0x2c4d   :  { %4701 = vrsqrt.f32 %v3492_v62  ;;  %v3491_v33 = vadd.f32 1e-05, %v3487_v61  ;;  %v3486_v7 = vmul.f32 0.03125, %v3476_v11 }
0x2c4e   :  { %v3523_v9 = vpop.permute.xlu1 %3522 }
0x2c4f   :  { %4703 = vrsqrt.f32 %v3491_v33  ;;  %v3490_v4 = vadd.f32 1e-05, %v3486_v7 }
0x2c50   :  { %v3521_v17 = vpop.permute.xlu0 %3520 }
0x2c51   :  { %4705 = vrsqrt.f32 %v3490_v4  ;;  %4295 = vmatprep.subr.bf16.mxu1 %v3521_v17 }
0x2c52   :  { %4296 = vmatpush3.bf16.msra.mxu1 %v3521_v17  ;;  %v3591_v1 = vpop.permute.xlu1 %3590 }
0x2c53   :  { %4297 = vmatprep.subr.bf16.mxu1 %v3523_v9  ;;  %4303 = vmatprep.subr.bf16.mxu0 %v3591_v1 }
0x2c54   :  { %4304 = vmatpush3.bf16.msra.mxu0 %v3591_v1  ;;  %v3527_v0 = vpop.permute.xlu0 %3526 }
0x2c55   :  { %v4700_v45 = vpop.eup %4699 }
0x2c56   :  { %4298 = vmatpush3.bf16.msra.mxu1 %v3523_v9  ;;  %v3501_v57 = vmul.f32 %v4700_v45, %v3469_v15  ;;  %v3593_v48 = vpop.permute.xlu1 %3592 }
0x2c57   :  { %v4702_v10 = vpop.eup %4701  ;;  %4305 = vmatprep.subr.bf16.mxu0 %v3593_v48 }
0x2c58   :  { %v3500_v12 = vmul.f32 %v4702_v10, %v3468_v50  ;;  %v3509_v31 = vmul.f32 %v3849_v51, %v3501_v57  ;;  %4306 = vmatpush3.bf16.msra.mxu0 %v3593_v48 }
0x2c59   :  { %v4704_v56 = vpop.eup %4703 }
0x2c5a   :  { %v3499_v24 = vmul.f32 %v4704_v56, %v3467_v2  ;;  %v3508_v3 = vmul.f32 %v3849_v51, %v3500_v12  ;;  %v3517_v49 = vadd.f32 %v3850_v27, %v3509_v31  ;;  %v3597_v2 = vpop.permute.xlu0 %3596 }
0x2c5b   :  { %v4706_v25 = vpop.eup %4705 }
0x2c5c   :  { %v3498_v52 = vmul.f32 %v4706_v25, %v3466_v63  ;;  %v3507_v26 = vmul.f32 %v3849_v51, %v3499_v24  ;;  %v3516_v42 = vadd.f32 %v3850_v27, %v3508_v3 }
0x2c5e   :  { %v3506_v19 = vmul.f32 %v3849_v51, %v3498_v52  ;;  %v3515_v35 = vadd.f32 %v3850_v27, %v3507_v26  ;;  %v3519_v41 = vpack.c.bf16 %v3517_v49, %v3516_v42 }
0x2c60   :  { %v3514_v32 = vadd.f32 %v3850_v27, %v3506_v19 }
0x2c62   :  { %v3518_v29 = vpack.c.bf16 %v3515_v35, %v3514_v32 }
0x2c64   :  { %4299 = vmatprep.mubr.msk.bf16.mxu1 %vm204_vm5, %v3518_v29 }
0x2c65   :  { %4300 = vmatmul.mubr.msk.bf16.vlgmr.msra.gmra.mrb[68].mxu1 %vm204_vm5, %v3519_v41 }
0x2d38   :  { %v4301_v53 = vpop.f32.mrb[68].mxu1 }
0x2d39   :  { %v3578_v36 = vadd.f32 %v4301_v53, %v3527_v0  ;;  %v3569_v16 = vpop.f32.mrb[69].mxu1  ;;  %v3855_v53 = vld [vmem:[#allocation2 + $0x8] ss:$0 sm:$0xff] }
0x2d3a   :  { %v3570_v30 = vadd.f32 %v3569_v16, %v3527_v0  ;;  %v4302_v38 = vpop.f32.mrb[70].mxu1 }
0x2d3b   :  { %v3581_v39 = vadd.f32 %v4302_v38, %v3527_v0  ;;  %v3572_v40 = vpop.f32.mrb[71].mxu1  ;;  %v3586_v43 = vmax.f32 %v3578_v36, 0.0 }
0x2d3c   :  { %v3573_v37 = vadd.f32 %v3572_v40, %v3527_v0  ;;  %v3584_v23 = vmax.f32 %v3570_v30, 0.0  ;;  %v3856_v30 = vld [vmem:[#allocation2 + $0x9] ss:$0 sm:$0xff] }
0x2d3d   :  { %v3587_v44 = vmax.f32 %v3581_v39, 0.0 }
0x2d3e   :  { %v3585_v47 = vmax.f32 %v3573_v37, 0.0 }
0x2d3f   :  { %v3589_v22 = vpack.c.bf16 %v3587_v44, %v3586_v43 }
0x2d40   :  { %v3588_v55 = vpack.c.bf16 %v3585_v47, %v3584_v23 }
0x2d42   :  { %4307 = vmatprep.mubr.msk.bf16.mxu0 %vm204_vm5, %v3588_v55 }
0x2d43   :  { %4308 = vmatmul.mubr.msk.bf16.vlgmr.msra.gmra.mrb[68].mxu0 %vm204_vm5, %v3589_v22 }
0x2e16   :  { %v4309_v15 = vpop.f32.mrb[68].mxu0 }
0x2e17   :  { %v3639_v54 = vpop.f32.mrb[69].mxu0  ;;  %v3648_v46 = vadd.f32 %v4309_v15, %v3597_v2 }
0x2e18   :  { %v3640_v63 = vadd.f32 %v3639_v54, %v3597_v2  ;;  %v4310_v50 = vpop.f32.mrb[70].mxu0 }
0x2e19   :  { %v3651_v5 = vadd.f32 %v4310_v50, %v3597_v2  ;;  %v3642_v8 = vpop.f32.mrb[71].mxu0  ;;  %v3656_v58 = vadd.f32 %v3648_v46, %v3516_v42 }
0x2e1a   :  { %v3654_v20 = vadd.f32 %v3640_v63, %v3514_v32  ;;  %v3643_v28 = vadd.f32 %v3642_v8, %v3597_v2 }
0x2e1b   :  { %v3657_v18 = vadd.f32 %v3651_v5, %v3517_v49  ;;  %v3666_v21 = vsel %vm204_vm5, %v3656_v58, 0.0 }
0x2e1c   :  { %v3655_v34 = vadd.f32 %v3643_v28, %v3515_v35  ;;  %v3660_v14 = vsel %vm204_vm5, %v3654_v20, 0.0 }
0x2e1d   :  { %3661 = vadd.xlane.f32.xlu1 %v3660_v14  ;;  %v3669_v59 = vsel %vm204_vm5, %v3657_v18, 0.0 }
0x2e1e   :  { %v3663_v13 = vsel %vm204_vm5, %v3655_v34, 0.0 }
0x2e1f   :  { %3664 = vadd.xlane.f32.xlu0 %v3663_v13 }
0x2e21   :  { %3670 = vadd.xlane.f32.xlu1 %v3669_v59 }
0x2e23   :  { %3667 = vadd.xlane.f32.xlu0 %v3666_v21 }
0x2eaa   :  { %v3662_v60 = vpop.xlane.xlu1 %3661 }
0x2eab   :  { %v3672_v6 = vmul.f32 0.03125, %v3662_v60 }
0x2eac   :  { %v3665_v62 = vpop.xlane.xlu0 %3664 }
0x2ead   :  { %v3676_v61 = vsub.f32 %v3654_v20, %v3672_v6  ;;  %v3673_v11 = vmul.f32 0.03125, %v3665_v62 }
0x2eae   :  { %v3671_v33 = vpop.xlane.xlu1 %3670 }
0x2eaf   :  { %v3677_v7 = vsub.f32 %v3655_v34, %v3673_v11  ;;  %v3675_v4 = vmul.f32 0.03125, %v3671_v33  ;;  %v3680_v17 = vmul.f32 %v3676_v61, %v3676_v61 }
0x2eb0   :  { %v3668_v9 = vpop.xlane.xlu0 %3667 }
0x2eb1   :  { %v3679_v45 = vsub.f32 %v3657_v18, %v3675_v4  ;;  %v3674_v10 = vmul.f32 0.03125, %v3668_v9  ;;  %v3684_v12 = vsel %vm204_vm5, %v3680_v17, 0.0  ;;  %v3681_v56 = vmul.f32 %v3677_v7, %v3677_v7 }
0x2eb2   :  { %3685 = vadd.xlane.f32.xlu0 %v3684_v12 }
0x2eb3   :  { %v3678_v57 = vsub.f32 %v3656_v58, %v3674_v10  ;;  %v3687_v51 = vsel %vm204_vm5, %v3681_v56, 0.0  ;;  %v3683_v24 = vmul.f32 %v3679_v45, %v3679_v45 }
0x2eb4   :  { %3688 = vadd.xlane.f32.xlu1 %v3687_v51 }
0x2eb5   :  { %v3682_v25 = vmul.f32 %v3678_v57, %v3678_v57  ;;  %v3693_v52 = vsel %vm204_vm5, %v3683_v24, 0.0 }
0x2eb7   :  { %v3690_v3 = vsel %vm204_vm5, %v3682_v25, 0.0 }
0x2eb8   :  { %3691 = vadd.xlane.f32.xlu0 %v3690_v3  ;;  %3694 = vadd.xlane.f32.xlu1 %v3693_v52 }
0x2f3f   :  { %v3686_v26 = vpop.xlane.xlu0 %3685 }
0x2f40   :  { %v3696_v31 = vmul.f32 0.03125, %v3686_v26 }
0x2f41   :  { %v3689_v27 = vpop.xlane.xlu1 %3688 }
0x2f42   :  { %v3700_v19 = vadd.f32 1e-05, %v3696_v31  ;;  %v3697_v42 = vmul.f32 0.03125, %v3689_v27 }
0x2f44   :  { %4707 = vrsqrt.f32 %v3700_v19  ;;  %v3701_v32 = vadd.f32 1e-05, %v3697_v42 }
0x2f45   :  { %v3692_v35 = vpop.xlane.xlu0 %3691  ;;  %v3695_v49 = vpop.xlane.xlu1 %3694 }
0x2f46   :  { %4709 = vrsqrt.f32 %v3701_v32  ;;  %v3698_v29 = vmul.f32 0.03125, %v3692_v35  ;;  %v3699_v41 = vmul.f32 0.03125, %v3695_v49 }
0x2f48   :  { %v3702_v1 = vadd.f32 1e-05, %v3698_v29  ;;  %v3703_v48 = vadd.f32 1e-05, %v3699_v41 }
0x2f4a   :  { %4711 = vrsqrt.f32 %v3702_v1 }
0x2f4b   :  { %4713 = vrsqrt.f32 %v3703_v48 }
0x2f4e   :  { %v4708_v0 = vpop.eup %4707 }
0x2f4f   :  { %v3708_v36 = vmul.f32 %v4708_v0, %v3676_v61 }
0x2f50   :  { %v4710_v16 = vpop.eup %4709 }
0x2f51   :  { %v3716_v38 = vmul.f32 %v3855_v53, %v3708_v36  ;;  %v3709_v39 = vmul.f32 %v4710_v16, %v3677_v7 }
0x2f53   :  { %v3717_v40 = vmul.f32 %v3855_v53, %v3709_v39  ;;  %v3724_v37 = vadd.f32 %v3856_v30, %v3716_v38 }
0x2f54   :  { %v4712_v43 = vpop.eup %4711 }
0x2f55   :  { %v4714_v44 = vpop.eup %4713  ;;  %v3710_v23 = vmul.f32 %v4712_v43, %v3678_v57  ;;  %v3725_v47 = vadd.f32 %v3856_v30, %v3717_v40  ;;  %3728 = vst.msk [vmem:[#allocation5] sm:$0xff] %vm204_vm5, %v3724_v37 }
0x2f56   :  { %v3711_v22 = vmul.f32 %v4714_v44, %v3679_v45 }
0x2f57   :  { %v3718_v55 = vmul.f32 %v3855_v53, %v3710_v23  ;;  %3729 = vst.msk [vmem:[#allocation5 + $0x8] sm:$0xff] %vm204_vm5, %v3725_v47 }
0x2f58   :  { %v3719_v2 = vmul.f32 %v3855_v53, %v3711_v22 }
0x2f59   :  { %v3726_v15 = vadd.f32 %v3856_v30, %v3718_v55 }
0x2f5a   :  { %v3727_v54 = vadd.f32 %v3856_v30, %v3719_v2 }
0x2f5b   :  { %3730 = vst.msk [vmem:[#allocation5 + $0x10] sm:$0xff] %vm204_vm5, %v3726_v15 }
0x2f5c   :  { %3731 = vst.msk [vmem:[#allocation5 + $0x18] sm:$0xff] %vm204_vm5, %v3727_v54 }
0x2f5d   :  { %4752 = shalt.err (!%p4749_p12)
}
0x2f5e   :  { %s4753_s2 = scalar_lea.hbm %s5733_s6, 512 }
0x2f5f   :  { %p4754_p13 = scmp.ne.s32.totalorder %s5733_s6, %s4753_s2  ;;  %p4757_p0 = scmp.lt.u32.totalorder %s4753_s2, %s5733_s6 }
0x2f61   :  { %p4759_p1 = pnand %p4757_p0, %p4754_p13 }
0x2f63   :  { %4762 = shalt.err (!%p4759_p1)
}
0x2f64   :  { %3743 = dma.vmem_to_hbm [thread:$0]  %s3738_s4, 512, %s5733_s6, [#allocation4], %s4768_s7, %s4768_s7, %s4769_s8  }
0x2f65   :  { %4765 = dma.done.wait [#allocation4], 512  }
0x2f66   :  { %4766 = vsyncadd [#allocation4], 4294966784 }
0x2f67   :  { %3747 = vsyncpa [#allocation3], 1 }
0x2f68   :  { %3748 = vsyncpa [#allocation4], 1 }

</bundles_post_ra>
